<compile_context>
chip_gen: v6e
topology: v6e:2x2x1
jax: 0.10.0
libtpu: 0.0.40
codegen_flags: <defaults>
</compile_context>

<pallas_src>
import functools
import math

import jax
import jax.numpy as jnp
from jax import lax
from jax.experimental import pallas as pl
from jax.experimental.pallas import tpu as pltpu

_NEG_BIG = -1e30  # finite "-inf" so the online max / exp never produces NaN


def _supcon_kernel(lab_q_ref, lab_k_ref, invp_ref, aq_ref, ak_ref, out_ref,
                   m_ref, l_ref, psum_ref, aqs_ref, *,
                   inv_temp, n_valid, n_padded):
    blk_q = aq_ref.shape[0]
    blk_k = ak_ref.shape[0]
    qi = pl.program_id(0)
    ki = pl.program_id(1)
    nk = pl.num_programs(1)
    padded = n_padded > n_valid  # static Python bool (trace-time branch)

    @pl.when(ki == 0)
    def _init():
        m_ref[...] = jnp.full(m_ref.shape, _NEG_BIG, dtype=m_ref.dtype)
        l_ref[...] = jnp.zeros_like(l_ref)
        psum_ref[...] = jnp.zeros_like(psum_ref)
        # Fold 1/temperature into the anchor tile once per row sweep: saves a
        # full (TQ, TK) VPU multiply on every grid step.
        aqs_ref[...] = (aq_ref[...] * inv_temp).astype(aqs_ref.dtype)

    # (TQ, TK) score tile: contract the feature dim of both operands directly
    # (no transpose of the contrast tile), accumulate in f32 on the MXU.
    s = lax.dot_general(
        aqs_ref[...], ak_ref[...],
        dimension_numbers=(((1,), (1,)), ((), ())),
        preferred_element_type=jnp.float32)

    # (TQ, 1) vs (1, TK) broadcasting compare -> (TQ, TK); no full iota planes.
    diff = lab_q_ref[...] != lab_k_ref[...]

    # --- positive-pair accumulator ---------------------------------------------
    # Same-label columns.  Self-pairs are removed by the diagonal correction
    # below; padded columns have all-zero features (s == 0) so they contribute
    # nothing; the positive COUNT is supplied from the wrapper (invp_ref).
    psum_ref[...] += jnp.sum(jnp.where(diff, 0.0, s), axis=1, keepdims=True)

    row0 = qi * blk_q
    col0 = ki * blk_k
    touches_diag = jnp.logical_and(row0 < col0 + blk_k, col0 < row0 + blk_q)

    @pl.when(touches_diag)
    def _drop_self_pairs():
        r_idx = lax.broadcasted_iota(jnp.int32, (blk_q, 1), 0) + row0
        c_idx = lax.broadcasted_iota(jnp.int32, (1, blk_k), 1) + col0
        on_diag = r_idx == c_idx                      # (TQ, TK) via broadcast
        psum_ref[...] -= jnp.sum(jnp.where(on_diag, s, 0.0), axis=1,
                                 keepdims=True)

    # --- online log-sum-exp over the negatives ----------------------------------
    def _online_lse(neg):
        m_prev = m_ref[...]
        s_neg = jnp.where(neg, s, _NEG_BIG)
        m_new = jnp.maximum(m_prev, jnp.max(s_neg, axis=1, keepdims=True))
        # The where() is load-bearing: a row with no negatives so far keeps
        # m == _NEG_BIG and exp(0) == 1 must not leak into l.
        p = jnp.where(neg, jnp.exp(s_neg - m_new), 0.0)
        l_ref[...] = (jnp.exp(m_prev - m_new) * l_ref[...]
                      + jnp.sum(p, axis=1, keepdims=True))
        m_ref[...] = m_new

    if padded:
        # Only the column tile(s) covering the padded tail pay for the
        # validity mask; every other tile runs the cheap path.
        has_pad_cols = (ki + 1) * blk_k > n_valid

        @pl.when(has_pad_cols)
        def _lse_tail():
            c_idx = lax.broadcasted_iota(jnp.int32, (1, blk_k), 1) + col0
            _online_lse(jnp.logical_and(diff, c_idx < n_valid))

        @pl.when(jnp.logical_not(has_pad_cols))
        def _lse_full():
            _online_lse(diff)
    else:
        _online_lse(diff)

    @pl.when(ki == nk - 1)
    def _finalize():
        # NOTE: like the PyTorch original, rows with no positives
        # (invp == inf, psum == 0 -> NaN) or no negatives (l == 0 -> -inf)
        # propagate NaN/inf; not guarded, to keep identical forward semantics.
        lse_neg = m_ref[...] + jnp.log(l_ref[...])
        out_ref[...] = psum_ref[...] * invp_ref[...] - lse_neg


def _round_up(x, m):
    return ((x + m - 1) // m) * m


def _halve_tile(t):
    return max(128, (t // 2) // 128 * 128)


def _clamp_tile(t, n_min):
    while t > n_min and t > 128:
        t = _halve_tile(t)
    return t


def _generation_defaults():
    """Returns (name, default TQ, default TK, VMEM budget bytes, force >=2 row tiles)."""
    try:
        kind = jax.devices()[0].device_kind.lower()
    except Exception:
        kind = ""
    if "v7" in kind:
        return "v7x", 512, 256, 44 << 20, True    # 64 MiB physical VMEM, 2 TCs
    if "v6" in kind:
        return "v6e", 512, 256, 100 << 20, False  # 128 MiB physical VMEM
    if "v5p" in kind:
        return "v5p", 512, 256, 100 << 20, False
    if "v5" in kind or "v4" in kind:              # v5e / v4: 128x128 MXUs
        return "v5e", 256, 256, 100 << 20, False
    return "unknown", 256, 256, 40 << 20, False   # conservative, safe everywhere


class NNSupConLossPallas:
    """Pallas TPU port of NNSupConLoss (contrast_mode='all').

    compute_dtype defaults to bfloat16 (halves HBM traffic and runs the MXU at
    full rate; accumulation stays f32).  Pass compute_dtype=jnp.float32 (or
    None to preserve the input dtype) for bit-closer agreement with the f32
    PyTorch forward.
    """

    def __init__(self, temperature=0.07, contrast_mode='all',
                 base_temperature=0.07, tile_q=None, tile_k=None,
                 compute_dtype=jnp.bfloat16, contrast_buffers=2):
        if contrast_mode != 'all':
            # TODO(synk): contrast_mode='one' (anchor = view 0 only) not implemented.
            raise ValueError("only contrast_mode='all' is implemented")
        for t in (tile_q, tile_k):
            if t is not None and (t <= 0 or t % 128 != 0):
                raise ValueError("tile sizes must be positive multiples of 128")
        self.temperature = float(temperature)
        self.base_temperature = float(base_temperature)
        self.tile_q = tile_q
        self.tile_k = tile_k
        self.compute_dtype = compute_dtype
        self.contrast_buffers = int(contrast_buffers)  # sweepable pipeline depth for ak

    # ---------------------------------------------------------------- tiling --
    def _plan_tiles(self, n, d, itemsize):
        d_pad = _round_up(d, 128)
        n_min = _round_up(n, 128)
        _, tq_def, tk_def, budget, want_two_row_tiles = _generation_defaults()
        tq = self.tile_q if self.tile_q is not None else tq_def
        tk = self.tile_k if self.tile_k is not None else tk_def
        tq = _clamp_tile(tq, n_min)
        tk = _clamp_tile(tk, n_min)

        # VMEM audit: aq is double-buffered + held once pre-scaled (scratch),
        # ak is double-buffered.  Shrink TK first (TQ is the data-reuse lever).
        def est(tq_, tk_):
            feat = (3 * tq_ + 2 * tk_) * d_pad * itemsize
            narrow = (4 * tq_ + tk_) * 128 * 4 * 2  # labels/invp/out/scratch, lane-padded
            return feat + narrow + (2 << 20)        # slack for internal scratch

        while est(tq, tk) > budget and (tq > 128 or tk > 128):
            if tk > 128:
                tk = _halve_tile(tk)
            else:
                tq = _halve_tile(tq)
        # TODO(synk): for very large D (est > budget even at 128x128 tiles) add a
        # third grid axis over D with an f32 (TQ, TK) score-accumulator scratch.

        n_pad = _round_up(n, math.lcm(tq, tk))
        if want_two_row_tiles:
            while tq > 128 and n_pad // tq < 2:  # keep both v7x TensorCores busy
                tq = _halve_tile(tq)
            n_pad = _round_up(n, math.lcm(tq, tk))

        vmem_limit = int(min(budget, max(32 << 20, est(tq, tk) + (8 << 20))))
        return tq, tk, n_pad, d_pad, vmem_limit

    # --------------------------------------------------------------- forward --
    def __call__(self, features, labels=None, mask=None):
        if features.ndim < 3:
            raise ValueError("`features` needs to be [bsz, n_views, ...]")
        if labels is not None and mask is not None:
            raise ValueError("Cannot define both `labels` and `mask`")
        if mask is not None:
            # TODO(synk): explicit (possibly asymmetric) bsz x bsz mask not implemented.
            raise NotImplementedError("explicit `mask` is not implemented")

        bsz, n_views = features.shape[0], features.shape[1]
        feat = features.reshape(bsz, n_views, -1)
        d = feat.shape[-1]
        n = bsz * n_views

        cdtype = self.compute_dtype if self.compute_dtype is not None else feat.dtype
        # Sample-major row order (loss is invariant to row ordering) -> no
        # view-major transpose/copy of the original formulation.
        contrast = feat.reshape(n, d).astype(cdtype)

        if labels is None:
            labels = jnp.arange(bsz, dtype=jnp.int32)  # SimCLR: eye(bsz) mask
        labels = jnp.asarray(labels, dtype=jnp.int32).reshape(-1)
        if labels.shape[0] != bsz:
            raise ValueError("Num of labels does not match num of features")
        labels_full = jnp.repeat(labels, n_views)      # (N,)

        # Positive counts are a pure function of the labels: O(bsz^2) in JAX,
        # removing the pcnt accumulator (bool->f32 cast + XLU reduce) per tile.
        per_label = jnp.sum((labels[:, None] == labels[None, :]).astype(jnp.int32),
                            axis=1)
        pos_cnt = (per_label * n_views - 1).astype(jnp.float32)
        inv_pcnt = jnp.repeat(1.0 / pos_cnt, n_views)  # inf when no positives (-> NaN, like torch)

        itemsize = jnp.dtype(cdtype).itemsize
        tq, tk, n_pad, d_pad, vmem_limit = self._plan_tiles(n, d, itemsize)

        a = jnp.pad(contrast, ((0, n_pad - n), (0, d_pad - d)))
        lab_pad = jnp.pad(labels_full, (0, n_pad - n))
        lab_q = lab_pad.reshape(n_pad, 1)
        lab_k = lab_pad.reshape(1, n_pad)              # lane-dense label row
        invp = jnp.pad(inv_pcnt, (0, n_pad - n)).reshape(n_pad, 1)

        kernel = functools.partial(
            _supcon_kernel,
            inv_temp=1.0 / self.temperature,
            n_valid=n, n_padded=n_pad)

        grid = (n_pad // tq, n_pad // tk)

        ak_spec = pl.BlockSpec((tk, d_pad), lambda qi, ki: (ki, 0))
        if self.contrast_buffers != 2:
            try:  # sweepable: deeper pipelining on the only per-step-streamed operand
                ak_spec = pl.BlockSpec((tk, d_pad), lambda qi, ki: (ki, 0),
                                       pipeline_mode=pl.Buffered(self.contrast_buffers))
            except (TypeError, AttributeError):
                pass

        cost = pl.CostEstimate(
            flops=2 * n_pad * n_pad * d_pad,
            transcendentals=n_pad * n_pad,
            bytes_accessed=int((grid[0] + 1) * n_pad * d_pad * itemsize
                               + 16 * n_pad))

        per_row = pl.pallas_call(
            kernel,
            out_shape=jax.ShapeDtypeStruct((n_pad, 1), jnp.float32),
            grid_spec=pltpu.PrefetchScalarGridSpec(
                num_scalar_prefetch=0,
                grid=grid,
                in_specs=[
                    pl.BlockSpec((tq, 1), lambda qi, ki: (qi, 0)),      # anchor labels
                    pl.BlockSpec((1, tk), lambda qi, ki: (0, ki)),      # contrast labels
                    pl.BlockSpec((tq, 1), lambda qi, ki: (qi, 0)),      # 1 / pos-count
                    pl.BlockSpec((tq, d_pad), lambda qi, ki: (qi, 0)),  # anchor tile
                    ak_spec,                                            # contrast tile
                ],
                out_specs=pl.BlockSpec((tq, 1), lambda qi, ki: (qi, 0)),
                scratch_shapes=[pltpu.VMEM((tq, 1), jnp.float32)] * 3   # m, l, psum
                             + [pltpu.VMEM((tq, d_pad), cdtype)],       # pre-scaled aq
            ),
            compiler_params=pltpu.CompilerParams(
                dimension_semantics=("parallel", "arbitrary"),
                vmem_limit_bytes=vmem_limit),
            cost_estimate=cost,
        )(lab_q, lab_k, invp, a, a)

        # Tiny final reduction in JAX over the N valid rows (padded rows dropped).
        total = jnp.sum(per_row[:n, 0])
        return -(self.temperature / self.base_temperature) * total / n


def _reference_supcon(features, labels=None, temperature=0.07,
                      base_temperature=0.07):
    """Pure-JAX mirror of the PyTorch forward (contrast_mode='all')."""
    bsz, n_views = features.shape[0], features.shape[1]
    feat = features.reshape(bsz, n_views, -1).astype(jnp.float32)
    if labels is None:
        mask = jnp.eye(bsz, dtype=jnp.float32)
    else:
        labels = jnp.asarray(labels).reshape(-1, 1)
        mask = (labels == labels.T).astype(jnp.float32)
    contrast = jnp.concatenate([feat[:, v] for v in range(n_views)], axis=0)
    n = bsz * n_views
    adc = jnp.matmul(contrast, contrast.T,
                     precision=lax.Precision.HIGHEST) / temperature
    logits = adc - jnp.max(adc, axis=1, keepdims=True)
    mask = jnp.tile(mask, (n_views, n_views))
    logits_mask = 1.0 - jnp.eye(n, dtype=jnp.float32)
    mask = mask * logits_mask
    neg_mask = (mask == 0).astype(jnp.float32) * logits_mask
    exp_logits = jnp.exp(logits) * neg_mask
    log_prob = logits - jnp.log(jnp.sum(exp_logits, axis=1, keepdims=True))
    mlpp = jnp.sum(mask * log_prob, axis=1) / jnp.sum(mask, axis=1)
    loss = -(temperature / base_temperature) * mlpp
    return jnp.mean(loss.reshape(n_views, bsz))


if __name__ == "__main__":
    key = jax.random.PRNGKey(0)
    k1, k2, k3, k4 = jax.random.split(key, 4)

    # f32 compute path: strict agreement with the f32 reference.
    loss_f32 = NNSupConLossPallas(temperature=0.07, base_temperature=0.07,
                                  compute_dtype=jnp.float32)
    # default (bf16 features, f32 accumulation): looser tolerance.
    loss_bf16 = NNSupConLossPallas(temperature=0.07, base_temperature=0.07)
    # decoupled TQ != TK path (exercises rectangular tiles + diag correction).
    loss_rect = NNSupConLossPallas(temperature=0.07, base_temperature=0.07,
                                   tile_q=128, tile_k=256,
                                   compute_dtype=jnp.float32)

    # Case 1: N=192 (padded), D=72 -> padded to 128.
    bsz, n_views, dim = 96, 2, 72
    features = jax.random.normal(k1, (bsz, n_views, dim), dtype=jnp.float32)
    features = features / jnp.linalg.norm(features, axis=-1, keepdims=True)
    labels = jax.random.randint(k2, (bsz,), 0, 4, dtype=jnp.int32)

    ref_sup = _reference_supcon(features, labels)
    ref_simclr = _reference_supcon(features)

    out_sup = jax.block_until_ready(loss_f32(features, labels))
    out_simclr = jax.block_until_ready(loss_f32(features))          # SimCLR path
    assert jnp.allclose(out_sup, ref_sup, rtol=1e-3, atol=1e-3), (out_sup, ref_sup)
    assert jnp.allclose(out_simclr, ref_simclr, rtol=1e-3, atol=1e-3), \
        (out_simclr, ref_simclr)

    out_rect = jax.block_until_ready(loss_rect(features, labels))   # TQ=128, TK=256
    assert jnp.allclose(out_rect, ref_sup, rtol=1e-3, atol=1e-3), (out_rect, ref_sup)

    out_bf16 = jax.block_until_ready(loss_bf16(features, labels))   # bf16 fast path
    assert jnp.allclose(out_bf16, ref_sup, rtol=2e-2, atol=2e-2), (out_bf16, ref_sup)

    # Case 2: small, heavily padded (N=16 and D=40 inside a single 128 tile).
    bsz2, n_views2, dim2 = 8, 2, 40
    f2 = jax.random.normal(k3, (bsz2, n_views2, dim2), dtype=jnp.float32)
    f2 = f2 / jnp.linalg.norm(f2, axis=-1, keepdims=True)
    l2 = jnp.arange(bsz2, dtype=jnp.int32) % 3
    out2 = jax.block_until_ready(loss_f32(f2, l2))
    ref2 = _reference_supcon(f2, l2)
    assert jnp.allclose(out2, ref2, rtol=1e-3, atol=1e-3), (out2, ref2)

    # Case 3: exactly tile-aligned (N=128, D=128) -> exercises the no-padding path.
    bsz3, n_views3, dim3 = 64, 2, 128
    f3 = jax.random.normal(k4, (bsz3, n_views3, dim3), dtype=jnp.float32)
    f3 = f3 / jnp.linalg.norm(f3, axis=-1, keepdims=True)
    l3 = jnp.arange(bsz3, dtype=jnp.int32) % 5
    out3 = jax.block_until_ready(loss_f32(f3, l3))
    ref3 = _reference_supcon(f3, l3)
    assert jnp.allclose(out3, ref3, rtol=1e-3, atol=1e-3), (out3, ref3)

    print("KERNEL_OK")
</pallas_src>

<mosaic_0001>
module attributes {stable_mosaic.version = 11 : i64} {
  func.func @_supcon_kernel(%arg0: i32, %arg1: i32, %arg2: memref<256x1xi32, #tpu.memory_space<vmem>>, %arg3: memref<1x256xi32, #tpu.memory_space<vmem>>, %arg4: memref<256x1xf32, #tpu.memory_space<vmem>>, %arg5: memref<256x128xf32, #tpu.memory_space<vmem>>, %arg6: memref<256x128xf32, #tpu.memory_space<vmem>>, %arg7: memref<256x1xf32, #tpu.memory_space<vmem>>, %arg8: memref<256x1xf32, #tpu.memory_space<vmem>>, %arg9: memref<256x1xf32, #tpu.memory_space<vmem>>, %arg10: memref<256x1xf32, #tpu.memory_space<vmem>>, %arg11: memref<256x128xf32, #tpu.memory_space<vmem>>) attributes {dimension_semantics = [#tpu.dimension_semantics<parallel>, #tpu.dimension_semantics<arbitrary>], iteration_bounds = array<i64: 1, 1>, scalar_prefetch = 0 : i64, scratch_operands = 4 : i64, tpu.core_type = #tpu.core_type<tc>, window_params = [{transform_indices = @transform_0, window_bounds = array<i64: 256, 1>}, {transform_indices = @transform_1, window_bounds = array<i64: 1, 256>}, {transform_indices = @transform_2, window_bounds = array<i64: 256, 1>}, {transform_indices = @transform_3, window_bounds = array<i64: 256, 128>}, {transform_indices = @transform_4, window_bounds = array<i64: 256, 128>}, {transform_indices = @transform_5, window_bounds = array<i64: 256, 1>}]} {
    %c0_i32 = arith.constant 0 : i32
    %0 = arith.cmpi eq, %arg1, %c0_i32 : i32
    %1 = arith.extui %0 : i1 to i32
    %c0_i32_0 = arith.constant 0 : i32
    %2 = arith.cmpi ne, %1, %c0_i32_0 : i32
    scf.if %2 {
      %cst_23 = arith.constant -1.000000e+30 : f32
      %38 = vector.broadcast %cst_23 : f32 to vector<256x1xf32>
      %c0_24 = arith.constant 0 : index
      %c0_25 = arith.constant 0 : index
      %39 = vector.load %arg8[%c0_24, %c0_25] : memref<256x1xf32, #tpu.memory_space<vmem>>, vector<256x1xf32>
      tpu.vector_store %arg8[%c0_24, %c0_25], %38 {strides = array<i32>} : memref<256x1xf32, #tpu.memory_space<vmem>>, vector<256x1xf32>,
      %cst_26 = arith.constant 0.000000e+00 : f32
      %40 = vector.broadcast %cst_26 : f32 to vector<256x1xf32>
      %c0_27 = arith.constant 0 : index
      %c0_28 = arith.constant 0 : index
      %41 = vector.load %arg9[%c0_27, %c0_28] : memref<256x1xf32, #tpu.memory_space<vmem>>, vector<256x1xf32>
      tpu.vector_store %arg9[%c0_27, %c0_28], %40 {strides = array<i32>} : memref<256x1xf32, #tpu.memory_space<vmem>>, vector<256x1xf32>,
      %cst_29 = arith.constant 0.000000e+00 : f32
      %42 = vector.broadcast %cst_29 : f32 to vector<256x1xf32>
      %c0_30 = arith.constant 0 : index
      %c0_31 = arith.constant 0 : index
      %43 = vector.load %arg10[%c0_30, %c0_31] : memref<256x1xf32, #tpu.memory_space<vmem>>, vector<256x1xf32>
      tpu.vector_store %arg10[%c0_30, %c0_31], %42 {strides = array<i32>} : memref<256x1xf32, #tpu.memory_space<vmem>>, vector<256x1xf32>,
      %c0_32 = arith.constant 0 : index
      %c0_33 = arith.constant 0 : index
      %44 = vector.load %arg5[%c0_32, %c0_33] : memref<256x128xf32, #tpu.memory_space<vmem>>, vector<256x128xf32>
      %cst_34 = arith.constant 14.2857141 : f32
      %45 = vector.broadcast %cst_34 : f32 to vector<256x128xf32>
      %46 = arith.mulf %44, %45 : vector<256x128xf32>
      %c0_35 = arith.constant 0 : index
      %c0_36 = arith.constant 0 : index
      %47 = vector.load %arg11[%c0_35, %c0_36] : memref<256x128xf32, #tpu.memory_space<vmem>>, vector<256x128xf32>
      tpu.vector_store %arg11[%c0_35, %c0_36], %46 {strides = array<i32>} : memref<256x128xf32, #tpu.memory_space<vmem>>, vector<256x128xf32>,
    } else {
    }
    %c0 = arith.constant 0 : index
    %c0_1 = arith.constant 0 : index
    %3 = vector.load %arg11[%c0, %c0_1] : memref<256x128xf32, #tpu.memory_space<vmem>>, vector<256x128xf32>
    %c0_2 = arith.constant 0 : index
    %c0_3 = arith.constant 0 : index
    %4 = vector.load %arg6[%c0_2, %c0_3] : memref<256x128xf32, #tpu.memory_space<vmem>>, vector<256x128xf32>
    %cst = arith.constant dense<0.000000e+00> : vector<256x256xf32>
    %5 = tpu.matmul %3, %4, %cst {dimension_numbers = #tpu.dot_dimension_numbers<[1], [1], [0], [0], [0, 0, 1, 0], [], []>} : vector<256x128xf32>, vector<256x128xf32>, vector<256x256xf32> -> vector<256x256xf32>
    %c0_4 = arith.constant 0 : index
    %c0_5 = arith.constant 0 : index
    %6 = vector.load %arg2[%c0_4, %c0_5] : memref<256x1xi32, #tpu.memory_space<vmem>>, vector<256x1xi32>
    %c0_6 = arith.constant 0 : index
    %c0_7 = arith.constant 0 : index
    %7 = vector.load %arg3[%c0_6, %c0_7] : memref<1x256xi32, #tpu.memory_space<vmem>>, vector<1x256xi32>
    %8 = vector.broadcast %6 : vector<256x1xi32> to vector<256x256xi32>
    %9 = vector.broadcast %7 : vector<1x256xi32> to vector<256x256xi32>
    %10 = arith.cmpi ne, %8, %9 : vector<256x256xi32>
    %c0_8 = arith.constant 0 : index
    %c0_9 = arith.constant 0 : index
    %11 = vector.load %arg10[%c0_8, %c0_9] : memref<256x1xf32, #tpu.memory_space<vmem>>, vector<256x1xf32>
    %cst_10 = arith.constant 0.000000e+00 : f32
    %12 = vector.broadcast %cst_10 : f32 to vector<256x256xf32>
    %13 = arith.select %10, %12, %5 : vector<256x256xi1>, vector<256x256xf32>
    %cst_11 = arith.constant dense<0.000000e+00> : vector<256xf32>
    %14 = vector.multi_reduction <add>, %13, %cst_11 [1] : vector<256x256xf32> to vector<256xf32>
    %15 = vector.shape_cast %14 : vector<256xf32> to vector<256x1xf32>
    %16 = arith.addf %11, %15 : vector<256x1xf32>
    %c0_12 = arith.constant 0 : index
    %c0_13 = arith.constant 0 : index
    %17 = vector.load %arg10[%c0_12, %c0_13] : memref<256x1xf32, #tpu.memory_space<vmem>>, vector<256x1xf32>
    tpu.vector_store %arg10[%c0_12, %c0_13], %16 {strides = array<i32>} : memref<256x1xf32, #tpu.memory_space<vmem>>, vector<256x1xf32>,
    %c256_i32 = arith.constant 256 : i32
    %18 = arith.muli %arg0, %c256_i32 : i32
    %c256_i32_14 = arith.constant 256 : i32
    %19 = arith.muli %arg1, %c256_i32_14 : i32
    %c256_i32_15 = arith.constant 256 : i32
    %20 = arith.addi %19, %c256_i32_15 : i32
    %21 = arith.cmpi slt, %18, %20 : i32
    %c256_i32_16 = arith.constant 256 : i32
    %22 = arith.addi %18, %c256_i32_16 : i32
    %23 = arith.cmpi slt, %19, %22 : i32
    %24 = arith.andi %21, %23 : i1
    %25 = arith.extui %24 : i1 to i32
    %c0_i32_17 = arith.constant 0 : i32
    %26 = arith.cmpi ne, %25, %c0_i32_17 : i32
    scf.if %26 {
      %38 = tpu.iota {dimensions = array<i32: 0>} : vector<256x1xi32>
      %39 = vector.broadcast %18 : i32 to vector<256x1xi32>
      %40 = arith.addi %38, %39 : vector<256x1xi32>
      %41 = tpu.iota {dimensions = array<i32: 1>} : vector<1x256xi32>
      %42 = vector.broadcast %19 : i32 to vector<1x256xi32>
      %43 = arith.addi %41, %42 : vector<1x256xi32>
      %44 = vector.broadcast %40 : vector<256x1xi32> to vector<256x256xi32>
      %45 = vector.broadcast %43 : vector<1x256xi32> to vector<256x256xi32>
      %46 = arith.cmpi eq, %44, %45 : vector<256x256xi32>
      %c0_23 = arith.constant 0 : index
      %c0_24 = arith.constant 0 : index
      %47 = vector.load %arg10[%c0_23, %c0_24] : memref<256x1xf32, #tpu.memory_space<vmem>>, vector<256x1xf32>
      %cst_25 = arith.constant 0.000000e+00 : f32
      %48 = vector.broadcast %cst_25 : f32 to vector<256x256xf32>
      %49 = arith.select %46, %5, %48 : vector<256x256xi1>, vector<256x256xf32>
      %cst_26 = arith.constant dense<0.000000e+00> : vector<256xf32>
      %50 = vector.multi_reduction <add>, %49, %cst_26 [1] : vector<256x256xf32> to vector<256xf32>
      %51 = vector.shape_cast %50 : vector<256xf32> to vector<256x1xf32>
      %52 = arith.subf %47, %51 : vector<256x1xf32>
      %c0_27 = arith.constant 0 : index
      %c0_28 = arith.constant 0 : index
      %53 = vector.load %arg10[%c0_27, %c0_28] : memref<256x1xf32, #tpu.memory_space<vmem>>, vector<256x1xf32>
      tpu.vector_store %arg10[%c0_27, %c0_28], %52 {strides = array<i32>} : memref<256x1xf32, #tpu.memory_space<vmem>>, vector<256x1xf32>,
    } else {
    }
    %c1_i32 = arith.constant 1 : i32
    %27 = arith.addi %arg1, %c1_i32 : i32
    %c256_i32_18 = arith.constant 256 : i32
    %28 = arith.muli %27, %c256_i32_18 : i32
    %c192_i32 = arith.constant 192 : i32
    %29 = arith.cmpi sgt, %28, %c192_i32 : i32
    %30 = arith.extui %29 : i1 to i32
    %c0_i32_19 = arith.constant 0 : i32
    %31 = arith.cmpi ne, %30, %c0_i32_19 : i32
    scf.if %31 {
      %38 = tpu.iota {dimensions = array<i32: 1>} : vector<1x256xi32>
      %39 = vector.broadcast %19 : i32 to vector<1x256xi32>
      %40 = arith.addi %38, %39 : vector<1x256xi32>
      %c192_i32_23 = arith.constant 192 : i32
      %41 = vector.broadcast %c192_i32_23 : i32 to vector<1x256xi32>
      %42 = arith.cmpi slt, %40, %41 : vector<1x256xi32>
      %43 = vector.broadcast %42 : vector<1x256xi1> to vector<256x256xi1>
      %44 = arith.andi %10, %43 : vector<256x256xi1>
      %c0_24 = arith.constant 0 : index
      %c0_25 = arith.constant 0 : index
      %45 = vector.load %arg8[%c0_24, %c0_25] : memref<256x1xf32, #tpu.memory_space<vmem>>, vector<256x1xf32>
      %cst_26 = arith.constant -1.000000e+30 : f32
      %46 = vector.broadcast %cst_26 : f32 to vector<256x256xf32>
      %47 = arith.select %44, %5, %46 : vector<256x256xi1>, vector<256x256xf32>
      %cst_27 = arith.constant dense<0xFF800000> : vector<256xf32>
      %48 = vector.multi_reduction <maximumf>, %47, %cst_27 [1] : vector<256x256xf32> to vector<256xf32>
      %49 = vector.shape_cast %48 : vector<256xf32> to vector<256x1xf32>
      %50 = arith.maximumf %45, %49 : vector<256x1xf32>
      %51 = vector.broadcast %50 : vector<256x1xf32> to vector<256x256xf32>
      %52 = arith.subf %47, %51 : vector<256x256xf32>
      %53 = math.exp %52 : vector<256x256xf32>
      %cst_28 = arith.constant 0.000000e+00 : f32
      %54 = vector.broadcast %cst_28 : f32 to vector<256x256xf32>
      %55 = arith.select %44, %53, %54 : vector<256x256xi1>, vector<256x256xf32>
      %56 = arith.subf %45, %50 : vector<256x1xf32>
      %57 = math.exp %56 : vector<256x1xf32>
      %c0_29 = arith.constant 0 : index
      %c0_30 = arith.constant 0 : index
      %58 = vector.load %arg9[%c0_29, %c0_30] : memref<256x1xf32, #tpu.memory_space<vmem>>, vector<256x1xf32>
      %59 = arith.mulf %57, %58 : vector<256x1xf32>
      %cst_31 = arith.constant dense<0.000000e+00> : vector<256xf32>
      %60 = vector.multi_reduction <add>, %55, %cst_31 [1] : vector<256x256xf32> to vector<256xf32>
      %61 = vector.shape_cast %60 : vector<256xf32> to vector<256x1xf32>
      %62 = arith.addf %59, %61 : vector<256x1xf32>
      %c0_32 = arith.constant 0 : index
      %c0_33 = arith.constant 0 : index
      %63 = vector.load %arg9[%c0_32, %c0_33] : memref<256x1xf32, #tpu.memory_space<vmem>>, vector<256x1xf32>
      tpu.vector_store %arg9[%c0_32, %c0_33], %62 {strides = array<i32>} : memref<256x1xf32, #tpu.memory_space<vmem>>, vector<256x1xf32>,
      %c0_34 = arith.constant 0 : index
      %c0_35 = arith.constant 0 : index
      %64 = vector.load %arg8[%c0_34, %c0_35] : memref<256x1xf32, #tpu.memory_space<vmem>>, vector<256x1xf32>
      tpu.vector_store %arg8[%c0_34, %c0_35], %50 {strides = array<i32>} : memref<256x1xf32, #tpu.memory_space<vmem>>, vector<256x1xf32>,
    } else {
    }
    %true = arith.constant true
    %32 = arith.xori %29, %true : i1
    %33 = arith.extui %32 : i1 to i32
    %c0_i32_20 = arith.constant 0 : i32
    %34 = arith.cmpi ne, %33, %c0_i32_20 : i32
    scf.if %34 {
      %c0_23 = arith.constant 0 : index
      %c0_24 = arith.constant 0 : index
      %38 = vector.load %arg8[%c0_23, %c0_24] : memref<256x1xf32, #tpu.memory_space<vmem>>, vector<256x1xf32>
      %cst_25 = arith.constant -1.000000e+30 : f32
      %39 = vector.broadcast %cst_25 : f32 to vector<256x256xf32>
      %40 = arith.select %10, %5, %39 : vector<256x256xi1>, vector<256x256xf32>
      %cst_26 = arith.constant dense<0xFF800000> : vector<256xf32>
      %41 = vector.multi_reduction <maximumf>, %40, %cst_26 [1] : vector<256x256xf32> to vector<256xf32>
      %42 = vector.shape_cast %41 : vector<256xf32> to vector<256x1xf32>
      %43 = arith.maximumf %38, %42 : vector<256x1xf32>
      %44 = vector.broadcast %43 : vector<256x1xf32> to vector<256x256xf32>
      %45 = arith.subf %40, %44 : vector<256x256xf32>
      %46 = math.exp %45 : vector<256x256xf32>
      %cst_27 = arith.constant 0.000000e+00 : f32
      %47 = vector.broadcast %cst_27 : f32 to vector<256x256xf32>
      %48 = arith.select %10, %46, %47 : vector<256x256xi1>, vector<256x256xf32>
      %49 = arith.subf %38, %43 : vector<256x1xf32>
      %50 = math.exp %49 : vector<256x1xf32>
      %c0_28 = arith.constant 0 : index
      %c0_29 = arith.constant 0 : index
      %51 = vector.load %arg9[%c0_28, %c0_29] : memref<256x1xf32, #tpu.memory_space<vmem>>, vector<256x1xf32>
      %52 = arith.mulf %50, %51 : vector<256x1xf32>
      %cst_30 = arith.constant dense<0.000000e+00> : vector<256xf32>
      %53 = vector.multi_reduction <add>, %48, %cst_30 [1] : vector<256x256xf32> to vector<256xf32>
      %54 = vector.shape_cast %53 : vector<256xf32> to vector<256x1xf32>
      %55 = arith.addf %52, %54 : vector<256x1xf32>
      %c0_31 = arith.constant 0 : index
      %c0_32 = arith.constant 0 : index
      %56 = vector.load %arg9[%c0_31, %c0_32] : memref<256x1xf32, #tpu.memory_space<vmem>>, vector<256x1xf32>
      tpu.vector_store %arg9[%c0_31, %c0_32], %55 {strides = array<i32>} : memref<256x1xf32, #tpu.memory_space<vmem>>, vector<256x1xf32>,
      %c0_33 = arith.constant 0 : index
      %c0_34 = arith.constant 0 : index
      %57 = vector.load %arg8[%c0_33, %c0_34] : memref<256x1xf32, #tpu.memory_space<vmem>>, vector<256x1xf32>
      tpu.vector_store %arg8[%c0_33, %c0_34], %43 {strides = array<i32>} : memref<256x1xf32, #tpu.memory_space<vmem>>, vector<256x1xf32>,
    } else {
    }
    %c0_i32_21 = arith.constant 0 : i32
    %35 = arith.cmpi eq, %arg1, %c0_i32_21 : i32
    %36 = arith.extui %35 : i1 to i32
    %c0_i32_22 = arith.constant 0 : i32
    %37 = arith.cmpi ne, %36, %c0_i32_22 : i32
    scf.if %37 {
      %c0_23 = arith.constant 0 : index
      %c0_24 = arith.constant 0 : index
      %38 = vector.load %arg8[%c0_23, %c0_24] : memref<256x1xf32, #tpu.memory_space<vmem>>, vector<256x1xf32>
      %c0_25 = arith.constant 0 : index
      %c0_26 = arith.constant 0 : index
      %39 = vector.load %arg9[%c0_25, %c0_26] : memref<256x1xf32, #tpu.memory_space<vmem>>, vector<256x1xf32>
      %40 = math.log %39 : vector<256x1xf32>
      %41 = arith.addf %38, %40 : vector<256x1xf32>
      %c0_27 = arith.constant 0 : index
      %c0_28 = arith.constant 0 : index
      %42 = vector.load %arg10[%c0_27, %c0_28] : memref<256x1xf32, #tpu.memory_space<vmem>>, vector<256x1xf32>
      %c0_29 = arith.constant 0 : index
      %c0_30 = arith.constant 0 : index
      %43 = vector.load %arg4[%c0_29, %c0_30] : memref<256x1xf32, #tpu.memory_space<vmem>>, vector<256x1xf32>
      %44 = arith.mulf %42, %43 : vector<256x1xf32>
      %45 = arith.subf %44, %41 : vector<256x1xf32>
      %c0_31 = arith.constant 0 : index
      %c0_32 = arith.constant 0 : index
      %46 = vector.load %arg7[%c0_31, %c0_32] : memref<256x1xf32, #tpu.memory_space<vmem>>, vector<256x1xf32>
      tpu.vector_store %arg7[%c0_31, %c0_32], %45 {strides = array<i32>} : memref<256x1xf32, #tpu.memory_space<vmem>>, vector<256x1xf32>,
    } else {
    }
    return
  }
  func.func @transform_0(%arg0: i32, %arg1: i32) -> (i32, i32) {
    %c0_i32 = arith.constant 0 : i32
    %c0_i32_0 = arith.constant 0 : i32
    return %arg0, %c0_i32 : i32, i32
  }
  func.func @transform_1(%arg0: i32, %arg1: i32) -> (i32, i32) {
    %c0_i32 = arith.constant 0 : i32
    %c0_i32_0 = arith.constant 0 : i32
    return %c0_i32, %arg1 : i32, i32
  }
  func.func @transform_2(%arg0: i32, %arg1: i32) -> (i32, i32) {
    %c0_i32 = arith.constant 0 : i32
    %c0_i32_0 = arith.constant 0 : i32
    return %arg0, %c0_i32 : i32, i32
  }
  func.func @transform_3(%arg0: i32, %arg1: i32) -> (i32, i32) {
    %c0_i32 = arith.constant 0 : i32
    %c0_i32_0 = arith.constant 0 : i32
    return %arg0, %c0_i32 : i32, i32
  }
  func.func @transform_4(%arg0: i32, %arg1: i32) -> (i32, i32) {
    %c0_i32 = arith.constant 0 : i32
    %c0_i32_0 = arith.constant 0 : i32
    return %arg1, %c0_i32 : i32, i32
  }
  func.func @transform_5(%arg0: i32, %arg1: i32) -> (i32, i32) {
    %c0_i32 = arith.constant 0 : i32
    %c0_i32_0 = arith.constant 0 : i32
    return %arg0, %c0_i32 : i32, i32
  }
}

</mosaic_0001>

<bundles_post_ra>
// kernel: tpu_custom_call.1
= control target key start
LH: loop header
LB: loop body
LE: loop exit
PB: predicated region body
PF: predicated region fallthrough
CT: control target
= control target key end

     0   :  { %v4184_v3 = vmov 0   ;;  %s6850_s4 = inlined_call_operand.vmem [shape: f32[256,128], index: 4, kind: input, shape index: {}]   ;;  %s6851_s0 = inlined_call_operand.vmem [shape: s32[256,1], index: 0, kind: input, shape index: {}]   ;;  %s6852_s3 = inlined_call_operand.vmem [shape: f32[256,128], index: 3, kind: input, shape index: {}]   ;;  %s6853_s1 = inlined_call_operand.vmem [shape: s32[1,256], index: 1, kind: input, shape index: {}]   ;;  %s6854_s2 = inlined_call_operand.vmem [shape: f32[256,1], index: 2, kind: input, shape index: {}]   ;;  %s6855_s5 = inlined_call_operand.vmem [shape: f32[256,1], index: 5, kind: output, shape index: {}]  }
   0x1   :  { %v280_v0 = vld [vmem:[%s6850_s4 + $0xf8] sm:$0xff]  ;;  %v279_v2 = vld [vmem:[%s6850_s4 + $0xf0] sm:$0xff]  ;;  %3927 = vset.pattern.permute.xlu1 %v4184_v3  ;;  %3926 = vset.pattern.permute.xlu0 %v4184_v3  ;;  %v278_v5 = vld [vmem:[%s6850_s4 + $0xe8] sm:$0xff] }
   0x2   :  { %v264_v1 = vld [vmem:[%s6850_s4 + $0x78] sm:$0xff]  ;;  %3795 = vmatprep.subr.mxu0 %v280_v0  ;;  %3891 = vmatprep.subr.mxu1 %v280_v0  ;;  %v263_v4 = vld [vmem:[%s6850_s4 + $0x70] sm:$0xff]  ;;  %v262_v6 = vld [vmem:[%s6850_s4 + $0x68] sm:$0xff] }
   0x3   :  { %3796 = vmatpush3.xpose.msra.mxu0 %v264_v1  ;;  %3907 = vmatpush3.xpose.msra.mxu1 %v264_v1  ;;  %v277_v7 = vld [vmem:[%s6850_s4 + $0xe0] sm:$0xff]  ;;  %v540_v8 = vld [vmem:[%s6851_s0 + $0x10] sm:$0xff]  ;;  %v276_v11 = vld [vmem:[%s6850_s4 + $0xd8] sm:$0xff] }
   0x4   :  { %3797 = vmatprep.subr.mxu0 %v279_v2  ;;  %3892 = vmatprep.subr.mxu1 %v279_v2  ;;  %v538_v9 = vld [vmem:[%s6851_s0] sm:$0xff]  ;;  %v541_v14 = vld [vmem:[%s6851_s0 + $0x18] sm:$0xff]  ;;  %v539_v15 = vld [vmem:[%s6851_s0 + $0x8] sm:$0xff] }
   0x5   :  { %v261_v10 = vld [vmem:[%s6850_s4 + $0x60] sm:$0xff]  ;;  %578 = vperm.xlu1 %3927, %v540_v8   ;;  %572 = vperm.xlu0 %3926, %v538_v9   ;;  %v260_v18 = vld [vmem:[%s6850_s4 + $0x58] sm:$0xff]  ;;  %v275_v19 = vld [vmem:[%s6850_s4 + $0xd0] sm:$0xff] }
   0x6   :  { %v121_v12 = vld [vmem:[%s6852_s3] sm:$0xff]  ;;  %v543_v20 = vld [vmem:[%s6851_s0 + $0x28] sm:$0xff]  ;;  %v259_v22 = vld [vmem:[%s6850_s4 + $0x50] sm:$0xff] }
   0x7   :  { %3798 = vmatpush3.xpose.msra.mxu0 %v263_v4  ;;  %3908 = vmatpush3.xpose.msra.mxu1 %v263_v4  ;;  %v137_v13 = vld [vmem:[%s6852_s3 + $0x80] sm:$0xff]  ;;  %v4262_v16 = vmul.f32 14.285714, %v121_v12  ;;  %v274_v23 = vld [vmem:[%s6850_s4 + $0xc8] sm:$0xff]  ;;  %v545_v24 = vld [vmem:[%s6851_s0 + $0x38] sm:$0xff] }
   0x8   :  { %3799 = vmatprep.subr.mxu0 %v278_v5  ;;  %3893 = vmatprep.subr.mxu1 %v278_v5  ;;  %v4264_v17 = vmul.f32 14.285714, %v137_v13  ;;  %v542_v21 = vld [vmem:[%s6851_s0 + $0x20] sm:$0xff]  ;;  %v544_v25 = vld [vmem:[%s6851_s0 + $0x30] sm:$0xff]  ;;  %v258_v26 = vld [vmem:[%s6850_s4 + $0x48] sm:$0xff] }
   0x9   :  { %581 = vperm.xlu1 %3927, %v541_v14   ;;  %575 = vperm.xlu0 %3926, %v539_v15   ;;  %v273_v27 = vld [vmem:[%s6850_s4 + $0xc0] sm:$0xff]  ;;  %v547_v28 = vld [vmem:[%s6851_s0 + $0x48] sm:$0xff]  ;;  %v272_v31 = vld [vmem:[%s6850_s4 + $0xb8] sm:$0xff] }
   0xa   :  { %3827 = vmatprep.mubr.f32.mxu0 %v4262_v16  ;;  %3859 = vmatprep.mubr.f32.mxu1 %v4264_v17  ;;  %v546_v29 = vld [vmem:[%s6851_s0 + $0x40] sm:$0xff]  ;;  %v549_v32 = vld [vmem:[%s6851_s0 + $0x58] sm:$0xff]  ;;  %v548_v33 = vld [vmem:[%s6851_s0 + $0x50] sm:$0xff] }
   0xb   :  { %3800 = vmatpush3.xpose.msra.mxu0 %v262_v6  ;;  %3909 = vmatpush3.xpose.msra.mxu1 %v262_v6  ;;  %v257_v30 = vld [vmem:[%s6850_s4 + $0x40] sm:$0xff]  ;;  %v256_v34 = vld [vmem:[%s6850_s4 + $0x38] sm:$0xff]  ;;  %v271_v35 = vld [vmem:[%s6850_s4 + $0xb0] sm:$0xff] }
   0xc   :  { %3801 = vmatprep.subr.mxu0 %v277_v7  ;;  %3894 = vmatprep.subr.mxu1 %v277_v7  ;;  %v551_v36 = vld [vmem:[%s6851_s0 + $0x68] sm:$0xff]  ;;  %v550_v37 = vld [vmem:[%s6851_s0 + $0x60] sm:$0xff]  ;;  %v255_v38 = vld [vmem:[%s6850_s4 + $0x30] sm:$0xff] }
   0xd   :  { %587 = vperm.xlu1 %3927, %v543_v20   ;;  %584 = vperm.xlu0 %3926, %v542_v21   ;;  %v270_v39 = vld [vmem:[%s6850_s4 + $0xa8] sm:$0xff]  ;;  %v553_v40 = vld [vmem:[%s6851_s0 + $0x78] sm:$0xff]  ;;  %v552_v41 = vld [vmem:[%s6851_s0 + $0x70] sm:$0xff] }
   0xe   :  { %v254_v42 = vld [vmem:[%s6850_s4 + $0x28] sm:$0xff]  ;;  %v269_v43 = vld [vmem:[%s6850_s4 + $0xa0] sm:$0xff]  ;;  %v268_v47 = vld [vmem:[%s6850_s4 + $0x98] sm:$0xff] }
   0xf   :  { %3802 = vmatpush3.xpose.msra.mxu0 %v261_v10  ;;  %3910 = vmatpush3.xpose.msra.mxu1 %v261_v10  ;;  %v555_v44 = vld [vmem:[%s6851_s0 + $0x88] sm:$0xff]  ;;  %v554_v45 = vld [vmem:[%s6851_s0 + $0x80] sm:$0xff]  ;;  %v557_v48 = vld [vmem:[%s6851_s0 + $0x98] sm:$0xff] }
  0x10   :  { %3803 = vmatprep.subr.mxu0 %v276_v11  ;;  %3895 = vmatprep.subr.mxu1 %v276_v11  ;;  %v253_v46 = vld [vmem:[%s6850_s4 + $0x20] sm:$0xff]  ;;  %v556_v49 = vld [vmem:[%s6851_s0 + $0x90] sm:$0xff]  ;;  %v252_v50 = vld [vmem:[%s6850_s4 + $0x18] sm:$0xff] }
  0x11   :  { %593 = vperm.xlu1 %3927, %v545_v24   ;;  %590 = vperm.xlu0 %3926, %v544_v25   ;;  %v267_v51 = vld [vmem:[%s6850_s4 + $0x90] sm:$0xff]  ;;  %v559_v52 = vld [vmem:[%s6851_s0 + $0xa8] sm:$0xff]  ;;  %v558_v53 = vld [vmem:[%s6851_s0 + $0xa0] sm:$0xff] }
  0x12   :  { %v251_v54 = vld [vmem:[%s6850_s4 + $0x10] sm:$0xff]  ;;  %v266_v55 = vld [vmem:[%s6850_s4 + $0x88] sm:$0xff]  ;;  %v561_v56 = vld [vmem:[%s6851_s0 + $0xb8] sm:$0xff] }
  0x13   :  { %3804 = vmatpush3.xpose.msra.mxu0 %v260_v18  ;;  %3911 = vmatpush3.xpose.msra.mxu1 %v260_v18  ;;  %v560_v57 = vld [vmem:[%s6851_s0 + $0xb0] sm:$0xff]  ;;  %v250_v58 = vld [vmem:[%s6850_s4 + $0x8] sm:$0xff]  ;;  %v265_v59 = vld [vmem:[%s6850_s4 + $0x80] sm:$0xff] }
  0x14   :  { %3805 = vmatprep.subr.mxu0 %v275_v19  ;;  %3896 = vmatprep.subr.mxu1 %v275_v19  ;;  %v563_v60 = vld [vmem:[%s6851_s0 + $0xc8] sm:$0xff]  ;;  %v562_v61 = vld [vmem:[%s6851_s0 + $0xc0] sm:$0xff]  ;;  %v565_v1 = vld [vmem:[%s6851_s0 + $0xd8] sm:$0xff] }
  0x15   :  { %599 = vperm.xlu1 %3927, %v547_v28   ;;  %596 = vperm.xlu0 %3926, %v546_v29   ;;  %v249_v62 = vld [vmem:[%s6850_s4] sm:$0xff]  ;;  %v122_v63 = vld [vmem:[%s6852_s3 + $0x8] sm:$0xff]  ;;  %v564_v2 = vld [vmem:[%s6851_s0 + $0xd0] sm:$0xff] }
  0x16   :  { %v138_v0 = vld [vmem:[%s6852_s3 + $0x88] sm:$0xff]  ;;  %v154_v3 = vmul.f32 14.285714, %v122_v63  ;;  %v123_v5 = vld [vmem:[%s6852_s3 + $0x10] sm:$0xff]  ;;  %v566_v8 = vld [vmem:[%s6851_s0 + $0xe0] sm:$0xff] }
  0x17   :  { %3806 = vmatpush3.xpose.msra.mxu0 %v259_v22  ;;  %3912 = vmatpush3.xpose.msra.mxu1 %v259_v22  ;;  %v170_v4 = vmul.f32 14.285714, %v138_v0  ;;  %v139_v6 = vld [vmem:[%s6852_s3 + $0x90] sm:$0xff]  ;;  %v567_v7 = vld [vmem:[%s6851_s0 + $0xe8] sm:$0xff]  ;;  %v155_v9 = vmul.f32 14.285714, %v123_v5 }
  0x18   :  { %3807 = vmatprep.subr.mxu0 %v274_v23  ;;  %3897 = vmatprep.subr.mxu1 %v274_v23  ;;  %v171_v10 = vmul.f32 14.285714, %v139_v6  ;;  %v124_v11 = vld [vmem:[%s6852_s3 + $0x18] sm:$0xff]  ;;  %v568_v14 = vld [vmem:[%s6851_s0 + $0xf0] sm:$0xff]  ;;  %v141_v18 = vld [vmem:[%s6852_s3 + $0xa0] sm:$0xff] }
  0x19   :  { %605 = vperm.xlu1 %3927, %v549_v32   ;;  %602 = vperm.xlu0 %3926, %v548_v33   ;;  %v140_v12 = vld [vmem:[%s6852_s3 + $0x98] sm:$0xff]  ;;  %v156_v15 = vmul.f32 14.285714, %v124_v11  ;;  %v173_v20 = vmul.f32 14.285714, %v141_v18  ;;  %v126_v21 = vld [vmem:[%s6852_s3 + $0x28] sm:$0xff] }
  0x1a   :  { %v569_v13 = vld [vmem:[%s6851_s0 + $0xf8] sm:$0xff]  ;;  %v142_v22 = vld [vmem:[%s6852_s3 + $0xa8] sm:$0xff]  ;;  %v158_v23 = vmul.f32 14.285714, %v126_v21  ;;  %v127_v25 = vld [vmem:[%s6852_s3 + $0x30] sm:$0xff]  ;;  %v7113_v21 = vmov 0 }
  0x1b   :  { %3808 = vmatpush3.xpose.msra.mxu0 %v258_v26  ;;  %3913 = vmatpush3.xpose.msra.mxu1 %v258_v26  ;;  %v174_v24 = vmul.f32 14.285714, %v142_v22  ;;  %v143_v26 = vld [vmem:[%s6852_s3 + $0xb0] sm:$0xff]  ;;  %v128_v29 = vld [vmem:[%s6852_s3 + $0x38] sm:$0xff]  ;;  %v129_v33 = vld [vmem:[%s6852_s3 + $0x40] sm:$0xff] }
  0x1c   :  { %3809 = vmatprep.subr.mxu0 %v273_v27  ;;  %3898 = vmatprep.subr.mxu1 %v273_v27  ;;  %v159_v27 = vmul.f32 14.285714, %v127_v25  ;;  %v175_v28 = vmul.f32 14.285714, %v143_v26  ;;  %v7121_v25 = vmov 0 }
  0x1d   :  { %611 = vperm.xlu1 %3927, %v551_v36   ;;  %608 = vperm.xlu0 %3926, %v550_v37   ;;  %v130_v37 = vld [vmem:[%s6852_s3 + $0x48] sm:$0xff] }
  0x1f   :  { %3810 = vmatpush3.xpose.msra.mxu0 %v257_v30  ;;  %3914 = vmatpush3.xpose.msra.mxu1 %v257_v30  ;;  %v144_v30 = vld [vmem:[%s6852_s3 + $0xb8] sm:$0xff] }
  0x20   :  { %3811 = vmatprep.subr.mxu0 %v272_v31  ;;  %3899 = vmatprep.subr.mxu1 %v272_v31  ;;  %v160_v31 = vmul.f32 14.285714, %v128_v29  ;;  %v176_v32 = vmul.f32 14.285714, %v144_v30  ;;  %v7129_v29 = vmov 0 }
  0x21   :  { %617 = vperm.xlu1 %3927, %v553_v40   ;;  %614 = vperm.xlu0 %3926, %v552_v41   ;;  %v131_v41 = vld [vmem:[%s6852_s3 + $0x50] sm:$0xff] }
  0x23   :  { %3812 = vmatpush3.xpose.msra.mxu0 %v256_v34  ;;  %3915 = vmatpush3.xpose.msra.mxu1 %v256_v34  ;;  %v145_v34 = vld [vmem:[%s6852_s3 + $0xc0] sm:$0xff] }
  0x24   :  { %3813 = vmatprep.subr.mxu0 %v271_v35  ;;  %3900 = vmatprep.subr.mxu1 %v271_v35  ;;  %v161_v35 = vmul.f32 14.285714, %v129_v33  ;;  %v177_v36 = vmul.f32 14.285714, %v145_v34  ;;  %v7137_v33 = vmov 0 }
  0x25   :  { %623 = vperm.xlu1 %3927, %v555_v44   ;;  %620 = vperm.xlu0 %3926, %v554_v45   ;;  %v132_v45 = vld [vmem:[%s6852_s3 + $0x58] sm:$0xff] }
  0x27   :  { %3814 = vmatpush3.xpose.msra.mxu0 %v255_v38  ;;  %3916 = vmatpush3.xpose.msra.mxu1 %v255_v38  ;;  %v146_v38 = vld [vmem:[%s6852_s3 + $0xc8] sm:$0xff] }
  0x28   :  { %3815 = vmatprep.subr.mxu0 %v270_v39  ;;  %3901 = vmatprep.subr.mxu1 %v270_v39  ;;  %v162_v39 = vmul.f32 14.285714, %v130_v37  ;;  %v178_v40 = vmul.f32 14.285714, %v146_v38 }
  0x29   :  { %629 = vperm.xlu1 %3927, %v557_v48   ;;  %626 = vperm.xlu0 %3926, %v556_v49   ;;  %v133_v49 = vld [vmem:[%s6852_s3 + $0x60] sm:$0xff] }
  0x2b   :  { %3816 = vmatpush3.xpose.msra.mxu0 %v254_v42  ;;  %3917 = vmatpush3.xpose.msra.mxu1 %v254_v42  ;;  %v147_v42 = vld [vmem:[%s6852_s3 + $0xd0] sm:$0xff] }
  0x2c   :  { %3817 = vmatprep.subr.mxu0 %v269_v43  ;;  %3902 = vmatprep.subr.mxu1 %v269_v43  ;;  %v163_v43 = vmul.f32 14.285714, %v131_v41  ;;  %v179_v44 = vmul.f32 14.285714, %v147_v42 }
  0x2d   :  { %635 = vperm.xlu1 %3927, %v559_v52   ;;  %632 = vperm.xlu0 %3926, %v558_v53   ;;  %v134_v53 = vld [vmem:[%s6852_s3 + $0x68] sm:$0xff] }
  0x2f   :  { %3818 = vmatpush3.xpose.msra.mxu0 %v253_v46  ;;  %3918 = vmatpush3.xpose.msra.mxu1 %v253_v46  ;;  %v148_v46 = vld [vmem:[%s6852_s3 + $0xd8] sm:$0xff] }
  0x30   :  { %3819 = vmatprep.subr.mxu0 %v268_v47  ;;  %3903 = vmatprep.subr.mxu1 %v268_v47  ;;  %v164_v47 = vmul.f32 14.285714, %v132_v45  ;;  %v180_v48 = vmul.f32 14.285714, %v148_v46 }
  0x31   :  { %641 = vperm.xlu1 %3927, %v561_v56   ;;  %638 = vperm.xlu0 %3926, %v560_v57   ;;  %v135_v57 = vld [vmem:[%s6852_s3 + $0x70] sm:$0xff] }
  0x33   :  { %3820 = vmatpush3.xpose.msra.mxu0 %v252_v50  ;;  %3919 = vmatpush3.xpose.msra.mxu1 %v252_v50  ;;  %v149_v50 = vld [vmem:[%s6852_s3 + $0xe0] sm:$0xff] }
  0x34   :  { %3821 = vmatprep.subr.mxu0 %v267_v51  ;;  %3904 = vmatprep.subr.mxu1 %v267_v51  ;;  %v165_v51 = vmul.f32 14.285714, %v133_v49  ;;  %v181_v52 = vmul.f32 14.285714, %v149_v50 }
  0x35   :  { %647 = vperm.xlu1 %3927, %v563_v60   ;;  %644 = vperm.xlu0 %3926, %v562_v61   ;;  %v136_v61 = vld [vmem:[%s6852_s3 + $0x78] sm:$0xff] }
  0x36   :  { %v168_v63 = vmul.f32 14.285714, %v136_v61 }
  0x37   :  { %3822 = vmatpush3.xpose.msra.mxu0 %v251_v54  ;;  %3920 = vmatpush3.xpose.msra.mxu1 %v251_v54  ;;  %v150_v54 = vld [vmem:[%s6852_s3 + $0xe8] sm:$0xff] }
  0x38   :  { %3823 = vmatprep.subr.mxu0 %v266_v55  ;;  %3905 = vmatprep.subr.mxu1 %v266_v55  ;;  %v166_v55 = vmul.f32 14.285714, %v134_v53  ;;  %v182_v56 = vmul.f32 14.285714, %v150_v54 }
  0x39   :  { %653 = vperm.xlu1 %3927, %v565_v1   ;;  %650 = vperm.xlu0 %3926, %v564_v2   ;;  %v667_v1 = vlaneseq }
  0x3b   :  { %3824 = vmatpush3.xpose.msra.mxu0 %v250_v58  ;;  %3921 = vmatpush3.xpose.msra.mxu1 %v250_v58  ;;  %v151_v58 = vld [vmem:[%s6852_s3 + $0xf0] sm:$0xff] }
  0x3c   :  { %3825 = vmatprep.subr.mxu0 %v265_v59  ;;  %3906 = vmatprep.subr.mxu1 %v265_v59  ;;  %v167_v59 = vmul.f32 14.285714, %v135_v57  ;;  %v183_v60 = vmul.f32 14.285714, %v151_v58 }
  0x3d   :  { %659 = vperm.xlu1 %3927, %v567_v7   ;;  %656 = vperm.xlu0 %3926, %v566_v8   ;;  %v4523_v7 = vand.u32 127, %v667_v1 }
  0x3f   :  { %3826 = vmatpush3.xpose.msra.mxu0 %v249_v62  ;;  %3922 = vmatpush3.xpose.msra.mxu1 %v249_v62  ;;  %v152_v62 = vld [vmem:[%s6852_s3 + $0xf8] sm:$0xff] }
  0x40   :  { %v184_v0 = vmul.f32 14.285714, %v152_v62 }
  0x41   :  { %665 = vperm.xlu1 %3927, %v569_v13   ;;  %662 = vperm.xlu0 %3926, %v568_v14  }
  0x42   :  { %3828 = vmatmul.mubr.f32.vlgmr.msra.gmra.mxu0 %v4262_v16  ;;  %3860 = vmatmul.mubr.f32.vlgmr.msra.gmra.mxu1 %v4264_v17  ;;  %v172_v16 = vmul.f32 14.285714, %v140_v12  ;;  %v125_v17 = vld [vmem:[%s6852_s3 + $0x20] sm:$0xff]  ;;  %v4536_v12 = vadd.s32 128, %v4523_v7 }
  0x43   :  { %3829 = vmatprep.mubr.f32.mxu0 %v154_v3  ;;  %3861 = vmatprep.mubr.f32.mxu1 %v170_v4  ;;  %v157_v19 = vmul.f32 14.285714, %v125_v17  ;;  %v7105_v17 = vmov 0 }
  0x44   :  { %vm6890_vm0 = vcmp.lt.s32.totalorder %v4536_v12, 192 }
  0x46   :  { %3830 = vmatmul.mubr.f32.gmra.mxu0 %v154_v3  ;;  %3862 = vmatmul.mubr.f32.gmra.mxu1 %v170_v4  ;;  %v4517_v4 = vshrl.u32 %v667_v1, 7 }
  0x47   :  { %3831 = vmatprep.mubr.f32.mxu0 %v155_v9  ;;  %3863 = vmatprep.mubr.f32.mxu1 %v171_v10 }
  0x48   :  { %v673_v8 = vsub.s32 1, %v4517_v4  ;;  %v669_v61 = vsub.s32 0, %v4517_v4  ;;  %v1023_v62 = vadd.s32 128, %v4517_v4 }
  0x4a   :  { %3832 = vmatmul.mubr.f32.gmra.mxu0 %v155_v9  ;;  %3864 = vmatmul.mubr.f32.gmra.mxu1 %v171_v10  ;;  %v4529_v9 = vld [vmem:[%s6853_s1] sm:$0x3] }
  0x4b   :  { %3833 = vmatprep.mubr.f32.mxu0 %v156_v15  ;;  %3865 = vmatprep.mubr.f32.mxu1 %v172_v16  ;;  %v4539_v13 = vrot.slane %v4529_v9, %v673_v8  ;;  %v1008_v8 = vadd.s32 8, %v4517_v4 }
  0x4e   :  { %3834 = vmatmul.mubr.f32.gmra.mxu0 %v156_v15  ;;  %3866 = vmatmul.mubr.f32.gmra.mxu1 %v172_v16  ;;  %v7102_v16 = vmov 0 }
  0x4f   :  { %3835 = vmatprep.mubr.f32.mxu0 %v157_v19  ;;  %3867 = vmatprep.mubr.f32.mxu1 %v173_v20 }
  0x52   :  { %3836 = vmatmul.mubr.f32.gmra.mxu0 %v157_v19  ;;  %3868 = vmatmul.mubr.f32.gmra.mxu1 %v173_v20  ;;  %v7110_v20 = vmov 0 }
  0x53   :  { %3837 = vmatprep.mubr.f32.mxu0 %v158_v23  ;;  %3869 = vmatprep.mubr.f32.mxu1 %v174_v24 }
  0x56   :  { %3838 = vmatmul.mubr.f32.gmra.mxu0 %v158_v23  ;;  %3870 = vmatmul.mubr.f32.gmra.mxu1 %v174_v24  ;;  %v7118_v24 = vmov 0 }
  0x57   :  { %3839 = vmatprep.mubr.f32.mxu0 %v159_v27  ;;  %3871 = vmatprep.mubr.f32.mxu1 %v175_v28 }
  0x5a   :  { %3840 = vmatmul.mubr.f32.gmra.mxu0 %v159_v27  ;;  %3872 = vmatmul.mubr.f32.gmra.mxu1 %v175_v28  ;;  %v7126_v28 = vmov 0 }
  0x5b   :  { %3841 = vmatprep.mubr.f32.mxu0 %v160_v31  ;;  %3873 = vmatprep.mubr.f32.mxu1 %v176_v32 }
  0x5e   :  { %3842 = vmatmul.mubr.f32.gmra.mxu0 %v160_v31  ;;  %3874 = vmatmul.mubr.f32.gmra.mxu1 %v176_v32  ;;  %v7134_v32 = vmov 0 }
  0x5f   :  { %3843 = vmatprep.mubr.f32.mxu0 %v161_v35  ;;  %3875 = vmatprep.mubr.f32.mxu1 %v177_v36 }
  0x62   :  { %3844 = vmatmul.mubr.f32.gmra.mxu0 %v161_v35  ;;  %3876 = vmatmul.mubr.f32.gmra.mxu1 %v177_v36 }
  0x63   :  { %3845 = vmatprep.mubr.f32.mxu0 %v162_v39  ;;  %3877 = vmatprep.mubr.f32.mxu1 %v178_v40 }
  0x66   :  { %3846 = vmatmul.mubr.f32.gmra.mxu0 %v162_v39  ;;  %3878 = vmatmul.mubr.f32.gmra.mxu1 %v178_v40  ;;  %v7146_v40 = vmov 0 }
  0x67   :  { %3847 = vmatprep.mubr.f32.mxu0 %v163_v43  ;;  %3879 = vmatprep.mubr.f32.mxu1 %v179_v44 }
  0x6a   :  { %3848 = vmatmul.mubr.f32.gmra.mxu0 %v163_v43  ;;  %3880 = vmatmul.mubr.f32.gmra.mxu1 %v179_v44  ;;  %v7151_v43 = vmov 0  ;;  %v7154_v44 = vmov 0 }
  0x6b   :  { %3849 = vmatprep.mubr.f32.mxu0 %v164_v47  ;;  %3881 = vmatprep.mubr.f32.mxu1 %v180_v48 }
  0x6e   :  { %3850 = vmatmul.mubr.f32.gmra.mxu0 %v164_v47  ;;  %3882 = vmatmul.mubr.f32.gmra.mxu1 %v180_v48  ;;  %v7159_v47 = vmov 0  ;;  %v7162_v48 = vmov 0 }
  0x6f   :  { %3851 = vmatprep.mubr.f32.mxu0 %v165_v51  ;;  %3883 = vmatprep.mubr.f32.mxu1 %v181_v52 }
  0x72   :  { %3852 = vmatmul.mubr.f32.gmra.mxu0 %v165_v51  ;;  %3884 = vmatmul.mubr.f32.gmra.mxu1 %v181_v52  ;;  %v7167_v51 = vmov 0  ;;  %v7170_v52 = vmov 0 }
  0x73   :  { %3853 = vmatprep.mubr.f32.mxu0 %v166_v55  ;;  %3885 = vmatprep.mubr.f32.mxu1 %v182_v56 }
  0x76   :  { %3854 = vmatmul.mubr.f32.gmra.mxu0 %v166_v55  ;;  %3886 = vmatmul.mubr.f32.gmra.mxu1 %v182_v56  ;;  %v7175_v55 = vmov 0  ;;  %v7178_v56 = vmov 0 }
  0x77   :  { %3855 = vmatprep.mubr.f32.mxu0 %v167_v59  ;;  %3887 = vmatprep.mubr.f32.mxu1 %v183_v60 }
  0x7a   :  { %3856 = vmatmul.mubr.f32.gmra.mxu0 %v167_v59  ;;  %3888 = vmatmul.mubr.f32.gmra.mxu1 %v183_v60  ;;  %v7183_v59 = vmov 0  ;;  %v7186_v60 = vmov 0 }
  0x7b   :  { %3857 = vmatprep.mubr.f32.mxu0 %v168_v63  ;;  %3889 = vmatprep.mubr.f32.mxu1 %v184_v0 }
  0x7e   :  { %3858 = vmatmul.mubr.f32.gmra.mxu0 %v168_v63  ;;  %3890 = vmatmul.mubr.f32.gmra.mxu1 %v184_v0  ;;  %v4830_v63 = vrot.slane %v4529_v9, %v669_v61 }
  0x80   :  { %v4513_v2 = vpop.permute.xlu1 %578  ;;  %v4515_v3 = vpop.permute.xlu0 %572 }
  0x81   :  { %7094 = vst [vmem:[#allocation6_spill] sm:$0xff] %v4513_v2  ;;  %7095 = vst [vmem:[#allocation7_spill] sm:$0xff] %v4515_v3 }
  0x84   :  { %v4519_v5 = vpop.permute.xlu1 %581  ;;  %v4521_v6 = vpop.permute.xlu0 %575 }
  0x85   :  { %7096 = vst [vmem:[#allocation8_spill] sm:$0xff] %v4519_v5  ;;  %7097 = vst [vmem:[#allocation9_spill] sm:$0xff] %v4521_v6 }
  0x88   :  { %v4531_v10 = vpop.permute.xlu1 %587  ;;  %v4533_v11 = vpop.permute.xlu0 %584 }
  0x89   :  { %7098 = vst [vmem:[#allocation10_spill] sm:$0xff] %v4531_v10  ;;  %7099 = vst [vmem:[#allocation11_spill] sm:$0xff] %v4533_v11 }
  0x8c   :  { %v4541_v14 = vpop.permute.xlu1 %593  ;;  %v4543_v15 = vpop.permute.xlu0 %590 }
  0x8d   :  { %7100 = vst [vmem:[#allocation12_spill] sm:$0xff] %v4541_v14  ;;  %7101 = vst [vmem:[#allocation13_spill] sm:$0xff] %v4543_v15  ;;  %vm6865_vm1 = vcmp.ne.s32.totalorder %v4543_v15, %v4539_v13  ;;  %vm6864_vm2 = vcmp.ne.s32.totalorder %v4541_v14, %v4539_v13 }
  0x8e   :  { %vm4555_vm3 = vmand %vm6865_vm1, %vm6890_vm0 }
  0x8f   :  { %v7103_v16 = vsel %vm4555_vm3, 4294967295, %v7102_v16  ;;  %vm4564_vm4 = vmand %vm6864_vm2, %vm6890_vm0 }
  0x90   :  { %7104 = vst [vmem:[#allocation14_spill] sm:$0xff] %v7103_v16  ;;  %v7106_v17 = vsel %vm4564_vm4, 4294967295, %v7105_v17  ;;  %v4568_v18 = vpop.permute.xlu1 %599  ;;  %v4570_v19 = vpop.permute.xlu0 %596 }
  0x91   :  { %7107 = vst [vmem:[#allocation15_spill] sm:$0xff] %v7106_v17  ;;  %7108 = vst [vmem:[#allocation16_spill] sm:$0xff] %v4568_v18  ;;  %vm6863_vm5 = vcmp.ne.s32.totalorder %v4570_v19, %v4539_v13  ;;  %vm6860_vm7 = vcmp.ne.s32.totalorder %v4568_v18, %v4539_v13 }
  0x92   :  { %7109 = vst [vmem:[#allocation17_spill] sm:$0xff] %v4570_v19  ;;  %vm4579_vm6 = vmand %vm6863_vm5, %vm6890_vm0 }
  0x93   :  { %v7111_v20 = vsel %vm4579_vm6, 4294967295, %v7110_v20  ;;  %vm4590_vm8 = vmand %vm6860_vm7, %vm6890_vm0 }
  0x94   :  { %7112 = vst [vmem:[#allocation18_spill] sm:$0xff] %v7111_v20  ;;  %v7114_v21 = vsel %vm4590_vm8, 4294967295, %v7113_v21  ;;  %v4594_v22 = vpop.permute.xlu1 %605  ;;  %v4596_v23 = vpop.permute.xlu0 %602 }
  0x95   :  { %7115 = vst [vmem:[#allocation19_spill] sm:$0xff] %v7114_v21  ;;  %7116 = vst [vmem:[#allocation20_spill] sm:$0xff] %v4594_v22  ;;  %vm6858_vm9 = vcmp.ne.s32.totalorder %v4596_v23, %v4539_v13  ;;  %vm6856_vm11 = vcmp.ne.s32.totalorder %v4594_v22, %v4539_v13 }
  0x96   :  { %7117 = vst [vmem:[#allocation21_spill] sm:$0xff] %v4596_v23  ;;  %vm4605_vm10 = vmand %vm6858_vm9, %vm6890_vm0 }
  0x97   :  { %v7119_v24 = vsel %vm4605_vm10, 4294967295, %v7118_v24  ;;  %vm4616_vm12 = vmand %vm6856_vm11, %vm6890_vm0 }
  0x98   :  { %7120 = vst [vmem:[#allocation22_spill] sm:$0xff] %v7119_v24  ;;  %v7122_v25 = vsel %vm4616_vm12, 4294967295, %v7121_v25  ;;  %v4620_v26 = vpop.permute.xlu1 %611  ;;  %v4622_v27 = vpop.permute.xlu0 %608 }
  0x99   :  { %7123 = vst [vmem:[#allocation23_spill] sm:$0xff] %v7122_v25  ;;  %7124 = vst [vmem:[#allocation24_spill] sm:$0xff] %v4620_v26  ;;  %vm6857_vm13 = vcmp.ne.s32.totalorder %v4622_v27, %v4539_v13  ;;  %vm6859_vm15 = vcmp.ne.s32.totalorder %v4620_v26, %v4539_v13 }
  0x9a   :  { %7125 = vst [vmem:[#allocation25_spill] sm:$0xff] %v4622_v27  ;;  %vm4631_vm14 = vmand %vm6857_vm13, %vm6890_vm0 }
  0x9b   :  { %v7127_v28 = vsel %vm4631_vm14, 4294967295, %v7126_v28  ;;  %vm4642_vm11 = vmand %vm6859_vm15, %vm6890_vm0 }
  0x9c   :  { %7128 = vst [vmem:[#allocation26_spill] sm:$0xff] %v7127_v28  ;;  %v7130_v29 = vsel %vm4642_vm11, 4294967295, %v7129_v29  ;;  %v4646_v30 = vpop.permute.xlu1 %617  ;;  %v4648_v31 = vpop.permute.xlu0 %614 }
  0x9d   :  { %7131 = vst [vmem:[#allocation27_spill] sm:$0xff] %v7130_v29  ;;  %7132 = vst [vmem:[#allocation28_spill] sm:$0xff] %v4646_v30  ;;  %vm6861_vm13 = vcmp.ne.s32.totalorder %v4648_v31, %v4539_v13  ;;  %vm6862_vm15 = vcmp.ne.s32.totalorder %v4646_v30, %v4539_v13  ;;  %v4185_v29 = vmov 0.0  }
  0x9e   :  { %7133 = vst [vmem:[#allocation29_spill] sm:$0xff] %v4648_v31  ;;  %vm4657_vm9 = vmand %vm6861_vm13, %vm6890_vm0 }
  0x9f   :  { %v7135_v32 = vsel %vm4657_vm9, 4294967295, %v7134_v32  ;;  %vm4668_vm7 = vmand %vm6862_vm15, %vm6890_vm0 }
  0xa0   :  { %7136 = vst [vmem:[#allocation30_spill] sm:$0xff] %v7135_v32  ;;  %v7138_v33 = vsel %vm4668_vm7, 4294967295, %v7137_v33  ;;  %v4672_v34 = vpop.permute.xlu1 %623  ;;  %v4674_v35 = vpop.permute.xlu0 %620 }
  0xa1   :  { %7139 = vst [vmem:[#allocation31_spill] sm:$0xff] %v7138_v33  ;;  %7140 = vst [vmem:[#allocation32_spill] sm:$0xff] %v4672_v34 }
  0xa2   :  { %7141 = vst [vmem:[#allocation33_spill] sm:$0xff] %v4674_v35 }
  0xa4   :  { %v4676_v36 = vpop.permute.xlu1 %629  ;;  %v4678_v37 = vpop.permute.xlu0 %626 }
  0xa5   :  { %7142 = vst [vmem:[#allocation34_spill] sm:$0xff] %v4676_v36  ;;  %7143 = vst [vmem:[#allocation35_spill] sm:$0xff] %v4678_v37 }
  0xa8   :  { %v4680_v38 = vpop.permute.xlu1 %635  ;;  %v4682_v39 = vpop.permute.xlu0 %632 }
  0xa9   :  { %7144 = vst [vmem:[#allocation36_spill] sm:$0xff] %v4680_v38  ;;  %7145 = vst [vmem:[#allocation37_spill] sm:$0xff] %v4682_v39  ;;  %vm6866_vm13 = vcmp.ne.s32.totalorder %v4680_v38, %v4539_v13 }
  0xaa   :  { %vm4691_vm15 = vmand %vm6866_vm13, %vm6890_vm0 }
  0xab   :  { %v7147_v40 = vsel %vm4691_vm15, 4294967295, %v7146_v40 }
  0xac   :  { %7148 = vst [vmem:[#allocation38_spill] sm:$0xff] %v7147_v40  ;;  %v4695_v41 = vpop.permute.xlu1 %641  ;;  %v4697_v42 = vpop.permute.xlu0 %638 }
  0xad   :  { %7149 = vst [vmem:[#allocation39_spill] sm:$0xff] %v4695_v41  ;;  %7150 = vst [vmem:[#allocation40_spill] sm:$0xff] %v4697_v42  ;;  %vm6868_vm5 = vcmp.ne.s32.totalorder %v4697_v42, %v4539_v13  ;;  %vm6870_vm2 = vcmp.ne.s32.totalorder %v4695_v41, %v4539_v13 }
  0xae   :  { %vm4708_vm1 = vmand %vm6868_vm5, %vm6890_vm0 }
  0xaf   :  { %v7152_v43 = vsel %vm4708_vm1, 4294967295, %v7151_v43  ;;  %vm4717_vm13 = vmand %vm6870_vm2, %vm6890_vm0 }
  0xb0   :  { %7153 = vst [vmem:[#allocation41_spill] sm:$0xff] %v7152_v43  ;;  %v7155_v44 = vsel %vm4717_vm13, 4294967295, %v7154_v44  ;;  %v4721_v45 = vpop.permute.xlu1 %647  ;;  %v4723_v46 = vpop.permute.xlu0 %644 }
  0xb1   :  { %7156 = vst [vmem:[#allocation42_spill] sm:$0xff] %v7155_v44  ;;  %7157 = vst [vmem:[#allocation43_spill] sm:$0xff] %v4721_v45  ;;  %vm6872_vm7 = vcmp.ne.s32.totalorder %v4723_v46, %v4539_v13  ;;  %vm6874_vm5 = vcmp.ne.s32.totalorder %v4721_v45, %v4539_v13 }
  0xb2   :  { %7158 = vst [vmem:[#allocation44_spill] sm:$0xff] %v4723_v46  ;;  %vm4734_vm9 = vmand %vm6872_vm7, %vm6890_vm0 }
  0xb3   :  { %v7160_v47 = vsel %vm4734_vm9, 4294967295, %v7159_v47  ;;  %vm4743_vm2 = vmand %vm6874_vm5, %vm6890_vm0 }
  0xb4   :  { %7161 = vst [vmem:[#allocation45_spill] sm:$0xff] %v7160_v47  ;;  %v7163_v48 = vsel %vm4743_vm2, 4294967295, %v7162_v48  ;;  %v4747_v49 = vpop.permute.xlu1 %653  ;;  %v4749_v50 = vpop.permute.xlu0 %650 }
  0xb5   :  { %7164 = vst [vmem:[#allocation46_spill] sm:$0xff] %v7163_v48  ;;  %7165 = vst [vmem:[#allocation47_spill] sm:$0xff] %v4747_v49  ;;  %vm6878_vm11 = vcmp.ne.s32.totalorder %v4747_v49, %v4539_v13  ;;  %vm6876_vm7 = vcmp.ne.s32.totalorder %v4749_v50, %v4539_v13 }
  0xb6   :  { %7166 = vst [vmem:[#allocation48_spill] sm:$0xff] %v4749_v50  ;;  %vm4760_vm14 = vmand %vm6876_vm7, %vm6890_vm0 }
  0xb7   :  { %v7168_v51 = vsel %vm4760_vm14, 4294967295, %v7167_v51  ;;  %vm4769_vm5 = vmand %vm6878_vm11, %vm6890_vm0 }
  0xb8   :  { %7169 = vst [vmem:[#allocation49_spill] sm:$0xff] %v7168_v51  ;;  %v7171_v52 = vsel %vm4769_vm5, 4294967295, %v7170_v52  ;;  %v4773_v53 = vpop.permute.xlu1 %659  ;;  %v4775_v54 = vpop.permute.xlu0 %656 }
  0xb9   :  { %7172 = vst [vmem:[#allocation50_spill] sm:$0xff] %v7171_v52  ;;  %7173 = vst [vmem:[#allocation51_spill] sm:$0xff] %v4773_v53  ;;  %vm6882_vm12 = vcmp.ne.s32.totalorder %v4773_v53, %v4539_v13  ;;  %vm6880_vm7 = vcmp.ne.s32.totalorder %v4775_v54, %v4539_v13 }
  0xba   :  { %7174 = vst [vmem:[#allocation52_spill] sm:$0xff] %v4775_v54  ;;  %vm4786_vm14 = vmand %vm6880_vm7, %vm6890_vm0 }
  0xbb   :  { %v7176_v55 = vsel %vm4786_vm14, 4294967295, %v7175_v55  ;;  %vm4795_vm11 = vmand %vm6882_vm12, %vm6890_vm0 }
  0xbc   :  { %7177 = vst [vmem:[#allocation53_spill] sm:$0xff] %v7176_v55  ;;  %v7179_v56 = vsel %vm4795_vm11, 4294967295, %v7178_v56  ;;  %v4799_v57 = vpop.permute.xlu1 %665  ;;  %v4801_v58 = vpop.permute.xlu0 %662  ;;  %vm1078_vm11 = vcmp.eq.s32.totalorder %v4517_v4, %v4523_v7 }
  0xbd   :  { %7180 = vst [vmem:[#allocation54_spill] sm:$0xff] %v7179_v56  ;;  %7181 = vst [vmem:[#allocation55_spill] sm:$0xff] %v4799_v57  ;;  %vm6884_vm5 = vcmp.ne.s32.totalorder %v4801_v58, %v4539_v13  ;;  %vm6887_vm7 = vcmp.ne.s32.totalorder %v4799_v57, %v4539_v13 }
  0xbe   :  { %7182 = vst [vmem:[#allocation56_spill] sm:$0xff] %v4801_v58  ;;  %vm4812_vm14 = vmand %vm6884_vm5, %vm6890_vm0  ;;  %vm1111_vm5 = vcmp.eq.s32.totalorder %v1023_v62, %v4536_v12  ;;  %v7191_v58 = vmov 0 }
  0xbf   :  { %v7184_v59 = vsel %vm4812_vm14, 4294967295, %v7183_v59  ;;  %vm4821_vm12 = vmand %vm6887_vm7, %vm6890_vm0  ;;  %vm6902_vm7 = vcmp.ne.s32.totalorder %v4515_v3, %v4830_v63  ;;  %vm6896_vm0 = vcmp.ne.s32.totalorder %v4515_v3, %v4539_v13  ;;  %vm7194_vm14 = vcmp.ne.s32.totalorder %v4515_v3, %v4830_v63 }
  0xc0   :  { %7185 = vst [vmem:[#allocation57_spill] sm:$0xff] %v7184_v59  ;;  %v7187_v60 = vsel %vm4821_vm12, 4294967295, %v7186_v60  ;;  %vm6901_vm12 = vcmp.ne.s32.totalorder %v4674_v35, %v4539_v13 }
  0xc1   :  { %7188 = vst [vmem:[#allocation58_spill] sm:$0xff] %v7187_v60 }
 0x102   :  { %v347_v0 = vpop.f32.mrf.mxu0  ;;  %v4832_v1 = vpop.f32.mrf.mxu1 }
 0x103   :  { %v1174_v33 = vsel %vm1078_vm11, %v347_v0, 0.0  ;;  %v771_v62 = vsel %vm6902_vm7, 0.0, %v347_v0  ;;  %vm1080_vm11 = vcmp.eq.s32.totalorder %v1008_v8, %v4523_v7  ;;  %v4890_v56 = vsel %vm7194_vm14, %v347_v0, -1e+30 }
 0x104   :  { %v349_v60 = vpop.f32.mrf.mxu0  ;;  %v4840_v57 = vpop.f32.mrf.mxu1  ;;  %1239 = vadd.xlane.f32.xlu1 %v1174_v33  ;;  %v7197_v0 = vmov 0 }
 0x105   :  { %v772_v9 = vsel %vm6896_vm0, 0.0, %v349_v60  ;;  %v1207_v61 = vsel %vm1111_vm5, %v4840_v57, 0.0  ;;  %v804_v33 = vsel %vm6901_vm12, 0.0, %v4840_v57  ;;  %vm6907_vm0 = vcmp.ne.s32.totalorder %v4674_v35, %v4830_v63 }
 0x106   :  { %v835_v30 = vadd.f32 %v772_v9, %v771_v62  ;;  %v4858_v59 = vpop.f32.mrf.mxu0  ;;  %v4860_v32 = vpop.f32.mrf.mxu1  ;;  %v4863_v9 = vadd.s32 136, %v4517_v4  ;;  %v803_v8 = vsel %vm6907_vm0, 0.0, %v4832_v1  ;;  %vm7189_vm5 = vcmp.lt.s32.totalorder %v4536_v12, 192 }
 0x107   :  { %v1176_v62 = vsel %vm1080_vm11, %v4858_v59, 0.0  ;;  %vm7190_vm12 = vcmp.ne.s32.totalorder %v4515_v3, %v4539_v13  ;;  %vm6914_vm0 = vcmask 7168   ;;  %vm7195_vm14 = vmmov %vm7189_vm5  ;;  %v4186_v3 = vmov -1e+30  }
 0x108   :  { %1287 = vadd.xlane.f32.xlu1 %v1207_v61  ;;  %836 = vadd.xlane.f32.xlu0 %v835_v30  ;;  %vm4875_vm7 = vmand %vm7190_vm12, %vm7189_vm5  ;;  %v883_v30 = vadd.f32 %v804_v33, %v803_v8  ;;  %v4883_v31 = vpop.f32.mrf.mxu1  ;;  %89 = vst.msk [vmem:[#allocation4] sm:$0xff] %vm6914_vm0, %v4185_v29  ;;  %vm6915_vm12 = vcmp.ne.s32.totalorder %v4672_v34, %v4539_v13 }
 0x109   :  { %v7192_v58 = vsel %vm4875_vm7, 4294967295, %v7191_v58  ;;  %v4881_v61 = vsel %vm4875_vm7, %v349_v60, -1e+30  ;;  %57 = vst.msk [vmem:[#allocation3] sm:$0xff] %vm6914_vm0, %v4185_v29  ;;  %58 = vst.msk [vmem:[#allocation3 + $0x8] sm:$0xff] %vm6914_vm0, %v4185_v29  ;;  %vm7196_vm5 = vcmp.ne.s32.totalorder %v4674_v35, %v4539_v13  ;;  %vm678_vm7 = vcmp.ne.s32.totalorder %v4521_v6, %v4539_v13 }
 0x10a   :  { %7193 = vst [vmem:[#allocation59_spill] sm:$0xff] %v7192_v58  ;;  %59 = vst.msk [vmem:[#allocation3 + $0x10] sm:$0xff] %vm6914_vm0, %v4185_v29  ;;  %v1576_v60 = vmax.f32 %v4890_v56, %v4881_v61  ;;  %v806_v33 = vsel %vm6915_vm12, 0.0, %v4883_v31 }
 0x10b   :  { %60 = vst.msk [vmem:[#allocation3 + $0x18] sm:$0xff] %vm6914_vm0, %v4185_v29  ;;  %61 = vst.msk [vmem:[#allocation3 + $0x20] sm:$0xff] %vm6914_vm0, %v4185_v29 }
 0x10c   :  { %1242 = vadd.xlane.f32.xlu0 %v1176_v62  ;;  %884 = vadd.xlane.f32.xlu1 %v883_v30  ;;  %62 = vst.msk [vmem:[#allocation3 + $0x28] sm:$0xff] %vm6914_vm0, %v4185_v29  ;;  %63 = vst.msk [vmem:[#allocation3 + $0x30] sm:$0xff] %vm6914_vm0, %v4185_v29  ;;  %v355_v62 = vpop.f32.mrf.mxu0 }
 0x10d   :  { %64 = vst.msk [vmem:[#allocation3 + $0x38] sm:$0xff] %vm6914_vm0, %v4185_v29  ;;  %65 = vst.msk [vmem:[#allocation3 + $0x40] sm:$0xff] %vm6914_vm0, %v4185_v29 }
 0x10e   :  { %66 = vst.msk [vmem:[#allocation3 + $0x48] sm:$0xff] %vm6914_vm0, %v4185_v29  ;;  %67 = vst.msk [vmem:[#allocation3 + $0x50] sm:$0xff] %vm6914_vm0, %v4185_v29  ;;  %v5075_v58 = vpop.f32.mrf.mxu0 }
 0x10f   :  { %68 = vst.msk [vmem:[#allocation3 + $0x58] sm:$0xff] %vm6914_vm0, %v4185_v29  ;;  %69 = vst.msk [vmem:[#allocation3 + $0x60] sm:$0xff] %vm6914_vm0, %v4185_v29 }
 0x110   :  { %70 = vst.msk [vmem:[#allocation3 + $0x68] sm:$0xff] %vm6914_vm0, %v4185_v29  ;;  %71 = vst.msk [vmem:[#allocation3 + $0x70] sm:$0xff] %vm6914_vm0, %v4185_v29  ;;  %1577 = vmax.xlane.f32.xlu1 %v1576_v60 }
 0x111   :  { %72 = vst.msk [vmem:[#allocation3 + $0x78] sm:$0xff] %vm6914_vm0, %v4185_v29  ;;  %73 = vst.msk [vmem:[#allocation3 + $0x80] sm:$0xff] %vm6914_vm0, %v4185_v29 }
 0x112   :  { %74 = vst.msk [vmem:[#allocation3 + $0x88] sm:$0xff] %vm6914_vm0, %v4185_v29  ;;  %75 = vst.msk [vmem:[#allocation3 + $0x90] sm:$0xff] %vm6914_vm0, %v4185_v29 }
 0x113   :  { %76 = vst.msk [vmem:[#allocation3 + $0x98] sm:$0xff] %vm6914_vm0, %v4185_v29  ;;  %77 = vst.msk [vmem:[#allocation3 + $0xa0] sm:$0xff] %vm6914_vm0, %v4185_v29 }
 0x114   :  { %78 = vst.msk [vmem:[#allocation3 + $0xa8] sm:$0xff] %vm6914_vm0, %v4185_v29  ;;  %79 = vst.msk [vmem:[#allocation3 + $0xb0] sm:$0xff] %vm6914_vm0, %v4185_v29 }
 0x115   :  { %80 = vst.msk [vmem:[#allocation3 + $0xb8] sm:$0xff] %vm6914_vm0, %v4185_v29  ;;  %81 = vst.msk [vmem:[#allocation3 + $0xc0] sm:$0xff] %vm6914_vm0, %v4185_v29 }
 0x116   :  { %82 = vst.msk [vmem:[#allocation3 + $0xc8] sm:$0xff] %vm6914_vm0, %v4185_v29  ;;  %83 = vst.msk [vmem:[#allocation3 + $0xd0] sm:$0xff] %vm6914_vm0, %v4185_v29 }
 0x117   :  { %84 = vst.msk [vmem:[#allocation3 + $0xd8] sm:$0xff] %vm6914_vm0, %v4185_v29  ;;  %85 = vst.msk [vmem:[#allocation3 + $0xe0] sm:$0xff] %vm6914_vm0, %v4185_v29 }
 0x118   :  { %86 = vst.msk [vmem:[#allocation3 + $0xe8] sm:$0xff] %vm6914_vm0, %v4185_v29  ;;  %87 = vst.msk [vmem:[#allocation3 + $0xf0] sm:$0xff] %vm6914_vm0, %v4185_v29 }
 0x119   :  { %88 = vst.msk [vmem:[#allocation3 + $0xf8] sm:$0xff] %vm6914_vm0, %v4185_v29  ;;  %90 = vst.msk [vmem:[#allocation4 + $0x8] sm:$0xff] %vm6914_vm0, %v4185_v29 }
 0x11a   :  { %91 = vst.msk [vmem:[#allocation4 + $0x10] sm:$0xff] %vm6914_vm0, %v4185_v29  ;;  %92 = vst.msk [vmem:[#allocation4 + $0x18] sm:$0xff] %vm6914_vm0, %v4185_v29 }
 0x11b   :  { %93 = vst.msk [vmem:[#allocation4 + $0x20] sm:$0xff] %vm6914_vm0, %v4185_v29  ;;  %94 = vst.msk [vmem:[#allocation4 + $0x28] sm:$0xff] %vm6914_vm0, %v4185_v29 }
 0x11c   :  { %95 = vst.msk [vmem:[#allocation4 + $0x30] sm:$0xff] %vm6914_vm0, %v4185_v29  ;;  %96 = vst.msk [vmem:[#allocation4 + $0x38] sm:$0xff] %vm6914_vm0, %v4185_v29 }
 0x11d   :  { %97 = vst.msk [vmem:[#allocation4 + $0x40] sm:$0xff] %vm6914_vm0, %v4185_v29  ;;  %98 = vst.msk [vmem:[#allocation4 + $0x48] sm:$0xff] %vm6914_vm0, %v4185_v29 }
 0x11e   :  { %99 = vst.msk [vmem:[#allocation4 + $0x50] sm:$0xff] %vm6914_vm0, %v4185_v29  ;;  %100 = vst.msk [vmem:[#allocation4 + $0x58] sm:$0xff] %vm6914_vm0, %v4185_v29 }
 0x11f   :  { %101 = vst.msk [vmem:[#allocation4 + $0x60] sm:$0xff] %vm6914_vm0, %v4185_v29  ;;  %102 = vst.msk [vmem:[#allocation4 + $0x68] sm:$0xff] %vm6914_vm0, %v4185_v29 }
 0x120   :  { %103 = vst.msk [vmem:[#allocation4 + $0x70] sm:$0xff] %vm6914_vm0, %v4185_v29  ;;  %104 = vst.msk [vmem:[#allocation4 + $0x78] sm:$0xff] %vm6914_vm0, %v4185_v29 }
 0x121   :  { %105 = vst.msk [vmem:[#allocation4 + $0x80] sm:$0xff] %vm6914_vm0, %v4185_v29  ;;  %106 = vst.msk [vmem:[#allocation4 + $0x88] sm:$0xff] %vm6914_vm0, %v4185_v29 }
 0x122   :  { %107 = vst.msk [vmem:[#allocation4 + $0x90] sm:$0xff] %vm6914_vm0, %v4185_v29  ;;  %108 = vst.msk [vmem:[#allocation4 + $0x98] sm:$0xff] %vm6914_vm0, %v4185_v29 }
 0x123   :  { %109 = vst.msk [vmem:[#allocation4 + $0xa0] sm:$0xff] %vm6914_vm0, %v4185_v29  ;;  %110 = vst.msk [vmem:[#allocation4 + $0xa8] sm:$0xff] %vm6914_vm0, %v4185_v29 }
 0x124   :  { %111 = vst.msk [vmem:[#allocation4 + $0xb0] sm:$0xff] %vm6914_vm0, %v4185_v29  ;;  %112 = vst.msk [vmem:[#allocation4 + $0xb8] sm:$0xff] %vm6914_vm0, %v4185_v29 }
 0x125   :  { %113 = vst.msk [vmem:[#allocation4 + $0xc0] sm:$0xff] %vm6914_vm0, %v4185_v29  ;;  %114 = vst.msk [vmem:[#allocation4 + $0xc8] sm:$0xff] %vm6914_vm0, %v4185_v29 }
 0x126   :  { %115 = vst.msk [vmem:[#allocation4 + $0xd0] sm:$0xff] %vm6914_vm0, %v4185_v29  ;;  %116 = vst.msk [vmem:[#allocation4 + $0xd8] sm:$0xff] %vm6914_vm0, %v4185_v29 }
 0x127   :  { %117 = vst.msk [vmem:[#allocation4 + $0xe0] sm:$0xff] %vm6914_vm0, %v4185_v29  ;;  %118 = vst.msk [vmem:[#allocation4 + $0xe8] sm:$0xff] %vm6914_vm0, %v4185_v29 }
 0x128   :  { %119 = vst.msk [vmem:[#allocation4 + $0xf0] sm:$0xff] %vm6914_vm0, %v4185_v29  ;;  %120 = vst.msk [vmem:[#allocation4 + $0xf8] sm:$0xff] %vm6914_vm0, %v4185_v29  ;;  %vm7200_vm0 = vcmp.eq.s32.totalorder %v4863_v9, %v4536_v12 }
 0x129   :  { %vm5029_vm11 = vmand %vm7196_vm5, %vm7195_vm14  ;;  %v1209_v29 = vsel %vm7200_vm0, %v4883_v31, 0.0  ;;  %vm6920_vm14 = vcmp.ne.s32.totalorder %v4672_v34, %v4830_v63  ;;  %vm7202_vm0 = vcmp.ne.s32.totalorder %v4674_v35, %v4830_v63  ;;  %vm7204_vm5 = vcmp.lt.s32.totalorder %v4536_v12, 192 }
 0x12a   :  { %v7198_v0 = vsel %vm5029_vm11, 4294967295, %v7197_v0  ;;  %v5046_v8 = vsel %vm5029_vm11, %v4840_v57, -1e+30  ;;  %1290 = vadd.xlane.f32.xlu0 %v1209_v29  ;;  %v5054_v9 = vsel %vm7202_vm0, %v4832_v1, -1e+30  ;;  %v805_v30 = vsel %vm6920_vm14, 0.0, %v4860_v32  ;;  %vm5062_vm12 = vmand %vm678_vm7, %vm7204_vm5 }
 0x12b   :  { %7199 = vst [vmem:[#allocation60_spill] sm:$0xff] %v7198_v0  ;;  %7201 = vst [vmem:[#allocation61_spill] sm:$0xff] %v5046_v8  ;;  %v7205_v57 = vmov 0  ;;  %v886_v0 = vadd.f32 %v806_v33, %v805_v30  ;;  %v1624_v60 = vmax.f32 %v5054_v9, %v5046_v8  ;;  %v1009_v29 = vadd.s32 16, %v4517_v4 }
 0x12c   :  { %7203 = vst [vmem:[#allocation62_spill] sm:$0xff] %v5054_v9  ;;  %v7206_v57 = vsel %vm5062_vm12, 4294967295, %v7205_v57  ;;  %v774_v35 = vsel %vm678_vm7, 0.0, %v355_v62  ;;  %v5071_v1 = vsel %vm5062_vm12, %v355_v62, -1e+30  ;;  %vm6924_vm0 = vcmp.ne.s32.totalorder %v4521_v6, %v4830_v63  ;;  %vm7210_vm7 = vmmov %vm7204_vm5  ;;  %v5105_v6 = vpop.f32.mrf.mxu1 }
 0x12d   :  { %7207 = vst [vmem:[#allocation63_spill] sm:$0xff] %v7206_v57  ;;  %7208 = vst [vmem:[#allocation64_spill] sm:$0xff] %v5071_v1  ;;  %1625 = vmax.xlane.f32.xlu1 %v1624_v60  ;;  %v5081_v33 = vsel %vm6924_vm0, %v4858_v59, -1e+30  ;;  %v773_v30 = vsel %vm6924_vm0, 0.0, %v4858_v59  ;;  %vm7211_vm5 = vcmp.ne.s32.totalorder %v4672_v34, %v4539_v13  ;;  %vm1082_vm12 = vcmp.eq.s32.totalorder %v1009_v29, %v4523_v7 }
 0x12e   :  { %887 = vadd.xlane.f32.xlu0 %v886_v0  ;;  %7209 = vst [vmem:[#allocation65_spill] sm:$0xff] %v5081_v33  ;;  %v1579_v62 = vmax.f32 %v5081_v33, %v5071_v1  ;;  %v838_v57 = vadd.f32 %v774_v35, %v773_v30  ;;  %vm5094_vm14 = vmand %vm7211_vm5, %vm7210_vm7  ;;  %v7212_v0 = vmov 0  ;;  %v1025_v60 = vadd.s32 144, %v4517_v4  ;;  %v5107_v35 = vpop.f32.mrf.mxu0 }
 0x12f   :  { %v7213_v0 = vsel %vm5094_vm14, 4294967295, %v7212_v0  ;;  %v5103_v59 = vsel %vm5094_vm14, %v4883_v31, -1e+30  ;;  %vm7215_vm7 = vcmp.ne.s32.totalorder %v4672_v34, %v4830_v63  ;;  %v1178_v29 = vsel %vm1082_vm12, %v5075_v58, 0.0 }
 0x130   :  { %7214 = vst [vmem:[#allocation66_spill] sm:$0xff] %v7213_v0  ;;  %v5113_v30 = vsel %vm7215_vm7, %v4860_v32, -1e+30  ;;  %vm7216_vm5 = vcmask 7168   ;;  %v1010_v32 = vadd.s32 24, %v4517_v4 }
 0x131   :  { %839 = vadd.xlane.f32.xlu1 %v838_v57  ;;  %25 = vst.msk [vmem:[#allocation2] sm:$0xff] %vm7216_vm5, %v4186_v3  ;;  %vm7217_vm0 = vmmov %vm7216_vm5  ;;  %v1627_v31 = vmax.f32 %v5113_v30, %v5103_v59 }
 0x132   :  { %1580 = vmax.xlane.f32.xlu0 %v1579_v62  ;;  %26 = vst.msk [vmem:[#allocation2 + $0x8] sm:$0xff] %vm7217_vm0, %v4186_v3  ;;  %vm7218_vm11 = vmmov %vm7217_vm0  ;;  %v457_v62 = vpop.f32.mrf.mxu1 }
 0x133   :  { %27 = vst.msk [vmem:[#allocation2 + $0x10] sm:$0xff] %vm7218_vm11, %v4186_v3  ;;  %vm7219_vm14 = vmmov %vm7217_vm0 }
 0x134   :  { %28 = vst.msk [vmem:[#allocation2 + $0x18] sm:$0xff] %vm7219_vm14, %v4186_v3  ;;  %vm7220_vm10 = vmmov %vm7217_vm0  ;;  %v461_v1 = vpop.f32.mrf.mxu1 }
 0x135   :  { %29 = vst.msk [vmem:[#allocation2 + $0x20] sm:$0xff] %vm7220_vm10, %v4186_v3  ;;  %vm7221_vm2 = vmmov %vm7217_vm0  ;;  %1245 = vadd.xlane.f32.xlu1 %v1178_v29  ;;  %v365_v29 = vpop.f32.mrf.mxu0 }
 0x136   :  { %30 = vst.msk [vmem:[#allocation2 + $0x28] sm:$0xff] %vm7221_vm2, %v4186_v3  ;;  %vm7222_vm8 = vmmov %vm7217_vm0  ;;  %1628 = vmax.xlane.f32.xlu0 %v1627_v31  ;;  %v1026_v31 = vadd.s32 152, %v4517_v4 }
 0x137   :  { %31 = vst.msk [vmem:[#allocation2 + $0x30] sm:$0xff] %vm7222_vm8, %v4186_v3  ;;  %vm7223_vm9 = vmmov %vm7217_vm0  ;;  %v367_v33 = vpop.f32.mrf.mxu0 }
 0x138   :  { %32 = vst.msk [vmem:[#allocation2 + $0x38] sm:$0xff] %vm7223_vm9, %v4186_v3  ;;  %vm7224_vm7 = vmmov %vm7217_vm0 }
 0x139   :  { %33 = vst.msk [vmem:[#allocation2 + $0x40] sm:$0xff] %vm7224_vm7, %v4186_v3  ;;  %vm7225_vm12 = vmmov %vm7217_vm0 }
 0x13a   :  { %34 = vst.msk [vmem:[#allocation2 + $0x48] sm:$0xff] %vm7225_vm12, %v4186_v3  ;;  %vm7226_vm6 = vmmov %vm7217_vm0 }
 0x13b   :  { %35 = vst.msk [vmem:[#allocation2 + $0x50] sm:$0xff] %vm7226_vm6, %v4186_v3  ;;  %vm7227_vm5 = vmmov %vm7217_vm0 }
 0x13c   :  { %36 = vst.msk [vmem:[#allocation2 + $0x58] sm:$0xff] %vm7227_vm5, %v4186_v3  ;;  %vm7228_vm11 = vmmov %vm7217_vm0 }
 0x13d   :  { %37 = vst.msk [vmem:[#allocation2 + $0x60] sm:$0xff] %vm7217_vm0, %v4186_v3  ;;  %vm7229_vm14 = vmmov %vm7217_vm0 }
 0x13e   :  { %38 = vst.msk [vmem:[#allocation2 + $0x68] sm:$0xff] %vm7228_vm11, %v4186_v3  ;;  %vm7230_vm10 = vmmov %vm7217_vm0 }
 0x13f   :  { %39 = vst.msk [vmem:[#allocation2 + $0x70] sm:$0xff] %vm7229_vm14, %v4186_v3  ;;  %vm7231_vm2 = vmmov %vm7217_vm0 }
 0x140   :  { %40 = vst.msk [vmem:[#allocation2 + $0x78] sm:$0xff] %vm7230_vm10, %v4186_v3  ;;  %vm7232_vm8 = vmmov %vm7217_vm0 }
 0x141   :  { %41 = vst.msk [vmem:[#allocation2 + $0x80] sm:$0xff] %vm7231_vm2, %v4186_v3  ;;  %vm7233_vm9 = vmmov %vm7217_vm0 }
 0x142   :  { %42 = vst.msk [vmem:[#allocation2 + $0x88] sm:$0xff] %vm7232_vm8, %v4186_v3  ;;  %vm7234_vm7 = vmmov %vm7217_vm0 }
 0x143   :  { %43 = vst.msk [vmem:[#allocation2 + $0x90] sm:$0xff] %vm7233_vm9, %v4186_v3  ;;  %vm7235_vm12 = vmmov %vm7217_vm0 }
 0x144   :  { %44 = vst.msk [vmem:[#allocation2 + $0x98] sm:$0xff] %vm7234_vm7, %v4186_v3  ;;  %vm7236_vm6 = vmmov %vm7217_vm0 }
 0x145   :  { %45 = vst.msk [vmem:[#allocation2 + $0xa0] sm:$0xff] %vm7235_vm12, %v4186_v3  ;;  %vm7237_vm5 = vmmov %vm7217_vm0 }
 0x146   :  { %46 = vst.msk [vmem:[#allocation2 + $0xa8] sm:$0xff] %vm7236_vm6, %v4186_v3  ;;  %vm7238_vm11 = vmmov %vm7217_vm0  ;;  %vm680_vm6 = vcmp.ne.s32.totalorder %v4513_v2, %v4539_v13 }
 0x147   :  { %47 = vst.msk [vmem:[#allocation2 + $0xb0] sm:$0xff] %vm7237_vm5, %v4186_v3  ;;  %vm7239_vm14 = vmmov %vm7217_vm0  ;;  %vm1115_vm5 = vcmp.eq.s32.totalorder %v1025_v60, %v4536_v12  ;;  %v776_v57 = vsel %vm680_vm6, 0.0, %v5107_v35 }
 0x148   :  { %48 = vst.msk [vmem:[#allocation2 + $0xb8] sm:$0xff] %vm7217_vm0, %v4186_v3  ;;  %vm7240_vm10 = vmmov %vm7217_vm0  ;;  %v1211_v0 = vsel %vm1115_vm5, %v457_v62, 0.0  ;;  %vm6949_vm5 = vcmp.ne.s32.totalorder %v4519_v5, %v4830_v63 }
 0x149   :  { %49 = vst.msk [vmem:[#allocation2 + $0xc0] sm:$0xff] %vm7238_vm11, %v4186_v3  ;;  %vm7241_vm2 = vmmov %vm7217_vm0  ;;  %vm1084_vm11 = vcmp.eq.s32.totalorder %v1010_v32, %v4523_v7  ;;  %1293 = vadd.xlane.f32.xlu1 %v1211_v0  ;;  %v5261_v9 = vsel %vm6949_vm5, %v365_v29, -1e+30 }
 0x14a   :  { %50 = vst.msk [vmem:[#allocation2 + $0xc8] sm:$0xff] %vm7239_vm14, %v4186_v3  ;;  %vm7242_vm8 = vmmov %vm7217_vm0  ;;  %vm712_vm14 = vcmp.ne.s32.totalorder %v4678_v37, %v4539_v13 }
 0x14b   :  { %51 = vst.msk [vmem:[#allocation2 + $0xd0] sm:$0xff] %vm7240_vm10, %v4186_v3  ;;  %vm7243_vm9 = vmmov %vm7217_vm0  ;;  %v808_v34 = vsel %vm712_vm14, 0.0, %v457_v62  ;;  %vm6942_vm10 = vcmp.ne.s32.totalorder %v4678_v37, %v4830_v63 }
 0x14c   :  { %52 = vst.msk [vmem:[#allocation2 + $0xd8] sm:$0xff] %vm7241_vm2, %v4186_v3  ;;  %vm7244_vm7 = vmmov %vm7217_vm0  ;;  %v807_v32 = vsel %vm6942_vm10, 0.0, %v5105_v6  ;;  %vm7246_vm2 = vcmp.lt.s32.totalorder %v4536_v12, 192 }
 0x14d   :  { %53 = vst.msk [vmem:[#allocation2 + $0xe0] sm:$0xff] %vm7242_vm8, %v4186_v3  ;;  %vm7245_vm12 = vmmov %vm7217_vm0  ;;  %vm6950_vm0 = vcmp.ne.s32.totalorder %v4513_v2, %v4830_v63  ;;  %v777_v2 = vsel %vm6949_vm5, 0.0, %v365_v29  ;;  %vm7266_vm5 = vcmp.lt.s32.totalorder %v4536_v12, 192 }
 0x14e   :  { %54 = vst.msk [vmem:[#allocation2 + $0xe8] sm:$0xff] %vm7243_vm9, %v4186_v3  ;;  %vm5182_vm8 = vmand %vm680_vm6, %vm7246_vm2  ;;  %vm1117_vm9 = vcmp.eq.s32.totalorder %v1026_v31, %v4536_v12  ;;  %v5196_v8 = vsel %vm6950_vm0, %v5075_v58, -1e+30  ;;  %v1011_v31 = vadd.s32 32, %v4517_v4 }
 0x14f   :  { %55 = vst.msk [vmem:[#allocation2 + $0xf0] sm:$0xff] %vm7244_vm7, %v4186_v3  ;;  %v5189_v0 = vsel %vm5182_vm8, %v5107_v35, -1e+30  ;;  %vm682_vm7 = vcmp.ne.s32.totalorder %v4519_v5, %v4539_v13  ;;  %v7252_v35 = vmov 0 }
 0x150   :  { %56 = vst.msk [vmem:[#allocation2 + $0xf8] sm:$0xff] %vm7245_vm12, %v4186_v3  ;;  %v775_v3 = vsel %vm6950_vm0, 0.0, %v5075_v58  ;;  %7250 = vst [vmem:[#allocation68_spill] sm:$0xff] %v5189_v0  ;;  %v778_v58 = vsel %vm682_vm7, 0.0, %v367_v33 }
 0x151   :  { %v841_v60 = vadd.f32 %v776_v57, %v775_v3  ;;  %v1180_v57 = vsel %vm1084_vm11, %v365_v29, 0.0  ;;  %v7247_v3 = vmov 0  ;;  %vm7251_vm12 = vmmov %vm7246_vm2  ;;  %vm714_vm11 = vcmp.ne.s32.totalorder %v4676_v36, %v4539_v13 }
 0x152   :  { %v7248_v3 = vsel %vm5182_vm8, 4294967295, %v7247_v3  ;;  %vm5207_vm6 = vmand %vm712_vm14, %vm7251_vm12  ;;  %vm1086_vm14 = vcmp.eq.s32.totalorder %v1011_v31, %v4523_v7  ;;  %vm6948_vm2 = vcmp.ne.s32.totalorder %v4676_v36, %v4830_v63  ;;  %v7258_v31 = vmov 0 }
 0x153   :  { %842 = vadd.xlane.f32.xlu0 %v841_v60  ;;  %7249 = vst [vmem:[#allocation67_spill] sm:$0xff] %v7248_v3  ;;  %v889_v60 = vadd.f32 %v808_v34, %v807_v32  ;;  %v463_v34 = vpop.f32.mrf.mxu1  ;;  %v1582_v32 = vmax.f32 %v5196_v8, %v5189_v0  ;;  %v7253_v35 = vsel %vm5207_vm6, 4294967295, %v7252_v35  ;;  %v5225_v3 = vsel %vm6942_vm10, %v5105_v6, -1e+30 }
 0x154   :  { %7254 = vst [vmem:[#allocation69_spill] sm:$0xff] %v7253_v35  ;;  %7256 = vst [vmem:[#allocation71_spill] sm:$0xff] %v5225_v3  ;;  %v810_v6 = vsel %vm714_vm11, 0.0, %v463_v34 }
 0x155   :  { %890 = vadd.xlane.f32.xlu1 %v889_v60  ;;  %v5217_v60 = vsel %vm5207_vm6, %v457_v62, -1e+30  ;;  %v844_v62 = vadd.f32 %v778_v58, %v777_v2  ;;  %v467_v37 = vpop.f32.mrf.mxu1  ;;  %v809_v2 = vsel %vm6948_vm2, 0.0, %v461_v1 }
 0x156   :  { %7255 = vst [vmem:[#allocation70_spill] sm:$0xff] %v5217_v60  ;;  %v1630_v35 = vmax.f32 %v5225_v3, %v5217_v60  ;;  %v892_v60 = vadd.f32 %v810_v6, %v809_v2  ;;  %v5289_v2 = vsel %vm6948_vm2, %v461_v1, -1e+30  ;;  %vm6954_vm2 = vcmp.ne.s32.totalorder %v4682_v39, %v4830_v63 }
 0x157   :  { %1248 = vadd.xlane.f32.xlu0 %v1180_v57  ;;  %v1213_v57 = vsel %vm1117_vm9, %v463_v34, 0.0  ;;  %vm7257_vm9 = vmmov %vm7251_vm12  ;;  %v469_v3 = vpop.f32.mrf.mxu1 }
 0x158   :  { %vm5249_vm12 = vmand %vm682_vm7, %vm7257_vm9  ;;  %vm684_vm7 = vcmp.ne.s32.totalorder %v4533_v11, %v4539_v13 }
 0x159   :  { %1583 = vmax.xlane.f32.xlu1 %v1582_v32  ;;  %v1027_v32 = vadd.s32 160, %v4517_v4  ;;  %v7259_v31 = vsel %vm5249_vm12, 4294967295, %v7258_v31  ;;  %vm5313_vm0 = vmand %vm684_vm7, %vm7266_vm5  ;;  %vm686_vm5 = vcmp.ne.s32.totalorder %v4531_v10, %v4539_v13 }
 0x15a   :  { %7260 = vst [vmem:[#allocation72_spill] sm:$0xff] %v7259_v31 }
 0x15b   :  { %1296 = vadd.xlane.f32.xlu0 %v1213_v57  ;;  %v371_v57 = vpop.f32.mrf.mxu0  ;;  %vm1119_vm10 = vcmp.eq.s32.totalorder %v1027_v32, %v4536_v12 }
 0x15c   :  { %v1182_v58 = vsel %vm1086_vm14, %v371_v57, 0.0  ;;  %v1215_v0 = vsel %vm1119_vm10, %v469_v3, 0.0  ;;  %vm7261_vm14 = vmmov %vm7257_vm9  ;;  %vm6955_vm10 = vcmp.ne.s32.totalorder %v4533_v11, %v4830_v63 }
 0x15d   :  { %1631 = vmax.xlane.f32.xlu1 %v1630_v35  ;;  %v5256_v35 = vsel %vm5249_vm12, %v367_v33, -1e+30  ;;  %vm5272_vm9 = vmand %vm714_vm11, %vm7261_vm14  ;;  %v7262_v33 = vmov 0  ;;  %vm716_vm14 = vcmp.ne.s32.totalorder %v4682_v39, %v4539_v13  ;;  %v5325_v5 = vsel %vm6955_vm10, %v371_v57, -1e+30 }
 0x15e   :  { %v1585_v32 = vmax.f32 %v5261_v9, %v5256_v35  ;;  %v7263_v33 = vsel %vm5272_vm9, 4294967295, %v7262_v33  ;;  %v5282_v6 = vsel %vm5272_vm9, %v463_v34, -1e+30  ;;  %v1028_v34 = vadd.s32 168, %v4517_v4  ;;  %7271 = vst [vmem:[#allocation77_spill] sm:$0xff] %v5325_v5 }
 0x15f   :  { %845 = vadd.xlane.f32.xlu0 %v844_v62  ;;  %v373_v62 = vpop.f32.mrf.mxu0  ;;  %7264 = vst [vmem:[#allocation73_spill] sm:$0xff] %v7263_v33  ;;  %7265 = vst [vmem:[#allocation74_spill] sm:$0xff] %v5282_v6  ;;  %v1633_v31 = vmax.f32 %v5289_v2, %v5282_v6 }
 0x160   :  { %v780_v29 = vsel %vm684_vm7, 0.0, %v373_v62  ;;  %vm7272_vm7 = vcmp.lt.s32.totalorder %v4536_v12, 192 }
 0x161   :  { %1251 = vadd.xlane.f32.xlu1 %v1182_v58  ;;  %v779_v58 = vsel %vm6955_vm10, 0.0, %v371_v57  ;;  %v377_v1 = vpop.f32.mrf.mxu0  ;;  %vm6959_vm10 = vcmp.ne.s32.totalorder %v4531_v10, %v4830_v63 }
 0x162   :  { %v847_v33 = vadd.f32 %v780_v29, %v779_v58  ;;  %v7267_v29 = vmov 0  ;;  %v473_v58 = vpop.f32.mrf.mxu1 }
 0x163   :  { %893 = vadd.xlane.f32.xlu0 %v892_v60  ;;  %v1012_v60 = vadd.s32 40, %v4517_v4  ;;  %v7268_v29 = vsel %vm5313_vm0, 4294967295, %v7267_v29 }
 0x164   :  { %7269 = vst [vmem:[#allocation75_spill] sm:$0xff] %v7268_v29  ;;  %v475_v6 = vpop.f32.mrf.mxu1  ;;  %v781_v29 = vsel %vm6959_vm10, 0.0, %v377_v1  ;;  %vm7280_vm10 = vcmp.lt.s32.totalorder %v4536_v12, 192 }
 0x165   :  { %1299 = vadd.xlane.f32.xlu1 %v1215_v0  ;;  %vm1088_vm11 = vcmp.eq.s32.totalorder %v1012_v60, %v4523_v7  ;;  %v812_v0 = vsel %vm716_vm14, 0.0, %v469_v3 }
 0x166   :  { %v1184_v60 = vsel %vm1088_vm11, %v377_v1, 0.0  ;;  %vm1121_vm11 = vcmp.eq.s32.totalorder %v1028_v34, %v4536_v12 }
 0x167   :  { %1586 = vmax.xlane.f32.xlu0 %v1585_v32  ;;  %v811_v32 = vsel %vm6954_vm2, 0.0, %v467_v37  ;;  %vm5336_vm2 = vmand %vm716_vm14, %vm7272_vm7  ;;  %v1217_v34 = vsel %vm1121_vm11, %v475_v6, 0.0  ;;  %vm7277_vm14 = vcmp.ne.s32.totalorder %v4682_v39, %v4830_v63  ;;  %vm7279_vm7 = vcmp.ne.s32.totalorder %v4680_v38, %v4539_v13 }
 0x168   :  { %v895_v36 = vadd.f32 %v812_v0, %v811_v32  ;;  %v5346_v32 = vsel %vm5336_vm2, %v469_v3, -1e+30  ;;  %v1029_v3 = vadd.s32 176, %v4517_v4 }
 0x169   :  { %848 = vadd.xlane.f32.xlu1 %v847_v33  ;;  %v379_v33 = vpop.f32.mrf.mxu0  ;;  %7276 = vst [vmem:[#allocation79_spill] sm:$0xff] %v5346_v32 }
 0x16a   :  { %v782_v57 = vsel %vm686_vm5, 0.0, %v379_v33 }
 0x16b   :  { %1634 = vmax.xlane.f32.xlu0 %v1633_v31  ;;  %v5319_v31 = vsel %vm5313_vm0, %v373_v62, -1e+30  ;;  %v1013_v62 = vadd.s32 48, %v4517_v4  ;;  %v850_v11 = vadd.f32 %v782_v57, %v781_v29 }
 0x16c   :  { %7270 = vst [vmem:[#allocation76_spill] sm:$0xff] %v5319_v31  ;;  %v1588_v0 = vmax.f32 %v5325_v5, %v5319_v31 }
 0x16d   :  { %896 = vadd.xlane.f32.xlu1 %v895_v36  ;;  %v7273_v36 = vmov 0  ;;  %vm1090_vm11 = vcmp.eq.s32.totalorder %v1013_v62, %v4523_v7  ;;  %v7281_v62 = vmov 0 }
 0x16e   :  { %v7274_v36 = vsel %vm5336_vm2, 4294967295, %v7273_v36  ;;  %vm5375_vm2 = vmand %vm686_vm5, %vm7280_vm10  ;;  %vm7285_vm10 = vcmp.ne.s32.totalorder %v4543_v15, %v4539_v13  ;;  %vm6973_vm5 = vcmp.ne.s32.totalorder %v4543_v15, %v4830_v63 }
 0x16f   :  { %1254 = vadd.xlane.f32.xlu0 %v1184_v60  ;;  %7275 = vst [vmem:[#allocation78_spill] sm:$0xff] %v7274_v36  ;;  %v5353_v60 = vsel %vm7277_vm14, %v467_v37, -1e+30  ;;  %vm6969_vm14 = vcmp.ne.s32.totalorder %v4680_v38, %v4830_v63  ;;  %v383_v37 = vpop.f32.mrf.mxu0  ;;  %v7282_v62 = vsel %vm5375_vm2, 4294967295, %v7281_v62 }
 0x170   :  { %7278 = vst [vmem:[#allocation80_spill] sm:$0xff] %v5353_v60  ;;  %v1636_v36 = vmax.f32 %v5353_v60, %v5346_v32  ;;  %v813_v29 = vsel %vm6969_vm14, 0.0, %v473_v58  ;;  %v1186_v57 = vsel %vm1090_vm11, %v383_v37, 0.0  ;;  %7283 = vst [vmem:[#allocation81_spill] sm:$0xff] %v7282_v62  ;;  %vm7284_vm11 = vcmp.ne.s32.totalorder %v4531_v10, %v4830_v63 }
 0x171   :  { %1589 = vmax.xlane.f32.xlu1 %v1588_v0  ;;  %v814_v0 = vsel %vm7279_vm7, 0.0, %v475_v6  ;;  %vm1123_vm7 = vcmp.eq.s32.totalorder %v1029_v3, %v4536_v12  ;;  %v5387_v60 = vsel %vm7284_vm11, %v377_v1, -1e+30  ;;  %v5397_v3 = vsel %vm4691_vm15, %v475_v6, -1e+30 }
 0x172   :  { %v898_v39 = vadd.f32 %v814_v0, %v813_v29  ;;  %v1014_v0 = vadd.s32 56, %v4517_v4  ;;  %v783_v1 = vsel %vm6973_vm5, 0.0, %v383_v37  ;;  %vm7286_vm11 = vcmp.ne.s32.totalorder %v4697_v42, %v4539_v13 }
 0x173   :  { %1302 = vadd.xlane.f32.xlu0 %v1217_v34  ;;  %v479_v34 = vpop.f32.mrf.mxu1 }
 0x175   :  { %1637 = vmax.xlane.f32.xlu1 %v1636_v36  ;;  %v385_v36 = vpop.f32.mrf.mxu0  ;;  %v481_v32 = vpop.f32.mrf.mxu1 }
 0x176   :  { %v1219_v31 = vsel %vm1123_vm7, %v481_v32, 0.0  ;;  %vm1092_vm7 = vcmp.eq.s32.totalorder %v1014_v0, %v4523_v7  ;;  %v5423_v0 = vsel %vm4555_vm3, %v385_v36, -1e+30 }
 0x177   :  { %851 = vadd.xlane.f32.xlu0 %v850_v11  ;;  %v5382_v11 = vsel %vm5375_vm2, %v379_v33, -1e+30  ;;  %v784_v33 = vsel %vm7285_vm10, 0.0, %v385_v36  ;;  %vm6971_vm10 = vcmp.ne.s32.totalorder %v4697_v42, %v4830_v63  ;;  %v389_v6 = vpop.f32.mrf.mxu0 }
 0x178   :  { %v1591_v5 = vmax.f32 %v5387_v60, %v5382_v11  ;;  %v1188_v40 = vsel %vm1092_vm7, %v389_v6, 0.0  ;;  %vm7287_vm7 = vcmp.ne.s32.totalorder %v4541_v14, %v4539_v13 }
 0x179   :  { %1257 = vadd.xlane.f32.xlu1 %v1186_v57  ;;  %v853_v57 = vadd.f32 %v784_v33, %v783_v1  ;;  %v485_v33 = vpop.f32.mrf.mxu1  ;;  %v391_v38 = vpop.f32.mrf.mxu0 }
 0x17a   :  { %v786_v36 = vsel %vm7287_vm7, 0.0, %v391_v38  ;;  %vm7288_vm7 = vcmp.ne.s32.totalorder %v4695_v41, %v4539_v13 }
 0x17b   :  { %899 = vadd.xlane.f32.xlu0 %v898_v39  ;;  %v5404_v39 = vsel %vm6969_vm14, %v473_v58, -1e+30  ;;  %v1030_v58 = vadd.s32 184, %v4517_v4  ;;  %vm6977_vm14 = vcmp.ne.s32.totalorder %v4541_v14, %v4830_v63 }
 0x17c   :  { %v1639_v29 = vmax.f32 %v5404_v39, %v5397_v3 }
 0x17d   :  { %1305 = vadd.xlane.f32.xlu1 %v1219_v31  ;;  %v815_v31 = vsel %vm6971_vm10, 0.0, %v479_v34 }
 0x17f   :  { %1592 = vmax.xlane.f32.xlu0 %v1591_v5  ;;  %v816_v5 = vsel %vm7286_vm11, 0.0, %v481_v32  ;;  %vm1125_vm11 = vcmp.eq.s32.totalorder %v1030_v58, %v4536_v12  ;;  %v785_v58 = vsel %vm6977_vm14, 0.0, %v389_v6 }
 0x180   :  { %v901_v1 = vadd.f32 %v816_v5, %v815_v31  ;;  %v1015_v5 = vadd.s32 64, %v4517_v4 }
 0x181   :  { %854 = vadd.xlane.f32.xlu1 %v853_v57  ;;  %v487_v57 = vpop.f32.mrf.mxu1 }
 0x182   :  { %v1221_v31 = vsel %vm1125_vm11, %v487_v57, 0.0  ;;  %vm1094_vm11 = vcmp.eq.s32.totalorder %v1015_v5, %v4523_v7  ;;  %v5466_v5 = vsel %vm4564_vm4, %v391_v38, -1e+30 }
 0x183   :  { %1640 = vmax.xlane.f32.xlu0 %v1639_v29  ;;  %v5429_v29 = vsel %vm6973_vm5, %v383_v37, -1e+30  ;;  %v5446_v37 = vsel %vm6971_vm10, %v479_v34, -1e+30  ;;  %vm6979_vm10 = vcmp.ne.s32.totalorder %v4695_v41, %v4830_v63  ;;  %v395_v34 = vpop.f32.mrf.mxu0 }
 0x184   :  { %v1594_v62 = vmax.f32 %v5429_v29, %v5423_v0 }
 0x185   :  { %902 = vadd.xlane.f32.xlu1 %v901_v1  ;;  %v856_v1 = vadd.f32 %v786_v36, %v785_v58  ;;  %v817_v36 = vsel %vm6979_vm10, 0.0, %v485_v33  ;;  %v1190_v58 = vsel %vm1094_vm11, %v395_v34, 0.0  ;;  %v397_v16 = vpop.f32.mrf.mxu0  ;;  %vm7289_vm11 = vcmp.ne.s32.totalorder %v4570_v19, %v4539_v13 }
 0x186   :  { %v788_v38 = vsel %vm7289_vm11, 0.0, %v397_v16  ;;  %vm7290_vm11 = vcmp.ne.s32.totalorder %v4723_v46, %v4539_v13 }
 0x187   :  { %1260 = vadd.xlane.f32.xlu0 %v1188_v40  ;;  %v5439_v40 = vsel %vm4708_vm1, %v481_v32, -1e+30  ;;  %v1031_v32 = vadd.s32 192, %v4517_v4 }
 0x188   :  { %v1642_v43 = vmax.f32 %v5446_v37, %v5439_v40 }
 0x189   :  { %1595 = vmax.xlane.f32.xlu1 %v1594_v62  ;;  %v818_v62 = vsel %vm7288_vm7, 0.0, %v487_v57  ;;  %vm1127_vm5 = vcmp.eq.s32.totalorder %v1031_v32, %v4536_v12  ;;  %v5481_v32 = vsel %vm4717_vm13, %v487_v57, -1e+30  ;;  %vm6983_vm7 = vcmp.ne.s32.totalorder %v4570_v19, %v4830_v63  ;;  %v401_v57 = vpop.f32.mrf.mxu0 }
 0x18a   :  { %v904_v42 = vadd.f32 %v818_v62, %v817_v36  ;;  %v1016_v62 = vadd.s32 72, %v4517_v4 }
 0x18b   :  { %1308 = vadd.xlane.f32.xlu0 %v1221_v31  ;;  %v491_v31 = vpop.f32.mrf.mxu1  ;;  %v403_v41 = vpop.f32.mrf.mxu0 }
 0x18d   :  { %1643 = vmax.xlane.f32.xlu1 %v1642_v43  ;;  %v493_v15 = vpop.f32.mrf.mxu1  ;;  %v5471_v43 = vsel %vm6977_vm14, %v389_v6, -1e+30  ;;  %v787_v6 = vsel %vm6983_vm7, 0.0, %v395_v34  ;;  %vm6982_vm14 = vcmp.ne.s32.totalorder %v4723_v46, %v4830_v63 }
 0x18e   :  { %v1597_v10 = vmax.f32 %v5471_v43, %v5466_v5 }
 0x18f   :  { %857 = vadd.xlane.f32.xlu0 %v856_v1  ;;  %v1223_v1 = vsel %vm1127_vm5, %v493_v15, 0.0  ;;  %vm1096_vm5 = vcmp.eq.s32.totalorder %v1016_v62, %v4523_v7 }
 0x190   :  { %v1192_v44 = vsel %vm1096_vm5, %v401_v57, 0.0  ;;  %vm7292_vm5 = vcmp.ne.s32.totalorder %v4568_v18, %v4539_v13 }
 0x191   :  { %1263 = vadd.xlane.f32.xlu1 %v1190_v58  ;;  %v859_v58 = vadd.f32 %v788_v38, %v787_v6  ;;  %v497_v38 = vpop.f32.mrf.mxu1 }
 0x193   :  { %905 = vadd.xlane.f32.xlu0 %v904_v42  ;;  %v5488_v42 = vsel %vm6979_vm10, %v485_v33, -1e+30  ;;  %v1032_v33 = vadd.s32 200, %v4517_v4  ;;  %vm7291_vm10 = vnez %v7111_v20 }
 0x194   :  { %v1645_v36 = vmax.f32 %v5488_v42, %v5481_v32  ;;  %v5507_v62 = vsel %vm7291_vm10, %v397_v16, -1e+30  ;;  %v790_v16 = vsel %vm7292_vm5, 0.0, %v403_v41  ;;  %vm6986_vm10 = vcmp.ne.s32.totalorder %v4568_v18, %v4830_v63 }
 0x195   :  { %1311 = vadd.xlane.f32.xlu1 %v1223_v1  ;;  %v819_v1 = vsel %vm6982_vm14, 0.0, %v491_v31  ;;  %vm7293_vm14 = vnez %v7160_v47  ;;  %vm7295_vm5 = vcmp.ne.s32.totalorder %v4721_v45, %v4539_v13 }
 0x197   :  { %1598 = vmax.xlane.f32.xlu0 %v1597_v10  ;;  %v820_v10 = vsel %vm7290_vm11, 0.0, %v493_v15  ;;  %vm1129_vm11 = vcmp.eq.s32.totalorder %v1032_v33, %v4536_v12  ;;  %v789_v33 = vsel %vm6986_vm10, 0.0, %v401_v57 }
 0x198   :  { %v907_v6 = vadd.f32 %v820_v10, %v819_v1  ;;  %v1017_v10 = vadd.s32 80, %v4517_v4 }
 0x199   :  { %860 = vadd.xlane.f32.xlu1 %v859_v58  ;;  %v499_v58 = vpop.f32.mrf.mxu1 }
 0x19a   :  { %v1225_v1 = vsel %vm1129_vm11, %v499_v58, 0.0  ;;  %vm1098_vm11 = vcmp.eq.s32.totalorder %v1017_v10, %v4523_v7 }
 0x19b   :  { %1646 = vmax.xlane.f32.xlu0 %v1645_v36  ;;  %v5513_v36 = vsel %vm6983_vm7, %v395_v34, -1e+30  ;;  %vm7294_vm7 = vcmp.ne.s32.totalorder %v4723_v46, %v4830_v63 }
 0x19c   :  { %v1600_v17 = vmax.f32 %v5513_v36, %v5507_v62  ;;  %v5530_v34 = vsel %vm7294_vm7, %v491_v31, -1e+30  ;;  %vm6990_vm7 = vcmp.ne.s32.totalorder %v4721_v45, %v4830_v63  ;;  %v407_v31 = vpop.f32.mrf.mxu0 }
 0x19d   :  { %908 = vadd.xlane.f32.xlu1 %v907_v6  ;;  %v862_v6 = vadd.f32 %v790_v16, %v789_v33  ;;  %v821_v16 = vsel %vm6990_vm7, 0.0, %v497_v38  ;;  %v1194_v33 = vsel %vm1098_vm11, %v407_v31, 0.0  ;;  %vm7298_vm11 = vcmp.ne.s32.totalorder %v4596_v23, %v4539_v13 }
 0x19e   :  { %v409_v20 = vpop.f32.mrf.mxu0  ;;  %vm7299_vm7 = vnez %v7163_v48 }
 0x19f   :  { %1266 = vadd.xlane.f32.xlu0 %v1192_v44  ;;  %v5523_v44 = vsel %vm7293_vm14, %v493_v15, -1e+30  ;;  %v1033_v15 = vadd.s32 208, %v4517_v4  ;;  %vm7296_vm14 = vnez %v7114_v21 }
 0x1a0   :  { %v1648_v47 = vmax.f32 %v5530_v34, %v5523_v44  ;;  %v5550_v10 = vsel %vm7296_vm14, %v403_v41, -1e+30  ;;  %v792_v41 = vsel %vm7298_vm11, 0.0, %v409_v20  ;;  %vm6995_vm14 = vcmp.ne.s32.totalorder %v4596_v23, %v4830_v63  ;;  %v739_v23 = vld [vmem:[#allocation4] sm:$0xff] }
 0x1a1   :  { %1601 = vmax.xlane.f32.xlu1 %v1600_v17  ;;  %v822_v17 = vsel %vm7295_vm5, 0.0, %v499_v58  ;;  %vm1131_vm10 = vcmp.eq.s32.totalorder %v1033_v15, %v4536_v12  ;;  %vm7297_vm5 = vcmp.ne.s32.totalorder %v4568_v18, %v4830_v63  ;;  %v5565_v15 = vsel %vm7299_vm7, %v499_v58, -1e+30  ;;  %v413_v58 = vpop.f32.mrf.mxu0 }
 0x1a2   :  { %v910_v46 = vadd.f32 %v822_v17, %v821_v16  ;;  %v1018_v17 = vadd.s32 88, %v4517_v4  ;;  %vm7301_vm11 = vcmp.ne.s32.totalorder %v4749_v50, %v4539_v13  ;;  %vm6994_vm7 = vcmp.ne.s32.totalorder %v4749_v50, %v4830_v63 }
 0x1a3   :  { %1314 = vadd.xlane.f32.xlu0 %v1225_v1  ;;  %v503_v1 = vpop.f32.mrf.mxu1 }
 0x1a5   :  { %1649 = vmax.xlane.f32.xlu1 %v1648_v47  ;;  %v505_v19 = vpop.f32.mrf.mxu1  ;;  %v5555_v47 = vsel %vm7297_vm5, %v401_v57, -1e+30  ;;  %v791_v57 = vsel %vm6995_vm14, 0.0, %v407_v31  ;;  %vm1100_vm5 = vcmp.eq.s32.totalorder %v1018_v17, %v4523_v7 }
 0x1a6   :  { %v1603_v14 = vmax.f32 %v5555_v47, %v5550_v10  ;;  %v1196_v48 = vsel %vm1100_vm5, %v413_v58, 0.0  ;;  %vm7305_vm5 = vnez %v7168_v51  ;;  %v1035_v51 = vadd.s32 224, %v4517_v4 }
 0x1a7   :  { %863 = vadd.xlane.f32.xlu0 %v862_v6  ;;  %v1227_v6 = vsel %vm1131_vm10, %v505_v19, 0.0  ;;  %vm7300_vm10 = vcmp.ne.s32.totalorder %v4721_v45, %v4830_v63  ;;  %v415_v45 = vpop.f32.mrf.mxu0 }
 0x1a9   :  { %1269 = vadd.xlane.f32.xlu1 %v1194_v33  ;;  %v865_v33 = vadd.f32 %v792_v41, %v791_v57  ;;  %v509_v41 = vpop.f32.mrf.mxu1 }
 0x1ab   :  { %911 = vadd.xlane.f32.xlu0 %v910_v46  ;;  %v5572_v46 = vsel %vm7300_vm10, %v497_v38, -1e+30  ;;  %v1034_v38 = vadd.s32 216, %v4517_v4  ;;  %vm7302_vm10 = vnez %v7119_v24  ;;  %v511_v21 = vpop.f32.mrf.mxu1 }
 0x1ac   :  { %v1651_v16 = vmax.f32 %v5572_v46, %v5565_v15  ;;  %v5591_v17 = vsel %vm7302_vm10, %v409_v20, -1e+30  ;;  %v5604_v20 = vsel %vm7305_vm5, %v505_v19, -1e+30  ;;  %vm6998_vm10 = vcmp.ne.s32.totalorder %v4594_v22, %v4830_v63 }
 0x1ad   :  { %1317 = vadd.xlane.f32.xlu1 %v1227_v6  ;;  %v823_v6 = vsel %vm6994_vm7, 0.0, %v503_v1  ;;  %7303 = vst [vmem:[#allocation82_spill] sm:$0xff] %v5591_v17  ;;  %7306 = vst [vmem:[#allocation84_spill] sm:$0xff] %v5604_v20  ;;  %vm7307_vm7 = vcmp.ne.s32.totalorder %v4594_v22, %v4539_v13  ;;  %vm7313_vm5 = vcmp.ne.s32.totalorder %v4594_v22, %v4830_v63 }
 0x1af   :  { %1604 = vmax.xlane.f32.xlu0 %v1603_v14  ;;  %v824_v14 = vsel %vm7301_vm11, 0.0, %v505_v19  ;;  %vm1133_vm11 = vcmp.eq.s32.totalorder %v1034_v38, %v4536_v12  ;;  %v793_v19 = vsel %vm6998_vm10, 0.0, %v413_v58  ;;  %vm7311_vm10 = vnez %v7122_v25 }
 0x1b0   :  { %v913_v57 = vadd.f32 %v824_v14, %v823_v6  ;;  %v1019_v14 = vadd.s32 96, %v4517_v4  ;;  %v1229_v38 = vsel %vm1133_vm11, %v511_v21, 0.0  ;;  %vm7310_vm11 = vcmp.ne.s32.totalorder %v4747_v49, %v4539_v13 }
 0x1b1   :  { %866 = vadd.xlane.f32.xlu1 %v865_v33  ;;  %v5641_v24 = vsel %vm7311_vm10, %v415_v45, -1e+30  ;;  %vm7318_vm10 = vcmask 7168  }
 0x1b2   :  { %7312 = vst [vmem:[#allocation86_spill] sm:$0xff] %v5641_v24 }
 0x1b3   :  { %1652 = vmax.xlane.f32.xlu0 %v1651_v16  ;;  %v5597_v16 = vsel %vm6995_vm14, %v407_v31, -1e+30  ;;  %vm7308_vm14 = vcmp.ne.s32.totalorder %v4749_v50, %v4830_v63 }
 0x1b4   :  { %7304 = vst [vmem:[#allocation83_spill] sm:$0xff] %v5597_v16  ;;  %v1606_v33 = vmax.f32 %v5597_v16, %v5591_v17  ;;  %v5614_v31 = vsel %vm7308_vm14, %v503_v1, -1e+30  ;;  %vm7005_vm14 = vcmp.ne.s32.totalorder %v4747_v49, %v4830_v63  ;;  %v5628_v1 = vpop.f32.mrf.mxu0 }
 0x1b5   :  { %914 = vadd.xlane.f32.xlu1 %v913_v57  ;;  %7309 = vst [vmem:[#allocation85_spill] sm:$0xff] %v5614_v31  ;;  %v1654_v57 = vmax.f32 %v5614_v31, %v5604_v20  ;;  %v837_v31 = vpop.xlane.xlu0 %836 }
 0x1b6   :  { %v421_v18 = vpop.f32.mrf.mxu0 }
 0x1b7   :  { %1272 = vadd.xlane.f32.xlu0 %v1196_v48  ;;  %v794_v48 = vsel %vm7307_vm7, 0.0, %v415_v45  ;;  %vm1102_vm7 = vcmp.eq.s32.totalorder %v1019_v14, %v4523_v7  ;;  %v5635_v14 = vpop.xlane.xlu1 %1239  ;;  %v1020_v45 = vadd.s32 104, %v4517_v4 }
 0x1b8   :  { %v868_v6 = vadd.f32 %v794_v48, %v793_v19  ;;  %v825_v48 = vsel %vm7005_vm14, 0.0, %v509_v41  ;;  %v1198_v19 = vsel %vm1102_vm7, %v5628_v1, 0.0  ;;  %vm7315_vm7 = vnez %v7171_v52 }
 0x1b9   :  { %1607 = vmax.xlane.f32.xlu1 %v1606_v33  ;;  %v826_v33 = vsel %vm7310_vm11, 0.0, %v511_v21  ;;  %vm1135_vm11 = vcmp.eq.s32.totalorder %v1035_v51, %v4536_v12  ;;  %v5655_v25 = vsel %vm7315_vm7, %v511_v21, -1e+30  ;;  %vm7317_vm14 = vcmp.ne.s32.totalorder %v4622_v27, %v4539_v13 }
 0x1ba   :  { %v916_v50 = vadd.f32 %v826_v33, %v825_v48  ;;  %v931_v48 = vadd.f32 %v837_v31, %v739_v23  ;;  %7316 = vst [vmem:[#allocation88_spill] sm:$0xff] %v5655_v25 }
 0x1bb   :  { %1320 = vadd.xlane.f32.xlu0 %v1229_v38  ;;  %v5630_v38 = vpop.f32.mrf.mxu1 }
 0x1bc   :  { %964 = vst.msk [vmem:[#allocation4] sm:$0xff] %vm7318_vm10, %v931_v48  ;;  %vm1104_vm10 = vcmp.eq.s32.totalorder %v1020_v45, %v4523_v7 }
 0x1bd   :  { %1655 = vmax.xlane.f32.xlu1 %v1654_v57  ;;  %v517_v20 = vpop.f32.mrf.mxu1  ;;  %v5648_v57 = vpop.xlane.xlu1 %1287 }
 0x1be   :  { %v1231_v33 = vsel %vm1135_vm11, %v517_v20, 0.0  ;;  %vm7319_vm11 = vcmp.ne.s32.totalorder %v4747_v49, %v4830_v63 }
 0x1bf   :  { %869 = vadd.xlane.f32.xlu0 %v868_v6  ;;  %v5646_v6 = vsel %vm7313_vm5, %v413_v58, -1e+30  ;;  %v755_v58 = vld [vmem:[#allocation4 + $0x80] sm:$0xff]  ;;  %vm7008_vm5 = vcmp.ne.s32.totalorder %v4622_v27, %v4830_v63  ;;  %v5666_v23 = vsel %vm7319_vm11, %v509_v41, -1e+30  ;;  %vm7016_vm11 = vcmp.ne.s32.totalorder %v4775_v54, %v4830_v63  ;;  %v5695_v49 = vpop.f32.mrf.mxu1 }
 0x1c0   :  { %7314 = vst [vmem:[#allocation87_spill] sm:$0xff] %v5646_v6  ;;  %v1609_v51 = vmax.f32 %v5646_v6, %v5641_v24  ;;  %7320 = vst [vmem:[#allocation89_spill] sm:$0xff] %v5666_v23  ;;  %v795_v21 = vsel %vm7008_vm5, 0.0, %v5628_v1  ;;  %v1657_v48 = vmax.f32 %v5666_v23, %v5655_v25  ;;  %vm7323_vm5 = vcmask 7168   ;;  %v5704_v23 = vld [vmem:[#allocation2 + $0x80] sm:$0xff]  ;;  %v756_v24 = vld [vmem:[#allocation4 + $0x88] sm:$0xff] }
 0x1c1   :  { %1275 = vadd.xlane.f32.xlu1 %v1198_v19  ;;  %v885_v31 = vpop.xlane.xlu1 %884  ;;  %v5672_v19 = vpop.xlane.xlu0 %1242  ;;  %v827_v45 = vsel %vm7016_vm11, 0.0, %v5630_v38  ;;  %7326 = vst [vmem:[#allocation92_spill] sm:$0xff] %v5704_v23  ;;  %vm7328_vm11 = vcmp.ne.s32.totalorder %v4622_v27, %v4830_v63  ;;  %v5735_v27 = vld [vmem:[#allocation2 + $0x8] sm:$0xff] }
 0x1c2   :  { %v947_v22 = vadd.f32 %v885_v31, %v755_v58  ;;  %7332 = vst [vmem:[#allocation94_spill] sm:$0xff] %v5735_v27 }
 0x1c3   :  { %917 = vadd.xlane.f32.xlu0 %v916_v50  ;;  %v796_v50 = vsel %vm7317_vm14, 0.0, %v421_v18  ;;  %vm7321_vm14 = vcmp.ne.s32.totalorder %v4775_v54, %v4539_v13 }
 0x1c4   :  { %v871_v52 = vadd.f32 %v796_v50, %v795_v21  ;;  %v828_v41 = vsel %vm7321_vm14, 0.0, %v517_v20  ;;  %980 = vst.msk [vmem:[#allocation4 + $0x80] sm:$0xff] %vm7323_vm5, %v947_v22  ;;  %v1036_v50 = vadd.s32 232, %v4517_v4  ;;  %vm7324_vm5 = vnez %v7127_v28 }
 0x1c5   :  { %1323 = vadd.xlane.f32.xlu1 %v1231_v33  ;;  %v5680_v33 = vld [vmem:[#allocation2] sm:$0xff]  ;;  %v1578_v58 = vpop.xlane.xlu1 %1577  ;;  %v5692_v21 = vpop.xlane.xlu0 %1290  ;;  %v919_v22 = vadd.f32 %v828_v41, %v827_v45 }
 0x1c6   :  { %7322 = vst [vmem:[#allocation90_spill] sm:$0xff] %v5680_v33  ;;  %v5698_v25 = vmax.f32 %v5680_v33, %v1578_v58  ;;  %vm1137_vm14 = vcmp.eq.s32.totalorder %v1036_v50, %v4536_v12 }
 0x1c7   :  { %1610 = vmax.xlane.f32.xlu0 %v1609_v51  ;;  %v5684_v51 = vpop.f32.mrf.mxu0 }
 0x1c8   :  { %v1200_v31 = vsel %vm1104_vm10, %v5684_v51, 0.0  ;;  %vm7327_vm10 = vcmask 7168  }
 0x1c9   :  { %872 = vadd.xlane.f32.xlu1 %v871_v52  ;;  %v5702_v52 = vsel %vm7324_vm5, %v421_v18, -1e+30  ;;  %v427_v6 = vpop.f32.mrf.mxu0  ;;  %2440 = vst.msk [vmem:[#allocation2] sm:$0xff] %vm7327_vm10, %v5698_v25  ;;  %v5716_v18 = vsel %vm7328_vm11, %v5628_v1, -1e+30  ;;  %v1626_v41 = vpop.xlane.xlu1 %1625  ;;  %vm7329_vm5 = vnez %v7176_v55  ;;  %vm7331_vm11 = vcmp.ne.s32.totalorder %v4620_v26, %v4539_v13 }
 0x1ca   :  { %7325 = vst [vmem:[#allocation91_spill] sm:$0xff] %v5702_v52  ;;  %v888_v45 = vpop.xlane.xlu0 %887  ;;  %v1612_v58 = vmax.f32 %v5716_v18, %v5702_v52  ;;  %v5729_v1 = vsel %vm7329_vm5, %v517_v20, -1e+30  ;;  %v798_v16 = vsel %vm7331_vm11, 0.0, %v427_v6  ;;  %vm7333_vm5 = vcmask 7168  }
 0x1cb   :  { %1658 = vmax.xlane.f32.xlu0 %v1657_v48  ;;  %v1142_v48 = vld [vmem:[#allocation4] sm:$0xff]  ;;  %v948_v50 = vadd.f32 %v888_v45, %v756_v24  ;;  %7330 = vst [vmem:[#allocation93_spill] sm:$0xff] %v5729_v1  ;;  %vm7334_vm7 = vmmov %vm7333_vm5  ;;  %v1037_v45 = vadd.s32 240, %v4517_v4 }
 0x1cc   :  { %v1334_v17 = vsub.f32 %v1142_v48, %v5635_v14  ;;  %v1021_v14 = vadd.s32 112, %v4517_v4  ;;  %v5721_v48 = vpop.f32.mrf.mxu1  ;;  %v1158_v33 = vld [vmem:[#allocation4 + $0x80] sm:$0xff] }
 0x1cd   :  { %920 = vadd.xlane.f32.xlu1 %v919_v22  ;;  %v740_v22 = vld [vmem:[#allocation4 + $0x8] sm:$0xff]  ;;  %v1233_v28 = vsel %vm1137_vm14, %v5721_v48, 0.0  ;;  %981 = vst.msk [vmem:[#allocation4 + $0x88] sm:$0xff] %vm7334_vm7, %v948_v50  ;;  %vm7335_vm14 = vcmp.ne.s32.totalorder %v4775_v54, %v4830_v63  ;;  %vm7337_vm7 = vmmov %vm7333_vm5  ;;  %v741_v54 = vld [vmem:[#allocation4 + $0x10] sm:$0xff] }
 0x1ce   :  { %1366 = vst.msk [vmem:[#allocation4] sm:$0xff] %vm7327_vm10, %v1334_v17  ;;  %vm7021_vm10 = vcmp.ne.s32.totalorder %v4620_v26, %v4830_v63  ;;  %v1350_v17 = vsub.f32 %v1158_v33, %v5648_v57  ;;  %v5749_v20 = vsel %vm7335_vm14, %v5630_v38, -1e+30  ;;  %v840_v33 = vpop.xlane.xlu1 %839  ;;  %vm1106_vm11 = vcmp.eq.s32.totalorder %v1021_v14, %v4523_v7 }
 0x1cf   :  { %1278 = vadd.xlane.f32.xlu0 %v1200_v31  ;;  %v5725_v31 = vmax.f32 %v5704_v23, %v1626_v41  ;;  %7336 = vst [vmem:[#allocation95_spill] sm:$0xff] %v5749_v20  ;;  %v797_v57 = vsel %vm7021_vm10, 0.0, %v5684_v51  ;;  %v1581_v41 = vpop.xlane.xlu0 %1580  ;;  %v1660_v38 = vmax.f32 %v5749_v20, %v5729_v1  ;;  %v5767_v23 = vld [vmem:[#allocation2 + $0x88] sm:$0xff]  ;;  %vm7028_vm14 = vcmp.ne.s32.totalorder %v4773_v53, %v4830_v63  ;;  %vm7341_vm10 = vmmov %vm7337_vm7 }
 0x1d0   :  { %v874_v50 = vadd.f32 %v798_v16, %v797_v57  ;;  %1382 = vst.msk [vmem:[#allocation4 + $0x80] sm:$0xff] %vm7337_vm7, %v1350_v17  ;;  %7340 = vst [vmem:[#allocation97_spill] sm:$0xff] %v5767_v23  ;;  %v5771_v16 = vpop.f32.mrf.mxu0  ;;  %v5773_v17 = vpop.f32.mrf.mxu1  ;;  %v829_v57 = vsel %vm7028_vm14, 0.0, %v5695_v49 }
 0x1d1   :  { %2456 = vst.msk [vmem:[#allocation2 + $0x80] sm:$0xff] %vm7333_vm5, %v5725_v31  ;;  %1613 = vmax.xlane.f32.xlu1 %v1612_v58  ;;  %v5759_v58 = vmax.f32 %v5735_v27, %v1581_v41  ;;  %vm7339_vm5 = vcmp.ne.s32.totalorder %v4773_v53, %v4539_v13 }
 0x1d2   :  { %v830_v24 = vsel %vm7339_vm5, 0.0, %v5721_v48  ;;  %v433_v1 = vpop.f32.mrf.mxu0  ;;  %v5797_v20 = vpop.f32.mrf.mxu1 }
 0x1d3   :  { %1326 = vadd.xlane.f32.xlu0 %v1233_v28  ;;  %v932_v28 = vadd.f32 %v840_v33, %v740_v22  ;;  %7338 = vst [vmem:[#allocation96_spill] sm:$0xff] %v5759_v58  ;;  %2441 = vst.msk [vmem:[#allocation2 + $0x8] sm:$0xff] %vm7341_vm10, %v5759_v58  ;;  %v5784_v33 = vpop.xlane.xlu1 %1245  ;;  %v1629_v41 = vpop.xlane.xlu0 %1628  ;;  %v922_v22 = vadd.f32 %v830_v24, %v829_v57  ;;  %vm1139_vm10 = vcmp.eq.s32.totalorder %v1037_v45, %v4536_v12 }
 0x1d4   :  { %v5790_v55 = vmax.f32 %v5767_v23, %v1629_v41  ;;  %v1159_v27 = vld [vmem:[#allocation4 + $0x88] sm:$0xff]  ;;  %v1235_v57 = vsel %vm1139_vm10, %v5797_v20, 0.0  ;;  %v7350_v41 = vld [vmem:[#allocation54_spill] sm:$0xff] }
 0x1d5   :  { %965 = vst.msk [vmem:[#allocation4 + $0x8] sm:$0xff] %vm7337_vm7, %v932_v28  ;;  %1661 = vmax.xlane.f32.xlu1 %v1660_v38  ;;  %v1202_v28 = vsel %vm1106_vm11, %v5771_v16, 0.0  ;;  %v1351_v52 = vsub.f32 %v1159_v27, %v5692_v21  ;;  %vm7346_vm11 = vmmov %vm7337_vm7  ;;  %vm7347_vm7 = vcmp.ne.s32.totalorder %v4620_v26, %v4830_v63 }
 0x1d6   :  { %7342 = vst [vmem:[#allocation98_spill] sm:$0xff] %v5790_v55  ;;  %2457 = vst.msk [vmem:[#allocation2 + $0x88] sm:$0xff] %vm7346_vm11, %v5790_v55 }
 0x1d7   :  { %875 = vadd.xlane.f32.xlu0 %v874_v50  ;;  %v7343_v50 = vld [vmem:[#allocation27_spill] sm:$0xff]  ;;  %v5810_v24 = vpop.xlane.xlu1 %1293  ;;  %vm7349_vm14 = vmmov %vm7346_vm11  ;;  %vm7351_vm11 = vnez %v7350_v41 }
 0x1d8   :  { %vm7344_vm5 = vnez %v7343_v50  ;;  %1383 = vst.msk [vmem:[#allocation4 + $0x88] sm:$0xff] %vm7349_vm14, %v1351_v52  ;;  %v757_v50 = vld [vmem:[#allocation4 + $0x90] sm:$0xff] }
 0x1d9   :  { %v5795_v38 = vsel %vm7344_vm5, %v427_v6, -1e+30  ;;  %1281 = vadd.xlane.f32.xlu1 %v1202_v28  ;;  %v5808_v6 = vsel %vm7347_vm7, %v5684_v51, -1e+30  ;;  %v5820_v28 = vsel %vm7351_vm11, %v5721_v48, -1e+30  ;;  %vm7355_vm11 = vcmp.ne.s32.totalorder %v4773_v53, %v4830_v63 }
 0x1da   :  { %7345 = vst [vmem:[#allocation99_spill] sm:$0xff] %v5795_v38  ;;  %7348 = vst [vmem:[#allocation100_spill] sm:$0xff] %v5808_v6  ;;  %v1615_v27 = vmax.f32 %v5808_v6, %v5795_v38  ;;  %v7353_v51 = vld [vmem:[#allocation29_spill] sm:$0xff]  ;;  %v5873_v53 = vld [vmem:[#allocation2 + $0x90] sm:$0xff] }
 0x1db   :  { %923 = vadd.xlane.f32.xlu0 %v922_v22  ;;  %v1022_v22 = vadd.s32 120, %v4517_v4  ;;  %7352 = vst [vmem:[#allocation101_spill] sm:$0xff] %v5820_v28  ;;  %vm7354_vm7 = vcmp.ne.s32.totalorder %v7353_v51, %v4539_v13  ;;  %vm7031_vm10 = vcmp.ne.s32.totalorder %v7353_v51, %v4830_v63  ;;  %7365 = vst [vmem:[#allocation105_spill] sm:$0xff] %v5873_v53 }
 0x1dc   :  { %v843_v45 = vpop.xlane.xlu0 %842  ;;  %v800_v14 = vsel %vm7354_vm7, 0.0, %v433_v1  ;;  %v1143_v23 = vld [vmem:[#allocation4 + $0x8] sm:$0xff]  ;;  %v799_v52 = vsel %vm7031_vm10, 0.0, %v5771_v16  ;;  %vm7357_vm7 = vmmov %vm7349_vm14 }
 0x1dd   :  { %v933_v21 = vadd.f32 %v843_v45, %v741_v54  ;;  %v1335_v26 = vsub.f32 %v1143_v23, %v5672_v19  ;;  %1329 = vadd.xlane.f32.xlu1 %v1235_v57  ;;  %v5833_v54 = vsel %vm7355_vm11, %v5695_v49, -1e+30  ;;  %v877_v41 = vadd.f32 %v800_v14, %v799_v52  ;;  %v7358_v49 = vld [vmem:[#allocation56_spill] sm:$0xff]  ;;  %vm7361_vm5 = vmmov %vm7357_vm7  ;;  %v5864_v52 = vpop.f32.mrf.mxu1 }
 0x1de   :  { %7356 = vst [vmem:[#allocation102_spill] sm:$0xff] %v5833_v54  ;;  %v891_v48 = vpop.xlane.xlu1 %890  ;;  %v1663_v19 = vmax.f32 %v5833_v54, %v5820_v28  ;;  %vm7359_vm11 = vcmp.ne.s32.totalorder %v7358_v49, %v4539_v13  ;;  %vm7037_vm10 = vcmp.ne.s32.totalorder %v7358_v49, %v4830_v63  ;;  %v742_v28 = vld [vmem:[#allocation4 + $0x18] sm:$0xff] }
 0x1df   :  { %966 = vst.msk [vmem:[#allocation4 + $0x10] sm:$0xff] %vm7349_vm14, %v933_v21  ;;  %1616 = vmax.xlane.f32.xlu0 %v1615_v27  ;;  %v949_v23 = vadd.f32 %v891_v48, %v757_v50  ;;  %vm1108_vm14 = vcmp.eq.s32.totalorder %v1022_v22, %v4523_v7  ;;  %v832_v57 = vsel %vm7359_vm11, 0.0, %v5797_v20  ;;  %v5849_v27 = vld [vmem:[#allocation2 + $0x10] sm:$0xff]  ;;  %v5853_v21 = vpop.f32.mrf.mxu0  ;;  %v831_v7 = vsel %vm7037_vm10, 0.0, %v5773_v17  ;;  %vm7367_vm10 = vmmov %vm7357_vm7 }
 0x1e0   :  { %v5839_v45 = vpop.xlane.xlu0 %1248  ;;  %1367 = vst.msk [vmem:[#allocation4 + $0x8] sm:$0xff] %vm7357_vm7, %v1335_v26  ;;  %7360 = vst [vmem:[#allocation103_spill] sm:$0xff] %v5849_v27  ;;  %v1038_v26 = vadd.s32 248, %v4517_v4  ;;  %v1204_v22 = vsel %vm1108_vm14, %v5853_v21, 0.0  ;;  %vm7366_vm11 = vcmp.ne.s32.totalorder %v7353_v51, %v4830_v63 }
 0x1e1   :  { %982 = vst.msk [vmem:[#allocation4 + $0x90] sm:$0xff] %vm7361_vm5, %v949_v23  ;;  %878 = vadd.xlane.f32.xlu1 %v877_v41  ;;  %v925_v23 = vadd.f32 %v832_v57, %v831_v7  ;;  %v439_v54 = vpop.f32.mrf.mxu0 }
 0x1e2   :  { %v1584_v50 = vpop.xlane.xlu1 %1583  ;;  %vm1141_vm14 = vcmp.eq.s32.totalorder %v1038_v26, %v4536_v12  ;;  %v7368_v12 = vld [vmem:[#allocation57_spill] sm:$0xff] }
 0x1e3   :  { %1664 = vmax.xlane.f32.xlu0 %v1663_v19  ;;  %v5867_v48 = vmax.f32 %v5849_v27, %v1584_v50  ;;  %v7363_v19 = vld [vmem:[#allocation30_spill] sm:$0xff]  ;;  %v535_v50 = vpop.f32.mrf.mxu1 }
 0x1e4   :  { %v5861_v14 = vpop.xlane.xlu0 %1296  ;;  %vm7364_vm5 = vnez %v7363_v19  ;;  %v1237_v27 = vsel %vm1141_vm14, %v535_v50, 0.0  ;;  %v758_v19 = vld [vmem:[#allocation4 + $0x98] sm:$0xff]  ;;  %vm7373_vm14 = vcmp.ne.s32.totalorder %v7358_v49, %v4830_v63  ;;  %v743_v49 = vld [vmem:[#allocation4 + $0x20] sm:$0xff] }
 0x1e5   :  { %7362 = vst [vmem:[#allocation104_spill] sm:$0xff] %v5867_v48  ;;  %v5871_v41 = vsel %vm7364_vm5, %v433_v1, -1e+30  ;;  %2442 = vst.msk [vmem:[#allocation2 + $0x10] sm:$0xff] %vm7357_vm7, %v5867_v48  ;;  %926 = vadd.xlane.f32.xlu1 %v925_v23  ;;  %v5885_v1 = vsel %vm7366_vm11, %v5771_v16, -1e+30  ;;  %vm7369_vm7 = vnez %v7368_v12 }
 0x1e6   :  { %v1144_v4 = vld [vmem:[#allocation4 + $0x10] sm:$0xff]  ;;  %v1632_v57 = vpop.xlane.xlu1 %1631  ;;  %v5896_v26 = vsel %vm7369_vm7, %v5797_v20, -1e+30  ;;  %vm7372_vm7 = vmmov %vm7367_vm10  ;;  %v5913_v20 = vsel %vm7373_vm14, %v5773_v17, -1e+30  ;;  %v5925_v17 = vld [vmem:[#allocation2 + $0x18] sm:$0xff] }
 0x1e7   :  { %v1336_v38 = vsub.f32 %v1144_v4, %v5784_v33  ;;  %1284 = vadd.xlane.f32.xlu0 %v1204_v22  ;;  %v1618_v33 = vmax.f32 %v5885_v1, %v5871_v41  ;;  %v5891_v4 = vmax.f32 %v5873_v53, %v1632_v57  ;;  %v7370_v23 = vld [vmem:[#allocation28_spill] sm:$0xff]  ;;  %7377 = vst [vmem:[#allocation106_spill] sm:$0xff] %v5925_v17 }
 0x1e8   :  { %v846_v7 = vpop.xlane.xlu0 %845  ;;  %vm7371_vm11 = vcmp.ne.s32.totalorder %v7370_v23, %v4539_v13  ;;  %v1160_v6 = vld [vmem:[#allocation4 + $0x90] sm:$0xff]  ;;  %vm7042_vm5 = vcmp.ne.s32.totalorder %v7370_v23, %v4830_v63  ;;  %v5985_v23 = vld [vmem:[#allocation2 + $0xa0] sm:$0xff] }
 0x1e9   :  { %1368 = vst.msk [vmem:[#allocation4 + $0x10] sm:$0xff] %vm7367_vm10, %v1336_v38  ;;  %v934_v22 = vadd.f32 %v846_v7, %v742_v28  ;;  %v802_v16 = vsel %vm7371_vm11, 0.0, %v439_v54  ;;  %v1352_v38 = vsub.f32 %v1160_v6, %v5810_v24  ;;  %2458 = vst.msk [vmem:[#allocation2 + $0x90] sm:$0xff] %vm7367_vm10, %v5891_v4  ;;  %1619 = vmax.xlane.f32.xlu1 %v1618_v33  ;;  %v801_v6 = vsel %vm7042_vm5, 0.0, %v5853_v21  ;;  %v7375_v33 = vld [vmem:[#allocation55_spill] sm:$0xff] }
 0x1ea   :  { %v1252_v24 = vpop.xlane.xlu1 %1251  ;;  %v880_v7 = vadd.f32 %v802_v16, %v801_v6  ;;  %vm7374_vm11 = vmmov %vm7372_vm7  ;;  %vm7044_vm10 = vcmp.ne.s32.totalorder %v7375_v33, %v4830_v63  ;;  %7392 = vst [vmem:[#allocation110_spill] sm:$0xff] %v5985_v23 }
 0x1eb   :  { %967 = vst.msk [vmem:[#allocation4 + $0x18] sm:$0xff] %vm7372_vm7, %v934_v22  ;;  %1332 = vadd.xlane.f32.xlu0 %v1237_v27  ;;  %v1666_v27 = vmax.f32 %v5913_v20, %v5896_v26  ;;  %vm7376_vm7 = vcmp.ne.s32.totalorder %v7375_v33, %v4539_v13  ;;  %vm7378_vm14 = vmmov %vm7374_vm11 }
 0x1ec   :  { %v894_v57 = vpop.xlane.xlu0 %893  ;;  %1384 = vst.msk [vmem:[#allocation4 + $0x90] sm:$0xff] %vm7374_vm11, %v1352_v38  ;;  %v834_v22 = vsel %vm7376_vm7, 0.0, %v535_v50  ;;  %vm7382_vm7 = vmmov %vm7378_vm14 }
 0x1ed   :  { %v950_v28 = vadd.f32 %v894_v57, %v758_v19  ;;  %1667 = vmax.xlane.f32.xlu1 %v1666_v27  ;;  %v833_v19 = vsel %vm7044_vm10, 0.0, %v5864_v52  ;;  %v7379_v57 = vld [vmem:[#allocation31_spill] sm:$0xff]  ;;  %v7384_v27 = vld [vmem:[#allocation58_spill] sm:$0xff] }
 0x1ee   :  { %v1300_v16 = vpop.xlane.xlu1 %1299  ;;  %v928_v6 = vadd.f32 %v834_v22, %v833_v19  ;;  %vm7380_vm11 = vnez %v7379_v57  ;;  %v5952_v22 = vsel %vm7042_vm5, %v5853_v21, -1e+30  ;;  %v759_v57 = vld [vmem:[#allocation4 + $0xa0] sm:$0xff] }
 0x1ef   :  { %983 = vst.msk [vmem:[#allocation4 + $0x98] sm:$0xff] %vm7378_vm14, %v950_v28  ;;  %881 = vadd.xlane.f32.xlu0 %v880_v7  ;;  %v5939_v53 = vsel %vm7380_vm11, %v439_v54, -1e+30  ;;  %v5941_v28 = vld [vmem:[#allocation2 + $0x98] sm:$0xff]  ;;  %vm7383_vm14 = vmmov %vm7382_vm7 }
 0x1f0   :  { %v1587_v38 = vpop.xlane.xlu0 %1586  ;;  %7381 = vst [vmem:[#allocation107_spill] sm:$0xff] %v5941_v28  ;;  %vm7386_vm5 = vmmov %vm7383_vm14 }
 0x1f1   :  { %v5935_v13 = vmax.f32 %v5925_v17, %v1587_v38  ;;  %v1621_v38 = vmax.f32 %v5952_v22, %v5939_v53  ;;  %vm7387_vm10 = vmmov %vm7386_vm5 }
 0x1f2   :  { %v1145_v12 = vld [vmem:[#allocation4 + $0x18] sm:$0xff]  ;;  %v849_v54 = vpop.xlane.xlu1 %848 }
 0x1f3   :  { %v1337_v7 = vsub.f32 %v1145_v12, %v5839_v45  ;;  %2443 = vst.msk [vmem:[#allocation2 + $0x18] sm:$0xff] %vm7382_vm7, %v5935_v13  ;;  %929 = vadd.xlane.f32.xlu0 %v928_v6  ;;  %v935_v45 = vadd.f32 %v849_v54, %v743_v49  ;;  %vm7385_vm7 = vnez %v7384_v27  ;;  %v5979_v54 = vld [vmem:[#allocation2 + $0x20] sm:$0xff] }
 0x1f4   :  { %v1635_v19 = vpop.xlane.xlu0 %1634  ;;  %v5962_v6 = vsel %vm7385_vm7, %v535_v50, -1e+30  ;;  %vm7389_vm7 = vmmov %vm7386_vm5  ;;  %7390 = vst [vmem:[#allocation108_spill] sm:$0xff] %v5979_v54 }
 0x1f5   :  { %1369 = vst.msk [vmem:[#allocation4 + $0x18] sm:$0xff] %vm7383_vm14, %v1337_v7  ;;  %v5958_v12 = vmax.f32 %v5941_v28, %v1635_v19  ;;  %vm7388_vm14 = vcmp.ne.s32.totalorder %v7375_v33, %v4830_v63  ;;  %v744_v28 = vld [vmem:[#allocation4 + $0x28] sm:$0xff] }
 0x1f6   :  { %v1161_v17 = vld [vmem:[#allocation4 + $0x98] sm:$0xff]  ;;  %968 = vst.msk [vmem:[#allocation4 + $0x20] sm:$0xff] %vm7386_vm5, %v935_v45  ;;  %v5974_v49 = vsel %vm7388_vm14, %v5864_v52, -1e+30  ;;  %v897_v50 = vpop.xlane.xlu1 %896  ;;  %vm7396_vm14 = vmmov %vm7386_vm5 }
 0x1f7   :  { %v1353_v21 = vsub.f32 %v1161_v17, %v5861_v14  ;;  %2459 = vst.msk [vmem:[#allocation2 + $0x98] sm:$0xff] %vm7387_vm10, %v5958_v12  ;;  %1622 = vmax.xlane.f32.xlu0 %v1621_v38  ;;  %v1669_v14 = vmax.f32 %v5974_v49, %v5962_v6  ;;  %v951_v17 = vadd.f32 %v897_v50, %v759_v57  ;;  %vm7393_vm10 = vmmov %vm7386_vm5 }
 0x1f8   :  { %v1255_v7 = vpop.xlane.xlu0 %1254 }
 0x1f9   :  { %1385 = vst.msk [vmem:[#allocation4 + $0x98] sm:$0xff] %vm7389_vm7, %v1353_v21  ;;  %vm7394_vm7 = vmmov %vm7386_vm5 }
 0x1fa   :  { %984 = vst.msk [vmem:[#allocation4 + $0xa0] sm:$0xff] %vm7386_vm5, %v951_v17  ;;  %v1590_v19 = vpop.xlane.xlu1 %1589 }
 0x1fb   :  { %1670 = vmax.xlane.f32.xlu0 %v1669_v14  ;;  %v5983_v45 = vmax.f32 %v5979_v54, %v1590_v19  ;;  %v760_v19 = vld [vmem:[#allocation4 + $0xa8] sm:$0xff] }
 0x1fc   :  { %v1303_v38 = vpop.xlane.xlu0 %1302 }
 0x1fd   :  { %7391 = vst [vmem:[#allocation109_spill] sm:$0xff] %v5983_v45  ;;  %v1146_v52 = vld [vmem:[#allocation4 + $0x20] sm:$0xff]  ;;  %2444 = vst.msk [vmem:[#allocation2 + $0x20] sm:$0xff] %vm7393_vm10, %v5983_v45 }
 0x1fe   :  { %v1338_v27 = vsub.f32 %v1146_v52, %v1252_v24  ;;  %v1638_v57 = vpop.xlane.xlu1 %1637  ;;  %1706 = vperm.xlu1 %3927, %v5698_v25   ;;  %vm7397_vm10 = vmmov %vm7386_vm5  ;;  %v6010_v24 = vld [vmem:[#allocation2 + $0xa8] sm:$0xff] }
 0x1ff   :  { %v5994_v50 = vmax.f32 %v5985_v23, %v1638_v57  ;;  %v6003_v57 = vld [vmem:[#allocation2 + $0x28] sm:$0xff]  ;;  %7399 = vst [vmem:[#allocation112_spill] sm:$0xff] %v6010_v24 }
 0x200   :  { %v852_v21 = vpop.xlane.xlu0 %851  ;;  %1370 = vst.msk [vmem:[#allocation4 + $0x20] sm:$0xff] %vm7394_vm7, %v1338_v27  ;;  %vm7398_vm7 = vmmov %vm7386_vm5 }
 0x201   :  { %7395 = vst [vmem:[#allocation111_spill] sm:$0xff] %v5994_v50  ;;  %v936_v14 = vadd.f32 %v852_v21, %v744_v28  ;;  %v1162_v17 = vld [vmem:[#allocation4 + $0xa0] sm:$0xff]  ;;  %2460 = vst.msk [vmem:[#allocation2 + $0xa0] sm:$0xff] %vm7396_vm14, %v5994_v50 }
 0x202   :  { %v1354_v51 = vsub.f32 %v1162_v17, %v1300_v16  ;;  %v1258_v52 = vpop.xlane.xlu1 %1257  ;;  %1791 = vperm.xlu1 %3927, %v5790_v55   ;;  %vm7400_vm14 = vmmov %vm7386_vm5 }
 0x203   :  { %969 = vst.msk [vmem:[#allocation4 + $0x28] sm:$0xff] %vm7386_vm5, %v936_v14  ;;  %v745_v14 = vld [vmem:[#allocation4 + $0x30] sm:$0xff] }
 0x204   :  { %v900_v33 = vpop.xlane.xlu0 %899  ;;  %1386 = vst.msk [vmem:[#allocation4 + $0xa0] sm:$0xff] %vm7397_vm10, %v1354_v51  ;;  %vm7402_vm10 = vmmov %vm7386_vm5 }
 0x205   :  { %v952_v27 = vadd.f32 %v900_v33, %v760_v19 }
 0x206   :  { %v1306_v16 = vpop.xlane.xlu1 %1305  ;;  %1716 = vperm.xlu1 %3927, %v5867_v48   ;;  %v761_v48 = vld [vmem:[#allocation4 + $0xb0] sm:$0xff] }
 0x207   :  { %985 = vst.msk [vmem:[#allocation4 + $0xa8] sm:$0xff] %vm7398_vm7, %v952_v27  ;;  %vm7403_vm7 = vmmov %vm7386_vm5 }
 0x208   :  { %v1593_v28 = vpop.xlane.xlu0 %1592 }
 0x209   :  { %v6008_v21 = vmax.f32 %v6003_v57, %v1593_v28 }
 0x20a   :  { %v1147_v17 = vld [vmem:[#allocation4 + $0x28] sm:$0xff]  ;;  %v855_v33 = vpop.xlane.xlu1 %854  ;;  %1721 = vperm.xlu1 %3927, %v5935_v13  }
 0x20b   :  { %v1339_v23 = vsub.f32 %v1147_v17, %v1255_v7  ;;  %2445 = vst.msk [vmem:[#allocation2 + $0x28] sm:$0xff] %vm7400_vm14, %v6008_v21  ;;  %v937_v27 = vadd.f32 %v855_v33, %v745_v14  ;;  %vm7404_vm14 = vmmov %vm7386_vm5  ;;  %v6029_v14 = vld [vmem:[#allocation2 + $0x30] sm:$0xff] }
 0x20c   :  { %v1641_v19 = vpop.xlane.xlu0 %1640  ;;  %7405 = vst [vmem:[#allocation114_spill] sm:$0xff] %v6029_v14 }
 0x20d   :  { %1371 = vst.msk [vmem:[#allocation4 + $0x28] sm:$0xff] %vm7386_vm5, %v1339_v23  ;;  %v6019_v28 = vmax.f32 %v6010_v24, %v1641_v19 }
 0x20e   :  { %v1163_v54 = vld [vmem:[#allocation4 + $0xa8] sm:$0xff]  ;;  %970 = vst.msk [vmem:[#allocation4 + $0x30] sm:$0xff] %vm7402_vm10, %v937_v27  ;;  %v903_v17 = vpop.xlane.xlu1 %902  ;;  %1801 = vperm.xlu1 %3927, %v5958_v12   ;;  %v6037_v27 = vld [vmem:[#allocation2 + $0xb0] sm:$0xff]  ;;  %vm7408_vm10 = vmmov %vm7386_vm5 }
 0x20f   :  { %7401 = vst [vmem:[#allocation113_spill] sm:$0xff] %v6019_v28  ;;  %v1355_v55 = vsub.f32 %v1163_v54, %v1303_v38  ;;  %2461 = vst.msk [vmem:[#allocation2 + $0xa8] sm:$0xff] %vm7403_vm7, %v6019_v28  ;;  %v953_v23 = vadd.f32 %v903_v17, %v761_v48  ;;  %v6063_v17 = vld [vmem:[#allocation2 + $0xb8] sm:$0xff] }
 0x210   :  { %v1261_v51 = vpop.xlane.xlu0 %1260  ;;  %7407 = vst [vmem:[#allocation116_spill] sm:$0xff] %v6037_v27  ;;  %vm7409_vm7 = vmmov %vm7386_vm5 }
 0x211   :  { %1387 = vst.msk [vmem:[#allocation4 + $0xa8] sm:$0xff] %vm7404_vm14, %v1355_v55  ;;  %1786 = vperm.xlu0 %3926, %v5725_v31   ;;  %v746_v55 = vld [vmem:[#allocation4 + $0x38] sm:$0xff]  ;;  %vm7411_vm14 = vmmov %vm7386_vm5 }
 0x212   :  { %986 = vst.msk [vmem:[#allocation4 + $0xb0] sm:$0xff] %vm7386_vm5, %v953_v23  ;;  %v1596_v54 = vpop.xlane.xlu1 %1595  ;;  %1731 = vperm.xlu1 %3927, %v6008_v21   ;;  %7415 = vst [vmem:[#allocation119_spill] sm:$0xff] %v6063_v17 }
 0x213   :  { %v6034_v33 = vmax.f32 %v6029_v14, %v1596_v54 }
 0x214   :  { %v1309_v38 = vpop.xlane.xlu0 %1308 }
 0x215   :  { %7406 = vst [vmem:[#allocation115_spill] sm:$0xff] %v6034_v33  ;;  %1711 = vperm.xlu0 %3926, %v5759_v58   ;;  %v1148_v19 = vld [vmem:[#allocation4 + $0x30] sm:$0xff]  ;;  %2446 = vst.msk [vmem:[#allocation2 + $0x30] sm:$0xff] %vm7408_vm10, %v6034_v33 }
 0x216   :  { %v1340_v48 = vsub.f32 %v1148_v19, %v1258_v52  ;;  %v1644_v23 = vpop.xlane.xlu1 %1643  ;;  %1811 = vperm.xlu1 %3927, %v6019_v28   ;;  %v762_v52 = vld [vmem:[#allocation4 + $0xb8] sm:$0xff]  ;;  %vm7412_vm10 = vmmov %vm7386_vm5 }
 0x217   :  { %v6046_v54 = vmax.f32 %v6037_v27, %v1644_v23 }
 0x218   :  { %v858_v7 = vpop.xlane.xlu0 %857  ;;  %1372 = vst.msk [vmem:[#allocation4 + $0x30] sm:$0xff] %vm7409_vm7, %v1340_v48  ;;  %vm7413_vm7 = vmmov %vm7386_vm5 }
 0x219   :  { %7410 = vst [vmem:[#allocation117_spill] sm:$0xff] %v6046_v54  ;;  %v938_v24 = vadd.f32 %v858_v7, %v746_v55  ;;  %1796 = vperm.xlu0 %3926, %v5891_v4   ;;  %v1164_v58 = vld [vmem:[#allocation4 + $0xb0] sm:$0xff]  ;;  %2462 = vst.msk [vmem:[#allocation2 + $0xb0] sm:$0xff] %vm7411_vm14, %v6046_v54  ;;  %v6056_v7 = vld [vmem:[#allocation2 + $0x38] sm:$0xff] }
 0x21a   :  { %v1356_v19 = vsub.f32 %v1164_v58, %v1306_v16  ;;  %v1264_v14 = vpop.xlane.xlu1 %1263  ;;  %vm7416_vm14 = vmmov %vm7386_vm5 }
 0x21b   :  { %971 = vst.msk [vmem:[#allocation4 + $0x38] sm:$0xff] %vm7386_vm5, %v938_v24  ;;  %v747_v24 = vld [vmem:[#allocation4 + $0x40] sm:$0xff] }
 0x21c   :  { %v906_v28 = vpop.xlane.xlu0 %905  ;;  %1388 = vst.msk [vmem:[#allocation4 + $0xb0] sm:$0xff] %vm7412_vm10, %v1356_v19  ;;  %vm7418_vm10 = vmmov %vm7386_vm5 }
 0x21d   :  { %v954_v48 = vadd.f32 %v906_v28, %v762_v52  ;;  %1726 = vperm.xlu0 %3926, %v5983_v45   ;;  %v764_v45 = vld [vmem:[#allocation4 + $0xc8] sm:$0xff] }
 0x21e   :  { %v1312_v58 = vpop.xlane.xlu1 %1311 }
 0x21f   :  { %987 = vst.msk [vmem:[#allocation4 + $0xb8] sm:$0xff] %vm7413_vm7, %v954_v48  ;;  %vm7419_vm7 = vmmov %vm7386_vm5 }
 0x220   :  { %v1599_v16 = vpop.xlane.xlu0 %1598 }
 0x221   :  { %v6060_v55 = vmax.f32 %v6056_v7, %v1599_v16  ;;  %1806 = vperm.xlu0 %3926, %v5994_v50  }
 0x222   :  { %v1149_v23 = vld [vmem:[#allocation4 + $0x38] sm:$0xff]  ;;  %v861_v52 = vpop.xlane.xlu1 %860 }
 0x223   :  { %7414 = vst [vmem:[#allocation118_spill] sm:$0xff] %v6060_v55  ;;  %v1341_v27 = vsub.f32 %v1149_v23, %v1261_v51  ;;  %2447 = vst.msk [vmem:[#allocation2 + $0x38] sm:$0xff] %vm7416_vm14, %v6060_v55  ;;  %1741 = vperm.xlu1 %3927, %v6060_v55   ;;  %v939_v48 = vadd.f32 %v861_v52, %v747_v24  ;;  %v763_v51 = vld [vmem:[#allocation4 + $0xc0] sm:$0xff] }
 0x224   :  { %v1647_v19 = vpop.xlane.xlu0 %1646  ;;  %vm7420_vm14 = vmmov %vm7386_vm5 }
 0x225   :  { %1373 = vst.msk [vmem:[#allocation4 + $0x38] sm:$0xff] %vm7386_vm5, %v1341_v27  ;;  %v6072_v16 = vmax.f32 %v6063_v17, %v1647_v19  ;;  %1736 = vperm.xlu0 %3926, %v6034_v33   ;;  %v6083_v19 = vld [vmem:[#allocation2 + $0x40] sm:$0xff] }
 0x226   :  { %v1165_v50 = vld [vmem:[#allocation4 + $0xb8] sm:$0xff]  ;;  %972 = vst.msk [vmem:[#allocation4 + $0x40] sm:$0xff] %vm7418_vm10, %v939_v48  ;;  %v909_v27 = vpop.xlane.xlu1 %908  ;;  %7421 = vst [vmem:[#allocation121_spill] sm:$0xff] %v6083_v19  ;;  %v6089_v33 = vld [vmem:[#allocation2 + $0xc0] sm:$0xff] }
 0x227   :  { %7417 = vst [vmem:[#allocation120_spill] sm:$0xff] %v6072_v16  ;;  %v1357_v23 = vsub.f32 %v1165_v50, %v1309_v38  ;;  %2463 = vst.msk [vmem:[#allocation2 + $0xb8] sm:$0xff] %vm7419_vm7, %v6072_v16  ;;  %1821 = vperm.xlu1 %3927, %v6072_v16   ;;  %v955_v52 = vadd.f32 %v909_v27, %v763_v51  ;;  %v748_v16 = vld [vmem:[#allocation4 + $0x48] sm:$0xff] }
 0x228   :  { %v1267_v24 = vpop.xlane.xlu0 %1266  ;;  %7423 = vst [vmem:[#allocation123_spill] sm:$0xff] %v6089_v33  ;;  %vm7424_vm10 = vmmov %vm7386_vm5 }
 0x229   :  { %1389 = vst.msk [vmem:[#allocation4 + $0xb8] sm:$0xff] %vm7420_vm14, %v1357_v23  ;;  %1816 = vperm.xlu0 %3926, %v6046_v54   ;;  %vm7425_vm7 = vmmov %vm7386_vm5 }
 0x22a   :  { %988 = vst.msk [vmem:[#allocation4 + $0xc0] sm:$0xff] %vm7386_vm5, %v955_v52  ;;  %v1602_v50 = vpop.xlane.xlu1 %1601  ;;  %vm7427_vm14 = vmmov %vm7386_vm5 }
 0x22b   :  { %v6087_v48 = vmax.f32 %v6083_v19, %v1602_v50 }
 0x22c   :  { %v1315_v38 = vpop.xlane.xlu0 %1314 }
 0x22d   :  { %7422 = vst [vmem:[#allocation122_spill] sm:$0xff] %v6087_v48  ;;  %v1150_v28 = vld [vmem:[#allocation4 + $0x40] sm:$0xff]  ;;  %2448 = vst.msk [vmem:[#allocation2 + $0x40] sm:$0xff] %vm7424_vm10, %v6087_v48  ;;  %1746 = vperm.xlu0 %3926, %v6087_v48   ;;  %v765_v48 = vld [vmem:[#allocation4 + $0xd0] sm:$0xff] }
 0x22e   :  { %v1342_v17 = vsub.f32 %v1150_v28, %v1264_v14  ;;  %v1650_v51 = vpop.xlane.xlu1 %1649  ;;  %vm7428_vm10 = vmmov %vm7386_vm5  ;;  %v749_v14 = vld [vmem:[#allocation4 + $0x50] sm:$0xff] }
 0x22f   :  { %v6098_v52 = vmax.f32 %v6089_v33, %v1650_v51  ;;  %v6107_v51 = vld [vmem:[#allocation2 + $0x48] sm:$0xff] }
 0x230   :  { %v864_v27 = vpop.xlane.xlu0 %863  ;;  %1374 = vst.msk [vmem:[#allocation4 + $0x40] sm:$0xff] %vm7425_vm7, %v1342_v17  ;;  %7429 = vst [vmem:[#allocation125_spill] sm:$0xff] %v6107_v51  ;;  %v6113_v33 = vld [vmem:[#allocation2 + $0xc8] sm:$0xff] }
 0x231   :  { %7426 = vst [vmem:[#allocation124_spill] sm:$0xff] %v6098_v52  ;;  %v940_v50 = vadd.f32 %v864_v27, %v748_v16  ;;  %v1166_v54 = vld [vmem:[#allocation4 + $0xc0] sm:$0xff]  ;;  %2464 = vst.msk [vmem:[#allocation2 + $0xc0] sm:$0xff] %vm7427_vm14, %v6098_v52  ;;  %1826 = vperm.xlu0 %3926, %v6098_v52  }
 0x232   :  { %v1358_v55 = vsub.f32 %v1166_v54, %v1312_v58  ;;  %v1270_v28 = vpop.xlane.xlu1 %1269  ;;  %vm7430_vm7 = vmmov %vm7386_vm5  ;;  %7432 = vst [vmem:[#allocation127_spill] sm:$0xff] %v6113_v33 }
 0x233   :  { %973 = vst.msk [vmem:[#allocation4 + $0x48] sm:$0xff] %vm7386_vm5, %v940_v50  ;;  %vm7433_vm14 = vmmov %vm7386_vm5 }
 0x234   :  { %v912_v23 = vpop.xlane.xlu0 %911  ;;  %1390 = vst.msk [vmem:[#allocation4 + $0xc0] sm:$0xff] %vm7428_vm10, %v1358_v55  ;;  %vm7435_vm10 = vmmov %vm7386_vm5 }
 0x235   :  { %v956_v17 = vadd.f32 %v912_v23, %v764_v45 }
 0x236   :  { %v1318_v54 = vpop.xlane.xlu1 %1317 }
 0x237   :  { %989 = vst.msk [vmem:[#allocation4 + $0xc8] sm:$0xff] %vm7430_vm7, %v956_v17  ;;  %vm7436_vm7 = vmmov %vm7386_vm5 }
 0x238   :  { %v1605_v58 = vpop.xlane.xlu0 %1604 }
 0x239   :  { %v6111_v16 = vmax.f32 %v6107_v51, %v1605_v58 }
 0x23a   :  { %v1151_v27 = vld [vmem:[#allocation4 + $0x48] sm:$0xff]  ;;  %v867_v45 = vpop.xlane.xlu1 %866 }
 0x23b   :  { %7431 = vst [vmem:[#allocation126_spill] sm:$0xff] %v6111_v16  ;;  %v1343_v50 = vsub.f32 %v1151_v27, %v1267_v24  ;;  %2449 = vst.msk [vmem:[#allocation2 + $0x48] sm:$0xff] %vm7433_vm14, %v6111_v16  ;;  %1751 = vperm.xlu1 %3927, %v6111_v16   ;;  %v941_v23 = vadd.f32 %v867_v45, %v749_v14  ;;  %v750_v24 = vld [vmem:[#allocation4 + $0x58] sm:$0xff] }
 0x23c   :  { %v1653_v55 = vpop.xlane.xlu0 %1652  ;;  %vm7437_vm14 = vmmov %vm7386_vm5  ;;  %v766_v16 = vld [vmem:[#allocation4 + $0xd8] sm:$0xff] }
 0x23d   :  { %1375 = vst.msk [vmem:[#allocation4 + $0x48] sm:$0xff] %vm7386_vm5, %v1343_v50  ;;  %v6122_v17 = vmax.f32 %v6113_v33, %v1653_v55  ;;  %v6131_v50 = vld [vmem:[#allocation2 + $0x50] sm:$0xff] }
 0x23e   :  { %v1167_v58 = vld [vmem:[#allocation4 + $0xc8] sm:$0xff]  ;;  %974 = vst.msk [vmem:[#allocation4 + $0x50] sm:$0xff] %vm7435_vm10, %v941_v23  ;;  %v915_v27 = vpop.xlane.xlu1 %914  ;;  %7438 = vst [vmem:[#allocation129_spill] sm:$0xff] %v6131_v50 }
 0x23f   :  { %7434 = vst [vmem:[#allocation128_spill] sm:$0xff] %v6122_v17  ;;  %v1359_v19 = vsub.f32 %v1167_v58, %v1315_v38  ;;  %2465 = vst.msk [vmem:[#allocation2 + $0xc8] sm:$0xff] %vm7436_vm7, %v6122_v17  ;;  %1831 = vperm.xlu1 %3927, %v6122_v17   ;;  %v957_v14 = vadd.f32 %v915_v27, %v765_v48  ;;  %v6137_v58 = vld [vmem:[#allocation2 + $0xd0] sm:$0xff] }
 0x240   :  { %v1273_v52 = vpop.xlane.xlu0 %1272  ;;  %7440 = vst [vmem:[#allocation131_spill] sm:$0xff] %v6137_v58  ;;  %vm7441_vm10 = vmmov %vm7386_vm5 }
 0x241   :  { %1391 = vst.msk [vmem:[#allocation4 + $0xc8] sm:$0xff] %vm7437_vm14, %v1359_v19  ;;  %vm7442_vm7 = vmmov %vm7386_vm5 }
 0x242   :  { %990 = vst.msk [vmem:[#allocation4 + $0xd0] sm:$0xff] %vm7386_vm5, %v957_v14  ;;  %v1608_v38 = vpop.xlane.xlu1 %1607  ;;  %vm7444_vm14 = vmmov %vm7386_vm5 }
 0x243   :  { %v6135_v55 = vmax.f32 %v6131_v50, %v1608_v38 }
 0x244   :  { %v1321_v45 = vpop.xlane.xlu0 %1320 }
 0x245   :  { %7439 = vst [vmem:[#allocation130_spill] sm:$0xff] %v6135_v55  ;;  %v1152_v23 = vld [vmem:[#allocation4 + $0x50] sm:$0xff]  ;;  %2450 = vst.msk [vmem:[#allocation2 + $0x50] sm:$0xff] %vm7441_vm10, %v6135_v55  ;;  %1756 = vperm.xlu0 %3926, %v6135_v55   ;;  %v767_v55 = vld [vmem:[#allocation4 + $0xe0] sm:$0xff] }
 0x246   :  { %v1344_v33 = vsub.f32 %v1152_v23, %v1270_v28  ;;  %v1656_v19 = vpop.xlane.xlu1 %1655  ;;  %vm7445_vm10 = vmmov %vm7386_vm5  ;;  %v751_v28 = vld [vmem:[#allocation4 + $0x60] sm:$0xff] }
 0x247   :  { %v6146_v27 = vmax.f32 %v6137_v58, %v1656_v19  ;;  %v6155_v19 = vld [vmem:[#allocation2 + $0x58] sm:$0xff] }
 0x248   :  { %v870_v48 = vpop.xlane.xlu0 %869  ;;  %1376 = vst.msk [vmem:[#allocation4 + $0x50] sm:$0xff] %vm7442_vm7, %v1344_v33  ;;  %7446 = vst [vmem:[#allocation133_spill] sm:$0xff] %v6155_v19  ;;  %v6161_v58 = vld [vmem:[#allocation2 + $0xd8] sm:$0xff] }
 0x249   :  { %7443 = vst [vmem:[#allocation132_spill] sm:$0xff] %v6146_v27  ;;  %v942_v14 = vadd.f32 %v870_v48, %v750_v24  ;;  %v1168_v38 = vld [vmem:[#allocation4 + $0xd0] sm:$0xff]  ;;  %2466 = vst.msk [vmem:[#allocation2 + $0xd0] sm:$0xff] %vm7444_vm14, %v6146_v27  ;;  %1836 = vperm.xlu0 %3926, %v6146_v27  }
 0x24a   :  { %v1360_v51 = vsub.f32 %v1168_v38, %v1318_v54  ;;  %v1276_v23 = vpop.xlane.xlu1 %1275  ;;  %vm7447_vm7 = vmmov %vm7386_vm5  ;;  %7449 = vst [vmem:[#allocation135_spill] sm:$0xff] %v6161_v58 }
 0x24b   :  { %975 = vst.msk [vmem:[#allocation4 + $0x58] sm:$0xff] %vm7386_vm5, %v942_v14  ;;  %vm7450_vm14 = vmmov %vm7386_vm5 }
 0x24c   :  { %v918_v17 = vpop.xlane.xlu0 %917  ;;  %1392 = vst.msk [vmem:[#allocation4 + $0xd0] sm:$0xff] %vm7445_vm10, %v1360_v51  ;;  %vm7452_vm10 = vmmov %vm7386_vm5 }
 0x24d   :  { %v958_v33 = vadd.f32 %v918_v17, %v766_v16 }
 0x24e   :  { %v1324_v54 = vpop.xlane.xlu1 %1323 }
 0x24f   :  { %991 = vst.msk [vmem:[#allocation4 + $0xd8] sm:$0xff] %vm7447_vm7, %v958_v33  ;;  %vm7453_vm7 = vmmov %vm7386_vm5 }
 0x250   :  { %v1611_v24 = vpop.xlane.xlu0 %1610 }
 0x251   :  { %v6159_v48 = vmax.f32 %v6155_v19, %v1611_v24 }
 0x252   :  { %v1153_v38 = vld [vmem:[#allocation4 + $0x58] sm:$0xff]  ;;  %v873_v51 = vpop.xlane.xlu1 %872 }
 0x253   :  { %7448 = vst [vmem:[#allocation134_spill] sm:$0xff] %v6159_v48  ;;  %v1345_v14 = vsub.f32 %v1153_v38, %v1273_v52  ;;  %2451 = vst.msk [vmem:[#allocation2 + $0x58] sm:$0xff] %vm7450_vm14, %v6159_v48  ;;  %1761 = vperm.xlu1 %3927, %v6159_v48   ;;  %v943_v17 = vadd.f32 %v873_v51, %v751_v28  ;;  %v752_v52 = vld [vmem:[#allocation4 + $0x68] sm:$0xff] }
 0x254   :  { %v1659_v16 = vpop.xlane.xlu0 %1658  ;;  %vm7454_vm14 = vmmov %vm7386_vm5  ;;  %v768_v48 = vld [vmem:[#allocation4 + $0xe8] sm:$0xff] }
 0x255   :  { %1377 = vst.msk [vmem:[#allocation4 + $0x58] sm:$0xff] %vm7386_vm5, %v1345_v14  ;;  %v6170_v33 = vmax.f32 %v6161_v58, %v1659_v16  ;;  %v6179_v14 = vld [vmem:[#allocation2 + $0x60] sm:$0xff] }
 0x256   :  { %v1169_v24 = vld [vmem:[#allocation4 + $0xd8] sm:$0xff]  ;;  %976 = vst.msk [vmem:[#allocation4 + $0x60] sm:$0xff] %vm7452_vm10, %v943_v17  ;;  %v921_v38 = vpop.xlane.xlu1 %920  ;;  %7455 = vst [vmem:[#allocation137_spill] sm:$0xff] %v6179_v14 }
 0x257   :  { %7451 = vst [vmem:[#allocation136_spill] sm:$0xff] %v6170_v33  ;;  %v1361_v50 = vsub.f32 %v1169_v24, %v1321_v45  ;;  %2467 = vst.msk [vmem:[#allocation2 + $0xd8] sm:$0xff] %vm7453_vm7, %v6170_v33  ;;  %1841 = vperm.xlu1 %3927, %v6170_v33   ;;  %v959_v28 = vadd.f32 %v921_v38, %v767_v55  ;;  %v6185_v24 = vld [vmem:[#allocation2 + $0xe0] sm:$0xff] }
 0x258   :  { %v1279_v27 = vpop.xlane.xlu0 %1278  ;;  %7457 = vst [vmem:[#allocation139_spill] sm:$0xff] %v6185_v24  ;;  %vm7458_vm10 = vmmov %vm7386_vm5 }
 0x259   :  { %1393 = vst.msk [vmem:[#allocation4 + $0xd8] sm:$0xff] %vm7454_vm14, %v1361_v50  ;;  %vm7459_vm7 = vmmov %vm7386_vm5 }
 0x25a   :  { %992 = vst.msk [vmem:[#allocation4 + $0xe0] sm:$0xff] %vm7386_vm5, %v959_v28  ;;  %v1614_v45 = vpop.xlane.xlu1 %1613  ;;  %vm7461_vm14 = vmmov %vm7386_vm5 }
 0x25b   :  { %v6183_v16 = vmax.f32 %v6179_v14, %v1614_v45 }
 0x25c   :  { %v1327_v51 = vpop.xlane.xlu0 %1326 }
 0x25d   :  { %7456 = vst [vmem:[#allocation138_spill] sm:$0xff] %v6183_v16  ;;  %v1154_v17 = vld [vmem:[#allocation4 + $0x60] sm:$0xff]  ;;  %2452 = vst.msk [vmem:[#allocation2 + $0x60] sm:$0xff] %vm7458_vm10, %v6183_v16  ;;  %1766 = vperm.xlu0 %3926, %v6183_v16   ;;  %v769_v16 = vld [vmem:[#allocation4 + $0xf0] sm:$0xff] }
 0x25e   :  { %v1346_v58 = vsub.f32 %v1154_v17, %v1276_v23  ;;  %v1662_v50 = vpop.xlane.xlu1 %1661  ;;  %vm7462_vm10 = vmmov %vm7386_vm5  ;;  %v753_v23 = vld [vmem:[#allocation4 + $0x70] sm:$0xff] }
 0x25f   :  { %v6194_v38 = vmax.f32 %v6185_v24, %v1662_v50  ;;  %v6203_v50 = vld [vmem:[#allocation2 + $0x68] sm:$0xff] }
 0x260   :  { %v876_v55 = vpop.xlane.xlu0 %875  ;;  %1378 = vst.msk [vmem:[#allocation4 + $0x60] sm:$0xff] %vm7459_vm7, %v1346_v58  ;;  %7463 = vst [vmem:[#allocation141_spill] sm:$0xff] %v6203_v50  ;;  %v6209_v24 = vld [vmem:[#allocation2 + $0xe8] sm:$0xff] }
 0x261   :  { %7460 = vst [vmem:[#allocation140_spill] sm:$0xff] %v6194_v38  ;;  %v944_v28 = vadd.f32 %v876_v55, %v752_v52  ;;  %v1170_v45 = vld [vmem:[#allocation4 + $0xe0] sm:$0xff]  ;;  %2468 = vst.msk [vmem:[#allocation2 + $0xe0] sm:$0xff] %vm7461_vm14, %v6194_v38  ;;  %1846 = vperm.xlu0 %3926, %v6194_v38  }
 0x262   :  { %v1362_v19 = vsub.f32 %v1170_v45, %v1324_v54  ;;  %v1282_v17 = vpop.xlane.xlu1 %1281  ;;  %vm7464_vm7 = vmmov %vm7386_vm5  ;;  %7466 = vst [vmem:[#allocation143_spill] sm:$0xff] %v6209_v24 }
 0x263   :  { %977 = vst.msk [vmem:[#allocation4 + $0x68] sm:$0xff] %vm7386_vm5, %v944_v28  ;;  %vm7467_vm14 = vmmov %vm7386_vm5 }
 0x264   :  { %v924_v33 = vpop.xlane.xlu0 %923  ;;  %1394 = vst.msk [vmem:[#allocation4 + $0xe0] sm:$0xff] %vm7462_vm10, %v1362_v19  ;;  %vm7469_vm10 = vmmov %vm7386_vm5 }
 0x265   :  { %v960_v58 = vadd.f32 %v924_v33, %v768_v48 }
 0x266   :  { %v1330_v54 = vpop.xlane.xlu1 %1329 }
 0x267   :  { %993 = vst.msk [vmem:[#allocation4 + $0xe8] sm:$0xff] %vm7464_vm7, %v960_v58  ;;  %vm7470_vm7 = vmmov %vm7386_vm5 }
 0x268   :  { %v1617_v52 = vpop.xlane.xlu0 %1616 }
 0x269   :  { %v6207_v55 = vmax.f32 %v6203_v50, %v1617_v52 }
 0x26a   :  { %v1155_v45 = vld [vmem:[#allocation4 + $0x68] sm:$0xff]  ;;  %v879_v19 = vpop.xlane.xlu1 %878 }
 0x26b   :  { %7465 = vst [vmem:[#allocation142_spill] sm:$0xff] %v6207_v55  ;;  %v1347_v28 = vsub.f32 %v1155_v45, %v1279_v27  ;;  %2453 = vst.msk [vmem:[#allocation2 + $0x68] sm:$0xff] %vm7467_vm14, %v6207_v55  ;;  %1771 = vperm.xlu1 %3927, %v6207_v55   ;;  %v945_v33 = vadd.f32 %v879_v19, %v753_v23  ;;  %v754_v27 = vld [vmem:[#allocation4 + $0x78] sm:$0xff] }
 0x26c   :  { %v1665_v48 = vpop.xlane.xlu0 %1664  ;;  %vm7471_vm14 = vmmov %vm7386_vm5  ;;  %v770_v55 = vld [vmem:[#allocation4 + $0xf8] sm:$0xff] }
 0x26d   :  { %1379 = vst.msk [vmem:[#allocation4 + $0x68] sm:$0xff] %vm7386_vm5, %v1347_v28  ;;  %v6218_v58 = vmax.f32 %v6209_v24, %v1665_v48  ;;  %v6227_v28 = vld [vmem:[#allocation2 + $0x70] sm:$0xff] }
 0x26e   :  { %v1171_v52 = vld [vmem:[#allocation4 + $0xe8] sm:$0xff]  ;;  %978 = vst.msk [vmem:[#allocation4 + $0x70] sm:$0xff] %vm7469_vm10, %v945_v33  ;;  %v927_v45 = vpop.xlane.xlu1 %926  ;;  %vm7474_vm10 = vmmov %vm7386_vm5 }
 0x26f   :  { %7468 = vst [vmem:[#allocation144_spill] sm:$0xff] %v6218_v58  ;;  %v1363_v14 = vsub.f32 %v1171_v52, %v1327_v51  ;;  %2469 = vst.msk [vmem:[#allocation2 + $0xe8] sm:$0xff] %vm7470_vm7, %v6218_v58  ;;  %1851 = vperm.xlu1 %3927, %v6218_v58   ;;  %v961_v23 = vadd.f32 %v927_v45, %v769_v16  ;;  %v6233_v52 = vld [vmem:[#allocation2 + $0xf0] sm:$0xff] }
 0x270   :  { %v1285_v38 = vpop.xlane.xlu0 %1284  ;;  %7473 = vst [vmem:[#allocation146_spill] sm:$0xff] %v6233_v52  ;;  %vm7475_vm7 = vmmov %vm7386_vm5 }
 0x271   :  { %1395 = vst.msk [vmem:[#allocation4 + $0xe8] sm:$0xff] %vm7471_vm14, %v1363_v14  ;;  %vm7477_vm14 = vmmov %vm7386_vm5 }
 0x272   :  { %994 = vst.msk [vmem:[#allocation4 + $0xf0] sm:$0xff] %vm7386_vm5, %v961_v23  ;;  %v1620_v51 = vpop.xlane.xlu1 %1619 }
 0x273   :  { %v6231_v48 = vmax.f32 %v6227_v28, %v1620_v51 }
 0x274   :  { %v1333_v19 = vpop.xlane.xlu0 %1332 }
 0x275   :  { %7472 = vst [vmem:[#allocation145_spill] sm:$0xff] %v6231_v48  ;;  %v1156_v33 = vld [vmem:[#allocation4 + $0x70] sm:$0xff]  ;;  %2454 = vst.msk [vmem:[#allocation2 + $0x70] sm:$0xff] %vm7474_vm10, %v6231_v48  ;;  %1776 = vperm.xlu0 %3926, %v6231_v48  }
 0x276   :  { %v1348_v24 = vsub.f32 %v1156_v33, %v1282_v17  ;;  %v1668_v14 = vpop.xlane.xlu1 %1667  ;;  %vm7478_vm10 = vmmov %vm7386_vm5 }
 0x277   :  { %v6242_v45 = vmax.f32 %v6233_v52, %v1668_v14 }
 0x278   :  { %v882_v16 = vpop.xlane.xlu0 %881  ;;  %1380 = vst.msk [vmem:[#allocation4 + $0x70] sm:$0xff] %vm7475_vm7, %v1348_v24  ;;  %vm7479_vm7 = vmmov %vm7386_vm5 }
 0x279   :  { %7476 = vst [vmem:[#allocation147_spill] sm:$0xff] %v6242_v45  ;;  %v946_v23 = vadd.f32 %v882_v16, %v754_v27  ;;  %v1172_v51 = vld [vmem:[#allocation4 + $0xf0] sm:$0xff]  ;;  %2470 = vst.msk [vmem:[#allocation2 + $0xf0] sm:$0xff] %vm7477_vm14, %v6242_v45  ;;  %1856 = vperm.xlu0 %3926, %v6242_v45   ;;  %v6254_v16 = vld [vmem:[#allocation2 + $0x78] sm:$0xff] }
 0x27a   :  { %v1364_v50 = vsub.f32 %v1172_v51, %v1330_v54  ;;  %v1707_v33 = vpop.permute.xlu1 %1706  ;;  %vm7482_vm14 = vmmov %vm7386_vm5 }
 0x27b   :  { %979 = vst.msk [vmem:[#allocation4 + $0x78] sm:$0xff] %vm7386_vm5, %v946_v23  ;;  %v1864_v24 = vsub.f32 %v4890_v56, %v1707_v33  ;;  %v1865_v27 = vsub.f32 %v4881_v61, %v1707_v33 }
 0x27c   :  { %v930_v58 = vpop.xlane.xlu0 %929  ;;  %1396 = vst.msk [vmem:[#allocation4 + $0xf0] sm:$0xff] %vm7478_vm10, %v1364_v50  ;;  %vm7485_vm10 = vmmov %vm7386_vm5 }
 0x27d   :  { %v962_v14 = vadd.f32 %v930_v58, %v770_v55  ;;  %v1928_v54 = vmul.f32 1.442695, %v1864_v24  ;;  %v1930_v51 = vmul.f32 1.442695, %v1865_v27  ;;  %v6261_v55 = vld [vmem:[#allocation2 + $0xf8] sm:$0xff] }
 0x27e   :  { %v1792_v17 = vpop.permute.xlu1 %1791  ;;  %7481 = vst [vmem:[#allocation149_spill] sm:$0xff] %v6261_v55 }
 0x27f   :  { %995 = vst.msk [vmem:[#allocation4 + $0xf8] sm:$0xff] %vm7479_vm7, %v962_v14  ;;  %v1898_v23 = vsub.f32 %v5113_v30, %v1792_v17  ;;  %v1899_v45 = vsub.f32 %v5103_v59, %v1792_v17  ;;  %3928 = vpow2.f32 %v1928_v54  ;;  %vm7486_vm7 = vmmov %vm7386_vm5 }
 0x280   :  { %v1623_v52 = vpop.xlane.xlu0 %1622  ;;  %3930 = vpow2.f32 %v1930_v51 }
 0x281   :  { %v6259_v50 = vmax.f32 %v6254_v16, %v1623_v52  ;;  %v1996_v61 = vmul.f32 1.442695, %v1898_v23  ;;  %v1998_v58 = vmul.f32 1.442695, %v1899_v45 }
 0x282   :  { %v1157_v48 = vld [vmem:[#allocation4 + $0x78] sm:$0xff]  ;;  %v1717_v59 = vpop.permute.xlu1 %1716 }
 0x283   :  { %7480 = vst [vmem:[#allocation148_spill] sm:$0xff] %v6259_v50  ;;  %v1349_v56 = vsub.f32 %v1157_v48, %v1285_v38  ;;  %2455 = vst.msk [vmem:[#allocation2 + $0x78] sm:$0xff] %vm7482_vm14, %v6259_v50  ;;  %1781 = vperm.xlu1 %3927, %v6259_v50   ;;  %v1868_v38 = vsub.f32 %v5196_v8, %v1717_v59  ;;  %v7483_v48 = vld [vmem:[#allocation68_spill] sm:$0xff]  ;;  %3932 = vpow2.f32 %v1996_v61 }
 0x284   :  { %v1671_v30 = vpop.xlane.xlu0 %1670  ;;  %v1869_v52 = vsub.f32 %v7483_v48, %v1717_v59  ;;  %3934 = vpow2.f32 %v1998_v58  ;;  %v7488_v48 = vld [vmem:[#allocation62_spill] sm:$0xff] }
 0x285   :  { %1381 = vst.msk [vmem:[#allocation4 + $0x78] sm:$0xff] %vm7386_vm5, %v1349_v56  ;;  %v6272_v24 = vmax.f32 %v6261_v55, %v1671_v30  ;;  %v1936_v27 = vmul.f32 1.442695, %v1868_v38  ;;  %v7487_v30 = vld [vmem:[#allocation74_spill] sm:$0xff]  ;;  %v7494_v55 = vld [vmem:[#allocation59_spill] sm:$0xff] }
 0x286   :  { %v1173_v17 = vld [vmem:[#allocation4 + $0xf8] sm:$0xff]  ;;  %v1722_v54 = vpop.permute.xlu1 %1721  ;;  %v1938_v8 = vmul.f32 1.442695, %v1869_v52  ;;  %vm7495_vm5 = vnez %v7494_v55  ;;  %v7498_v55 = vld [vmem:[#allocation32_spill] sm:$0xff] }
 0x287   :  { %7484 = vst [vmem:[#allocation68_spill] sm:$0xff] %v6272_v24  ;;  %v1365_v45 = vsub.f32 %v1173_v17, %v1333_v19  ;;  %2471 = vst.msk [vmem:[#allocation2 + $0xf8] sm:$0xff] %vm7485_vm10, %v6272_v24  ;;  %1861 = vperm.xlu1 %3927, %v6272_v24   ;;  %v1870_v51 = vsub.f32 %v5261_v9, %v1722_v54  ;;  %v1871_v23 = vsub.f32 %v5256_v35, %v1722_v54 }
 0x288   :  { %3936 = vpow2.f32 %v1936_v27  ;;  %vm7499_vm10 = vcmp.ne.s32.totalorder %v7498_v55, %v4830_v63  ;;  %v7506_v55 = vld [vmem:[#allocation80_spill] sm:$0xff] }
 0x289   :  { %1397 = vst.msk [vmem:[#allocation4 + $0xf8] sm:$0xff] %vm7486_vm7, %v1365_v45  ;;  %v1940_v19 = vmul.f32 1.442695, %v1870_v51  ;;  %v1942_v56 = vmul.f32 1.442695, %v1871_v23  ;;  %3938 = vpow2.f32 %v1938_v8  ;;  %v7489_v45 = vld [vmem:[#allocation61_spill] sm:$0xff] }
 0x28a   :  { %v1802_v61 = vpop.permute.xlu1 %1801 }
 0x28b   :  { %v1902_v59 = vsub.f32 %v5289_v2, %v1802_v61  ;;  %v1903_v38 = vsub.f32 %v7487_v30, %v1802_v61  ;;  %3940 = vpow2.f32 %v1940_v19  ;;  %v7490_v2 = vld [vmem:[#allocation65_spill] sm:$0xff]  ;;  %v7491_v30 = vld [vmem:[#allocation64_spill] sm:$0xff] }
 0x28c   :  { %v1787_v58 = vpop.permute.xlu0 %1786  ;;  %v3929_v33 = vpop.eup %3928  ;;  %3942 = vpow2.f32 %v1942_v56 }
 0x28d   :  { %v1896_v17 = vsub.f32 %v7488_v48, %v1787_v58  ;;  %v2004_v14 = vmul.f32 1.442695, %v1902_v59  ;;  %v1897_v52 = vsub.f32 %v7489_v45, %v1787_v58  ;;  %v2006_v9 = vmul.f32 1.442695, %v1903_v38  ;;  %v3931_v27 = vpop.eup %3930  ;;  %v7492_v38 = vld [vmem:[#allocation7_spill] sm:$0xff] }
 0x28e   :  { %v1732_v35 = vpop.permute.xlu1 %1731  ;;  %vm7493_vm14 = vcmp.ne.s32.totalorder %v7492_v38, %v4830_v63 }
 0x28f   :  { %v1874_v51 = vsub.f32 %v5387_v60, %v1732_v35  ;;  %v1875_v8 = vsub.f32 %v5382_v11, %v1732_v35  ;;  %v1992_v23 = vmul.f32 1.442695, %v1896_v17  ;;  %3944 = vpow2.f32 %v2004_v14 }
 0x290   :  { %v1712_v54 = vpop.permute.xlu0 %1711  ;;  %v1994_v61 = vmul.f32 1.442695, %v1897_v52  ;;  %v3933_v59 = vpop.eup %3932  ;;  %3946 = vpow2.f32 %v2006_v9  ;;  %v2056_v45 = vsel %vm7493_vm14, %v3929_v33, 0.0  ;;  %v2057_v60 = vsel %vm7495_vm5, %v3931_v27, 0.0 }
 0x291   :  { %v1866_v24 = vsub.f32 %v7490_v2, %v1712_v54  ;;  %v1867_v19 = vsub.f32 %v7491_v30, %v1712_v54  ;;  %v1948_v58 = vmul.f32 1.442695, %v1874_v51  ;;  %v3935_v11 = vpop.eup %3934  ;;  %v1950_v17 = vmul.f32 1.442695, %v1875_v8  ;;  %v7496_v54 = vld [vmem:[#allocation71_spill] sm:$0xff]  ;;  %v7497_v2 = vld [vmem:[#allocation70_spill] sm:$0xff] }
 0x292   :  { %v1812_v48 = vpop.permute.xlu1 %1811  ;;  %3948 = vpow2.f32 %v1992_v23  ;;  %v2280_v50 = vadd.f32 %v2057_v60, %v2056_v45  ;;  %v2090_v27 = vsel %vm7499_vm10, %v3933_v59, 0.0  ;;  %v7500_v8 = vld [vmem:[#allocation66_spill] sm:$0xff]  ;;  %v7502_v23 = vld [vmem:[#allocation77_spill] sm:$0xff] }
 0x293   :  { %v1906_v35 = vsub.f32 %v5404_v39, %v1812_v48  ;;  %v1907_v14 = vsub.f32 %v5397_v3, %v1812_v48  ;;  %v1932_v52 = vmul.f32 1.442695, %v1866_v24  ;;  %3950 = vpow2.f32 %v1994_v61  ;;  %v7503_v61 = vld [vmem:[#allocation76_spill] sm:$0xff] }
 0x294   :  { %v1797_v56 = vpop.permute.xlu0 %1796  ;;  %v1934_v51 = vmul.f32 1.442695, %v1867_v19  ;;  %3952 = vpow2.f32 %v1948_v58  ;;  %vm7501_vm7 = vnez %v7500_v8 }
 0x295   :  { %v1900_v9 = vsub.f32 %v7496_v54, %v1797_v56  ;;  %v1901_v30 = vsub.f32 %v7497_v2, %v1797_v56  ;;  %v2012_v33 = vmul.f32 1.442695, %v1906_v35  ;;  %v2091_v39 = vsel %vm7501_vm7, %v3935_v11, 0.0  ;;  %v3937_v3 = vpop.eup %3936  ;;  %v7504_v2 = vld [vmem:[#allocation6_spill] sm:$0xff] }
 0x296   :  { %3954 = vpow2.f32 %v1950_v17  ;;  %v2014_v24 = vmul.f32 1.442695, %v1907_v14  ;;  %v3939_v54 = vpop.eup %3938  ;;  %v2331_v35 = vadd.f32 %v2091_v39, %v2090_v27  ;;  %vm7505_vm14 = vcmp.ne.s32.totalorder %v7504_v2, %v4830_v63 }
 0x297   :  { %3956 = vpow2.f32 %v1932_v52  ;;  %v2000_v56 = vmul.f32 1.442695, %v1900_v9  ;;  %v2002_v58 = vmul.f32 1.442695, %v1901_v30  ;;  %v2060_v11 = vsel %vm7505_vm14, %v3937_v3, 0.0 }
 0x298   :  { %v1727_v38 = vpop.permute.xlu0 %1726  ;;  %2281 = vadd.xlane.f32.xlu0 %v2280_v50  ;;  %3958 = vpow2.f32 %v1934_v51  ;;  %v3941_v45 = vpop.eup %3940  ;;  %v2061_v52 = vsel %vm5182_vm8, %v3939_v54, 0.0  ;;  %v7508_v50 = vld [vmem:[#allocation79_spill] sm:$0xff] }
 0x299   :  { %v1872_v48 = vsub.f32 %v7502_v23, %v1727_v38  ;;  %v1873_v19 = vsub.f32 %v7503_v61, %v1727_v38  ;;  %3960 = vpow2.f32 %v2012_v33  ;;  %v3943_v17 = vpop.eup %3942  ;;  %v7509_v23 = vld [vmem:[#allocation8_spill] sm:$0xff] }
 0x29a   :  { %3962 = vpow2.f32 %v2014_v24  ;;  %v2286_v24 = vadd.f32 %v2061_v52, %v2060_v11  ;;  %vm7510_vm5 = vcmp.ne.s32.totalorder %v7509_v23, %v4830_v63 }
 0x29b   :  { %v1944_v60 = vmul.f32 1.442695, %v1872_v48  ;;  %v1946_v14 = vmul.f32 1.442695, %v1873_v19  ;;  %3964 = vpow2.f32 %v2000_v56  ;;  %v2062_v48 = vsel %vm7510_vm5, %v3941_v45, 0.0 }
 0x29c   :  { %v1807_v59 = vpop.permute.xlu0 %1806  ;;  %2332 = vadd.xlane.f32.xlu0 %v2331_v35  ;;  %3966 = vpow2.f32 %v2002_v58  ;;  %v3945_v39 = vpop.eup %3944  ;;  %v2063_v19 = vsel %vm5249_vm12, %v3943_v17, 0.0 }
 0x29d   :  { %v1904_v38 = vsub.f32 %v7506_v55, %v1807_v59  ;;  %v1905_v9 = vsub.f32 %v7508_v50, %v1807_v59  ;;  %3968 = vpow2.f32 %v1944_v60  ;;  %v3947_v54 = vpop.eup %3946  ;;  %v7512_v55 = vld [vmem:[#allocation34_spill] sm:$0xff] }
 0x29e   :  { %v1742_v51 = vpop.permute.xlu1 %1741  ;;  %3970 = vpow2.f32 %v1946_v14  ;;  %v2289_v14 = vadd.f32 %v2063_v19, %v2062_v48  ;;  %vm7513_vm8 = vcmp.ne.s32.totalorder %v7512_v55, %v4830_v63  ;;  %v2095_v8 = vsel %vm5272_vm9, %v3947_v54, 0.0  ;;  %v7519_v19 = vld [vmem:[#allocation10_spill] sm:$0xff] }
 0x29f   :  { %v2008_v30 = vmul.f32 1.442695, %v1904_v38  ;;  %v1878_v33 = vsub.f32 %v5471_v43, %v1742_v51  ;;  %v1879_v27 = vsub.f32 %v5466_v5, %v1742_v51  ;;  %v2010_v43 = vmul.f32 1.442695, %v1905_v9  ;;  %v3949_v35 = vpop.eup %3948 }
 0x2a0   :  { %v1737_v3 = vpop.permute.xlu0 %1736  ;;  %2287 = vadd.xlane.f32.xlu0 %v2286_v24  ;;  %v3951_v11 = vpop.eup %3950  ;;  %vm7520_vm10 = vcmp.ne.s32.totalorder %v7519_v19, %v4830_v63 }
 0x2a1   :  { %v1956_v56 = vmul.f32 1.442695, %v1878_v33  ;;  %v1958_v58 = vmul.f32 1.442695, %v1879_v27  ;;  %v1876_v59 = vsub.f32 %v5429_v29, %v1737_v3  ;;  %3972 = vpow2.f32 %v2008_v30  ;;  %v7515_v27 = vld [vmem:[#allocation33_spill] sm:$0xff] }
 0x2a2   :  { %v1877_v5 = vsub.f32 %v5423_v0, %v1737_v3  ;;  %v1822_v60 = vpop.permute.xlu1 %1821  ;;  %v2094_v29 = vsel %vm7513_vm8, %v3945_v39, 0.0  ;;  %v3953_v0 = vpop.eup %3952  ;;  %vm7516_vm12 = vcmp.ne.s32.totalorder %v7515_v27, %v4830_v63  ;;  %v7517_v3 = vld [vmem:[#allocation60_spill] sm:$0xff] }
 0x2a3   :  { %3974 = vpow2.f32 %v1956_v56  ;;  %v1910_v2 = vsub.f32 %v5488_v42, %v1822_v60  ;;  %v1911_v45 = vsub.f32 %v5481_v32, %v1822_v60  ;;  %v1952_v52 = vmul.f32 1.442695, %v1876_v59  ;;  %v3955_v42 = vpop.eup %3954 }
 0x2a4   :  { %3976 = vpow2.f32 %v1958_v58  ;;  %v1817_v17 = vpop.permute.xlu0 %1816  ;;  %v1954_v32 = vmul.f32 1.442695, %v1877_v5  ;;  %2290 = vadd.xlane.f32.xlu0 %v2289_v14  ;;  %v3957_v33 = vpop.eup %3956  ;;  %v2088_v39 = vsel %vm7516_vm12, %v3949_v35, 0.0  ;;  %vm7518_vm9 = vnez %v7517_v3 }
 0x2a5   :  { %v2020_v50 = vmul.f32 1.442695, %v1910_v2  ;;  %v2022_v9 = vmul.f32 1.442695, %v1911_v45  ;;  %v1908_v51 = vsub.f32 %v5446_v37, %v1817_v17  ;;  %3978 = vpow2.f32 %v2010_v43  ;;  %v3959_v23 = vpop.eup %3958  ;;  %v7522_v45 = vld [vmem:[#allocation9_spill] sm:$0xff] }
 0x2a6   :  { %v1909_v30 = vsub.f32 %v5439_v40, %v1817_v17  ;;  %v2089_v24 = vsel %vm7518_vm9, %v3951_v11, 0.0  ;;  %v2337_v48 = vadd.f32 %v2095_v8, %v2094_v29  ;;  %v3961_v61 = vpop.eup %3960  ;;  %v2066_v40 = vsel %vm7520_vm10, %v3953_v0, 0.0  ;;  %v7524_v17 = vld [vmem:[#allocation63_spill] sm:$0xff]  ;;  %v7526_v8 = vld [vmem:[#allocation36_spill] sm:$0xff] }
 0x2a7   :  { %3980 = vpow2.f32 %v2020_v50  ;;  %v2016_v37 = vmul.f32 1.442695, %v1908_v51  ;;  %v2067_v56 = vsel %vm5375_vm2, %v3955_v42, 0.0  ;;  %v3963_v58 = vpop.eup %3962  ;;  %v2328_v5 = vadd.f32 %v2089_v24, %v2088_v39  ;;  %v7529_v42 = vld [vmem:[#allocation35_spill] sm:$0xff] }
 0x2a8   :  { %3982 = vpow2.f32 %v2022_v9  ;;  %v2018_v59 = vmul.f32 1.442695, %v1909_v30  ;;  %2338 = vadd.xlane.f32.xlu0 %v2337_v48  ;;  %v1747_v43 = vpop.permute.xlu0 %1746  ;;  %v3965_v60 = vpop.eup %3964  ;;  %vm7523_vm7 = vcmp.ne.s32.totalorder %v7522_v45, %v4830_v63  ;;  %vm7525_vm14 = vnez %v7524_v17 }
 0x2a9   :  { %3984 = vpow2.f32 %v1952_v52  ;;  %v1880_v35 = vsub.f32 %v5513_v36, %v1747_v43  ;;  %v1881_v2 = vsub.f32 %v5507_v62, %v1747_v43  ;;  %v2058_v11 = vsel %vm7523_vm7, %v3957_v33, 0.0  ;;  %v3967_v55 = vpop.eup %3966 }
 0x2aa   :  { %3986 = vpow2.f32 %v1954_v32  ;;  %v2059_v14 = vsel %vm7525_vm14, %v3959_v23, 0.0  ;;  %v2295_v29 = vadd.f32 %v2067_v56, %v2066_v40  ;;  %v3969_v38 = vpop.eup %3968  ;;  %vm7527_vm2 = vcmp.ne.s32.totalorder %v7526_v8, %v4830_v63  ;;  %v7548_v56 = vld [vmem:[#allocation40_spill] sm:$0xff] }
 0x2ab   :  { %2329 = vadd.xlane.f32.xlu1 %v2328_v5  ;;  %3988 = vpow2.f32 %v2016_v37  ;;  %v2098_v0 = vsel %vm7527_vm2, %v3961_v61, 0.0  ;;  %v2099_v36 = vsel %vm4691_vm15, %v3963_v58, 0.0  ;;  %v3971_v62 = vpop.eup %3970  ;;  %v1960_v50 = vmul.f32 1.442695, %v1880_v35  ;;  %v7532_v37 = vld [vmem:[#allocation12_spill] sm:$0xff]  ;;  %v7551_v5 = vld [vmem:[#allocation83_spill] sm:$0xff] }
 0x2ac   :  { %3990 = vpow2.f32 %v2018_v59  ;;  %2296 = vadd.xlane.f32.xlu0 %v2295_v29  ;;  %v1827_v9 = vpop.permute.xlu0 %1826  ;;  %v2283_v51 = vadd.f32 %v2059_v14, %v2058_v11  ;;  %vm7530_vm5 = vcmp.ne.s32.totalorder %v7529_v42, %v4830_v63  ;;  %v1962_v33 = vmul.f32 1.442695, %v1881_v2  ;;  %v7535_v59 = vld [vmem:[#allocation11_spill] sm:$0xff] }
 0x2ad   :  { %v2092_v32 = vsel %vm7530_vm5, %v3965_v60, 0.0  ;;  %v1912_v27 = vsub.f32 %v5530_v34, %v1827_v9  ;;  %v1913_v39 = vsub.f32 %v5523_v44, %v1827_v9  ;;  %v2093_v24 = vsel %vm5207_vm6, %v3967_v55, 0.0  ;;  %v7538_v11 = vld [vmem:[#allocation39_spill] sm:$0xff]  ;;  %v7543_v9 = vld [vmem:[#allocation78_spill] sm:$0xff] }
 0x2ae   :  { %v3973_v30 = vpop.eup %3972  ;;  %v2343_v48 = vadd.f32 %v2099_v36, %v2098_v0  ;;  %vm7533_vm15 = vcmp.ne.s32.totalorder %v7532_v37, %v4830_v63  ;;  %3992 = vpow2.f32 %v1960_v50  ;;  %v2334_v54 = vadd.f32 %v2093_v24, %v2092_v32  ;;  %v7545_v24 = vld [vmem:[#allocation13_spill] sm:$0xff] }
 0x2af   :  { %2284 = vadd.xlane.f32.xlu1 %v2283_v51  ;;  %v2024_v40 = vmul.f32 1.442695, %v1912_v27  ;;  %3994 = vpow2.f32 %v1962_v33  ;;  %v2026_v44 = vmul.f32 1.442695, %v1913_v39  ;;  %vm7536_vm6 = vcmp.ne.s32.totalorder %v7535_v59, %v4830_v63 }
 0x2b0   :  { %v3975_v23 = vpop.eup %3974  ;;  %2344 = vadd.xlane.f32.xlu0 %v2343_v48  ;;  %v2064_v43 = vsel %vm7536_vm6, %v3969_v38, 0.0  ;;  %v2065_v60 = vsel %vm5313_vm0, %v3971_v62, 0.0  ;;  %vm7539_vm8 = vcmp.ne.s32.totalorder %v7538_v11, %v4830_v63  ;;  %v7541_v38 = vld [vmem:[#allocation37_spill] sm:$0xff]  ;;  %vm7544_vm0 = vnez %v7543_v9  ;;  %v7560_v9 = vld [vmem:[#allocation84_spill] sm:$0xff] }
 0x2b1   :  { %v3977_v61 = vpop.eup %3976  ;;  %v2070_v19 = vsel %vm7533_vm15, %v3975_v23, 0.0  ;;  %3996 = vpow2.f32 %v2024_v40  ;;  %v2292_v29 = vadd.f32 %v2065_v60, %v2064_v43  ;;  %vm7549_vm12 = vcmp.ne.s32.totalorder %v7548_v56, %v4830_v63  ;;  %v7569_v56 = vld [vmem:[#allocation46_spill] sm:$0xff] }
 0x2b2   :  { %v2071_v34 = vsel %vm4564_vm4, %v3977_v61, 0.0  ;;  %v3979_v58 = vpop.eup %3978  ;;  %vm7542_vm4 = vcmp.ne.s32.totalorder %v7541_v38, %v4830_v63  ;;  %3998 = vpow2.f32 %v2026_v44  ;;  %vm7570_vm5 = vnez %v7569_v56 }
 0x2b3   :  { %2335 = vadd.xlane.f32.xlu1 %v2334_v54  ;;  %v2301_v2 = vadd.f32 %v2071_v34, %v2070_v19  ;;  %v2096_v52 = vsel %vm7542_vm4, %v3973_v30, 0.0  ;;  %v2097_v51 = vsel %vm7544_vm0, %v3979_v58, 0.0  ;;  %v7571_v58 = vld [vmem:[#allocation87_spill] sm:$0xff] }
 0x2b4   :  { %v3981_v35 = vpop.eup %3980  ;;  %v2340_v3 = vadd.f32 %v2097_v51, %v2096_v52  ;;  %v7557_v52 = vld [vmem:[#allocation44_spill] sm:$0xff] }
 0x2b5   :  { %v3983_v45 = vpop.eup %3982  ;;  %v2102_v17 = vsel %vm7539_vm8, %v3981_v35, 0.0  ;;  %2302 = vadd.xlane.f32.xlu0 %v2301_v2  ;;  %v7552_v35 = vld [vmem:[#allocation82_spill] sm:$0xff] }
 0x2b6   :  { %v3985_v14 = vpop.eup %3984  ;;  %v1752_v55 = vpop.permute.xlu1 %1751  ;;  %v2103_v0 = vsel %vm4717_vm13, %v3983_v45, 0.0  ;;  %vm7546_vm13 = vcmp.ne.s32.totalorder %v7545_v24, %v4830_v63  ;;  %v7553_v45 = vld [vmem:[#allocation17_spill] sm:$0xff]  ;;  %v7563_v24 = vld [vmem:[#allocation16_spill] sm:$0xff] }
 0x2b7   :  { %v3987_v36 = vpop.eup %3986  ;;  %v1882_v62 = vsub.f32 %v5555_v47, %v1752_v55  ;;  %v1883_v50 = vsub.f32 %v5550_v10, %v1752_v55  ;;  %2293 = vadd.xlane.f32.xlu1 %v2292_v29  ;;  %v2349_v42 = vadd.f32 %v2103_v0, %v2102_v17  ;;  %v2068_v30 = vsel %vm7546_vm13, %v3985_v14, 0.0  ;;  %v7555_v17 = vld [vmem:[#allocation18_spill] sm:$0xff] }
 0x2b8   :  { %v3989_v27 = vpop.eup %3988  ;;  %v2069_v61 = vsel %vm4555_vm3, %v3987_v36, 0.0  ;;  %vm7554_vm3 = vcmp.ne.s32.totalorder %v7553_v45, %v4830_v63  ;;  %vm7556_vm9 = vnez %v7555_v17  ;;  %vm7564_vm7 = vcmp.ne.s32.totalorder %v7563_v24, %v4830_v63  ;;  %v7574_v45 = vld [vmem:[#allocation88_spill] sm:$0xff] }
 0x2b9   :  { %v1964_v32 = vmul.f32 1.442695, %v1882_v62  ;;  %v1966_v33 = vmul.f32 1.442695, %v1883_v50  ;;  %2350 = vadd.xlane.f32.xlu0 %v2349_v42  ;;  %v3991_v23 = vpop.eup %3990  ;;  %v2298_v40 = vadd.f32 %v2069_v61, %v2068_v30  ;;  %v2100_v34 = vsel %vm7549_vm12, %v3989_v27, 0.0  ;;  %v7559_v62 = vld [vmem:[#allocation85_spill] sm:$0xff] }
 0x2ba   :  { %v1832_v39 = vpop.permute.xlu1 %1831  ;;  %v2101_v44 = vsel %vm4708_vm1, %v3991_v23, 0.0  ;;  %vm7558_vm1 = vcmp.ne.s32.totalorder %v7557_v52, %v4830_v63  ;;  %v7561_v42 = vld [vmem:[#allocation45_spill] sm:$0xff] }
 0x2bb   :  { %4000 = vpow2.f32 %v1964_v32  ;;  %v1914_v47 = vsub.f32 %v5572_v46, %v1832_v39  ;;  %v1915_v10 = vsub.f32 %v5565_v15, %v1832_v39  ;;  %2341 = vadd.xlane.f32.xlu1 %v2340_v3  ;;  %v3993_v54 = vpop.eup %3992  ;;  %v2346_v59 = vadd.f32 %v2101_v44, %v2100_v34 }
 0x2bc   :  { %4002 = vpow2.f32 %v1966_v33  ;;  %v3995_v46 = vpop.eup %3994  ;;  %v2072_v11 = vsel %vm7554_vm3, %v3993_v54, 0.0  ;;  %vm7562_vm10 = vnez %v7561_v42 }
 0x2bd   :  { %v2028_v37 = vmul.f32 1.442695, %v1914_v47  ;;  %v2030_v19 = vmul.f32 1.442695, %v1915_v10  ;;  %v2073_v14 = vsel %vm7556_vm9, %v3995_v46, 0.0  ;;  %v7565_v47 = vld [vmem:[#allocation19_spill] sm:$0xff] }
 0x2be   :  { %v3997_v43 = vpop.eup %3996  ;;  %v2304_v38 = vadd.f32 %v2073_v14, %v2072_v11  ;;  %vm7566_vm14 = vnez %v7565_v47  ;;  %v7572_v46 = vld [vmem:[#allocation86_spill] sm:$0xff] }
 0x2bf   :  { %4004 = vpow2.f32 %v2028_v37  ;;  %2299 = vadd.xlane.f32.xlu1 %v2298_v40  ;;  %v3999_v55 = vpop.eup %3998  ;;  %v2104_v36 = vsel %vm7558_vm1, %v3997_v43, 0.0 }
 0x2c0   :  { %4006 = vpow2.f32 %v2030_v19  ;;  %v1757_v15 = vpop.permute.xlu0 %1756  ;;  %v2105_v32 = vsel %vm7562_vm10, %v3999_v55, 0.0  ;;  %v7567_v19 = vld [vmem:[#allocation43_spill] sm:$0xff] }
 0x2c1   :  { %v1884_v60 = vsub.f32 %v7551_v5, %v1757_v15  ;;  %v1885_v2 = vsub.f32 %v7552_v35, %v1757_v15  ;;  %v2352_v23 = vadd.f32 %v2105_v32, %v2104_v36  ;;  %vm7568_vm2 = vcmp.ne.s32.totalorder %v7567_v19, %v4830_v63  ;;  %v7573_v35 = vld [vmem:[#allocation89_spill] sm:$0xff] }
 0x2c2   :  { %v7581_v32 = vld [vmem:[#allocation49_spill] sm:$0xff] }
 0x2c3   :  { %2347 = vadd.xlane.f32.xlu1 %v2346_v59  ;;  %v1968_v29 = vmul.f32 1.442695, %v1884_v60  ;;  %v1970_v8 = vmul.f32 1.442695, %v1885_v2  ;;  %vm7582_vm4 = vnez %v7581_v32  ;;  %v7598_v32 = vld [vmem:[#allocation25_spill] sm:$0xff] }
 0x2c4   :  { %v1837_v0 = vpop.permute.xlu0 %1836  ;;  %vm7599_vm9 = vcmp.ne.s32.totalorder %v7598_v32, %v4830_v63  ;;  %v7616_v32 = vld [vmem:[#allocation30_spill] sm:$0xff] }
 0x2c5   :  { %4008 = vpow2.f32 %v1968_v29  ;;  %v1916_v50 = vsub.f32 %v7559_v62, %v1837_v0  ;;  %v1917_v51 = vsub.f32 %v7560_v9, %v1837_v0  ;;  %v7579_v9 = vld [vmem:[#allocation48_spill] sm:$0xff] }
 0x2c6   :  { %4010 = vpow2.f32 %v1970_v8  ;;  %v7575_v8 = vld [vmem:[#allocation21_spill] sm:$0xff]  ;;  %vm7580_vm8 = vcmp.ne.s32.totalorder %v7579_v9, %v4830_v63 }
 0x2c7   :  { %2305 = vadd.xlane.f32.xlu1 %v2304_v38  ;;  %v2032_v39 = vmul.f32 1.442695, %v1916_v50  ;;  %v2034_v3 = vmul.f32 1.442695, %v1917_v51  ;;  %vm7576_vm15 = vcmp.ne.s32.totalorder %v7575_v8, %v4830_v63  ;;  %v7577_v38 = vld [vmem:[#allocation22_spill] sm:$0xff] }
 0x2c8   :  { %v4001_v33 = vpop.eup %4000  ;;  %vm7578_vm6 = vnez %v7577_v38  ;;  %v7596_v38 = vld [vmem:[#allocation102_spill] sm:$0xff] }
 0x2c9   :  { %v4003_v27 = vpop.eup %4002  ;;  %v2074_v30 = vsel %vm7564_vm7, %v4001_v33, 0.0  ;;  %4012 = vpow2.f32 %v2032_v39  ;;  %v7583_v39 = vld [vmem:[#allocation91_spill] sm:$0xff] }
 0x2ca   :  { %v2075_v10 = vsel %vm7566_vm14, %v4003_v27, 0.0  ;;  %4014 = vpow2.f32 %v2034_v3 }
 0x2cb   :  { %v2307_v48 = vadd.f32 %v2075_v10, %v2074_v30  ;;  %2353 = vadd.xlane.f32.xlu1 %v2352_v23  ;;  %v7584_v10 = vld [vmem:[#allocation95_spill] sm:$0xff] }
 0x2cc   :  { %v4005_v61 = vpop.eup %4004 }
 0x2cd   :  { %v4007_v37 = vpop.eup %4006  ;;  %2308 = vadd.xlane.f32.xlu0 %v2307_v48  ;;  %v2106_v40 = vsel %vm7568_vm2, %v4005_v61, 0.0  ;;  %v7585_v61 = vld [vmem:[#allocation93_spill] sm:$0xff] }
 0x2ce   :  { %v1762_v54 = vpop.permute.xlu1 %1761  ;;  %v2107_v34 = vsel %vm7570_vm5, %v4007_v37, 0.0 }
 0x2cf   :  { %v1886_v44 = vsub.f32 %v7571_v58, %v1762_v54  ;;  %v1887_v15 = vsub.f32 %v7572_v46, %v1762_v54  ;;  %v2355_v59 = vadd.f32 %v2107_v34, %v2106_v40  ;;  %v7586_v34 = vld [vmem:[#allocation20_spill] sm:$0xff]  ;;  %v7588_v58 = vld [vmem:[#allocation23_spill] sm:$0xff] }
 0x2d0   :  { %vm7587_vm0 = vcmp.ne.s32.totalorder %v7586_v34, %v4830_v63  ;;  %vm7589_vm13 = vnez %v7588_v58 }
 0x2d1   :  { %v1972_v43 = vmul.f32 1.442695, %v1886_v44  ;;  %v1974_v5 = vmul.f32 1.442695, %v1887_v15  ;;  %2356 = vadd.xlane.f32.xlu0 %v2355_v59 }
 0x2d2   :  { %v1842_v60 = vpop.permute.xlu1 %1841  ;;  %v4009_v17 = vpop.eup %4008 }
 0x2d3   :  { %4016 = vpow2.f32 %v1972_v43  ;;  %v1918_v2 = vsub.f32 %v7573_v35, %v1842_v60  ;;  %v1919_v11 = vsub.f32 %v7574_v45, %v1842_v60  ;;  %v4011_v14 = vpop.eup %4010  ;;  %v2076_v0 = vsel %vm7576_vm15, %v4009_v17, 0.0  ;;  %v7590_v43 = vld [vmem:[#allocation47_spill] sm:$0xff]  ;;  %v7592_v35 = vld [vmem:[#allocation50_spill] sm:$0xff]  ;;  %v7594_v45 = vld [vmem:[#allocation100_spill] sm:$0xff] }
 0x2d4   :  { %4018 = vpow2.f32 %v1974_v5  ;;  %v2077_v52 = vsel %vm7578_vm6, %v4011_v14, 0.0  ;;  %vm7591_vm12 = vcmp.ne.s32.totalorder %v7590_v43, %v4830_v63  ;;  %vm7593_vm3 = vnez %v7592_v35  ;;  %v7595_v17 = vld [vmem:[#allocation99_spill] sm:$0xff]  ;;  %v7606_v43 = vld [vmem:[#allocation24_spill] sm:$0xff] }
 0x2d5   :  { %v2036_v55 = vmul.f32 1.442695, %v1918_v2  ;;  %v2038_v29 = vmul.f32 1.442695, %v1919_v11  ;;  %v2310_v36 = vadd.f32 %v2077_v52, %v2076_v0  ;;  %vm7607_vm14 = vcmp.ne.s32.totalorder %v7606_v43, %v4830_v63 }
 0x2d6   :  { %v4013_v62 = vpop.eup %4012 }
 0x2d7   :  { %4020 = vpow2.f32 %v2036_v55  ;;  %v4015_v50 = vpop.eup %4014  ;;  %2311 = vadd.xlane.f32.xlu1 %v2310_v36  ;;  %v2108_v51 = vsel %vm7580_vm8, %v4013_v62, 0.0  ;;  %v7597_v36 = vld [vmem:[#allocation101_spill] sm:$0xff]  ;;  %vm7617_vm8 = vnez %v7616_v32  ;;  %v7647_v32 = vld [vmem:[#allocation112_spill] sm:$0xff] }
 0x2d8   :  { %4022 = vpow2.f32 %v2038_v29  ;;  %v1767_v42 = vpop.permute.xlu0 %1766  ;;  %v2109_v33 = vsel %vm7582_vm4, %v4015_v50, 0.0 }
 0x2d9   :  { %v1888_v27 = vsub.f32 %v5716_v18, %v1767_v42  ;;  %v1889_v3 = vsub.f32 %v7583_v39, %v1767_v42  ;;  %v2358_v24 = vadd.f32 %v2109_v33, %v2108_v51 }
 0x2db   :  { %v1976_v30 = vmul.f32 1.442695, %v1888_v27  ;;  %v1978_v23 = vmul.f32 1.442695, %v1889_v3  ;;  %2359 = vadd.xlane.f32.xlu1 %v2358_v24  ;;  %v7600_v27 = vld [vmem:[#allocation26_spill] sm:$0xff] }
 0x2dc   :  { %v1847_v47 = vpop.permute.xlu0 %1846  ;;  %vm7601_vm1 = vnez %v7600_v27 }
 0x2dd   :  { %4024 = vpow2.f32 %v1976_v30  ;;  %v1920_v48 = vsub.f32 %v7584_v10, %v1847_v47  ;;  %v1921_v37 = vsub.f32 %v7585_v61, %v1847_v47 }
 0x2de   :  { %4026 = vpow2.f32 %v1978_v23  ;;  %v7602_v23 = vld [vmem:[#allocation52_spill] sm:$0xff] }
 0x2df   :  { %v2040_v54 = vmul.f32 1.442695, %v1920_v48  ;;  %v2042_v56 = vmul.f32 1.442695, %v1921_v37  ;;  %vm7603_vm10 = vcmp.ne.s32.totalorder %v7602_v23, %v4830_v63  ;;  %v7604_v48 = vld [vmem:[#allocation53_spill] sm:$0xff]  ;;  %v7622_v23 = vld [vmem:[#allocation90_spill] sm:$0xff] }
 0x2e0   :  { %v4017_v19 = vpop.eup %4016  ;;  %vm7605_vm7 = vnez %v7604_v48 }
 0x2e1   :  { %v4019_v40 = vpop.eup %4018  ;;  %v2078_v18 = vsel %vm7587_vm0, %v4017_v19, 0.0  ;;  %4028 = vpow2.f32 %v2040_v54 }
 0x2e2   :  { %v2079_v44 = vsel %vm7589_vm13, %v4019_v40, 0.0  ;;  %4030 = vpow2.f32 %v2042_v56 }
 0x2e3   :  { %v2313_v46 = vadd.f32 %v2079_v44, %v2078_v18 }
 0x2e4   :  { %v4021_v15 = vpop.eup %4020 }
 0x2e5   :  { %v4023_v59 = vpop.eup %4022  ;;  %2314 = vadd.xlane.f32.xlu0 %v2313_v46  ;;  %v2110_v5 = vsel %vm7591_vm12, %v4021_v15, 0.0 }
 0x2e6   :  { %v1772_v60 = vpop.permute.xlu1 %1771  ;;  %v2111_v2 = vsel %vm7593_vm3, %v4023_v59, 0.0 }
 0x2e7   :  { %v1890_v11 = vsub.f32 %v7594_v45, %v1772_v60  ;;  %v1891_v14 = vsub.f32 %v7595_v17, %v1772_v60  ;;  %v2361_v55 = vadd.f32 %v2111_v2, %v2110_v5  ;;  %v7612_v45 = vld [vmem:[#allocation54_spill] sm:$0xff] }
 0x2e8   :  { %vm7613_vm15 = vnez %v7612_v45 }
 0x2e9   :  { %v1980_v29 = vmul.f32 1.442695, %v1890_v11  ;;  %v1982_v8 = vmul.f32 1.442695, %v1891_v14  ;;  %2362 = vadd.xlane.f32.xlu0 %v2361_v55 }
 0x2ea   :  { %v1852_v0 = vpop.permute.xlu1 %1851  ;;  %v4025_v50 = vpop.eup %4024 }
 0x2eb   :  { %4032 = vpow2.f32 %v1980_v29  ;;  %v1922_v52 = vsub.f32 %v7596_v38, %v1852_v0  ;;  %v1923_v62 = vsub.f32 %v7597_v36, %v1852_v0  ;;  %v4027_v9 = vpop.eup %4026  ;;  %v2080_v33 = vsel %vm7599_vm9, %v4025_v50, 0.0 }
 0x2ec   :  { %4034 = vpow2.f32 %v1982_v8  ;;  %v2081_v39 = vsel %vm7601_vm1, %v4027_v9, 0.0  ;;  %v7614_v9 = vld [vmem:[#allocation29_spill] sm:$0xff] }
 0x2ed   :  { %v2044_v51 = vmul.f32 1.442695, %v1922_v52  ;;  %v2046_v42 = vmul.f32 1.442695, %v1923_v62  ;;  %v2316_v3 = vadd.f32 %v2081_v39, %v2080_v33  ;;  %vm7615_vm6 = vcmp.ne.s32.totalorder %v7614_v9, %v4830_v63  ;;  %v7644_v9 = vld [vmem:[#allocation94_spill] sm:$0xff] }
 0x2ee   :  { %v4029_v24 = vpop.eup %4028 }
 0x2ef   :  { %4036 = vpow2.f32 %v2044_v51  ;;  %v4031_v30 = vpop.eup %4030  ;;  %2317 = vadd.xlane.f32.xlu1 %v2316_v3  ;;  %v2112_v47 = vsel %vm7603_vm10, %v4029_v24, 0.0  ;;  %v7620_v3 = vld [vmem:[#allocation57_spill] sm:$0xff] }
 0x2f0   :  { %4038 = vpow2.f32 %v2046_v42  ;;  %v1777_v10 = vpop.permute.xlu0 %1776  ;;  %v2113_v61 = vsel %vm7605_vm7, %v4031_v30, 0.0  ;;  %vm7621_vm0 = vnez %v7620_v3 }
 0x2f1   :  { %v1892_v37 = vsub.f32 %v5885_v1, %v1777_v10  ;;  %v1893_v19 = vsub.f32 %v5871_v41, %v1777_v10  ;;  %v2364_v40 = vadd.f32 %v2113_v61, %v2112_v47  ;;  %v7608_v41 = vld [vmem:[#allocation27_spill] sm:$0xff]  ;;  %v7623_v47 = vsub.f32 %v7622_v23, %v5698_v25 }
 0x2f2   :  { %vm7609_vm2 = vnez %v7608_v41  ;;  %v7630_v25 = vld [vmem:[#allocation103_spill] sm:$0xff] }
 0x2f3   :  { %v1984_v54 = vmul.f32 1.442695, %v1892_v37  ;;  %v1986_v56 = vmul.f32 1.442695, %v1893_v19  ;;  %2365 = vadd.xlane.f32.xlu1 %v2364_v40  ;;  %v2152_v10 = vmul.f32 1.442695, %v7623_v47 }
 0x2f4   :  { %v1857_v34 = vpop.permute.xlu0 %1856  ;;  %v7624_v37 = vld [vmem:[#allocation97_spill] sm:$0xff]  ;;  %v7625_v19 = vld [vmem:[#allocation98_spill] sm:$0xff]  ;;  %v7633_v41 = vld [vmem:[#allocation55_spill] sm:$0xff] }
 0x2f5   :  { %4040 = vpow2.f32 %v1984_v54  ;;  %v1924_v18 = vsub.f32 %v5913_v20, %v1857_v34  ;;  %v1925_v58 = vsub.f32 %v5896_v26, %v1857_v34  ;;  %v7610_v20 = vld [vmem:[#allocation51_spill] sm:$0xff]  ;;  %v7626_v40 = vsub.f32 %v7624_v37, %v7625_v19  ;;  %v7657_v37 = vld [vmem:[#allocation109_spill] sm:$0xff] }
 0x2f6   :  { %4042 = vpow2.f32 %v1986_v56  ;;  %vm7611_vm5 = vcmp.ne.s32.totalorder %v7610_v20, %v4830_v63  ;;  %v7627_v56 = vld [vmem:[#allocation28_spill] sm:$0xff]  ;;  %vm7634_vm12 = vcmp.ne.s32.totalorder %v7633_v41, %v4830_v63  ;;  %v7637_v20 = vld [vmem:[#allocation106_spill] sm:$0xff] }
 0x2f7   :  { %v2048_v15 = vmul.f32 1.442695, %v1924_v18  ;;  %v2050_v59 = vmul.f32 1.442695, %v1925_v58  ;;  %v2186_v54 = vmul.f32 1.442695, %v7626_v40  ;;  %vm7628_vm13 = vcmp.ne.s32.totalorder %v7627_v56, %v4830_v63 }
 0x2f8   :  { %v4033_v44 = vpop.eup %4032  ;;  %v2219_v56 = vld [vmem:[#allocation3 + $0x18] sm:$0xff]  ;;  %v7660_v18 = vld [vmem:[#allocation120_spill] sm:$0xff] }
 0x2f9   :  { %v4035_v46 = vpop.eup %4034  ;;  %v2082_v1 = vsel %vm7607_vm14, %v4033_v44, 0.0  ;;  %4044 = vpow2.f32 %v2048_v15 }
 0x2fa   :  { %v2083_v5 = vsel %vm7609_vm2, %v4035_v46, 0.0  ;;  %4046 = vpow2.f32 %v2050_v59  ;;  %v7631_v59 = vld [vmem:[#allocation104_spill] sm:$0xff] }
 0x2fb   :  { %v2319_v60 = vadd.f32 %v2083_v5, %v2082_v1  ;;  %v7632_v43 = vsub.f32 %v7630_v25, %v7631_v59  ;;  %v7663_v25 = vld [vmem:[#allocation110_spill] sm:$0xff]  ;;  %v7664_v59 = vld [vmem:[#allocation111_spill] sm:$0xff] }
 0x2fc   :  { %v4037_v35 = vpop.eup %4036 }
 0x2fd   :  { %v4039_v2 = vpop.eup %4038  ;;  %2320 = vadd.xlane.f32.xlu0 %v2319_v60  ;;  %v2114_v26 = vsel %vm7611_vm5, %v4037_v35, 0.0  ;;  %v2156_v1 = vmul.f32 1.442695, %v7632_v43  ;;  %v7635_v60 = vld [vmem:[#allocation58_spill] sm:$0xff]  ;;  %v7665_v43 = vsub.f32 %v7663_v25, %v7664_v59  ;;  %v3648_v25 = vld [vmem:[#allocation4 + $0x88] sm:$0xff] }
 0x2fe   :  { %v2115_v11 = vsel %vm7613_vm15, %v4039_v2, 0.0  ;;  %v1782_v17 = vpop.permute.xlu1 %1781  ;;  %vm7636_vm3 = vnez %v7635_v60 }
 0x2ff   :  { %v2367_v14 = vadd.f32 %v2115_v11, %v2114_v26  ;;  %v1894_v55 = vsub.f32 %v5952_v22, %v1782_v17  ;;  %v1895_v29 = vsub.f32 %v5939_v53, %v1782_v17  ;;  %v7638_v26 = vsub.f32 %v7637_v20, %v5935_v13  ;;  %v7639_v11 = vld [vmem:[#allocation107_spill] sm:$0xff]  ;;  %v2232_v20 = vld [vmem:[#allocation3 + $0x80] sm:$0xff] }
 0x300   :  { %v7640_v17 = vsub.f32 %v7639_v11, %v5958_v12 }
 0x301   :  { %2368 = vadd.xlane.f32.xlu0 %v2367_v14  ;;  %v1988_v8 = vmul.f32 1.442695, %v1894_v55  ;;  %v1990_v0 = vmul.f32 1.442695, %v1895_v29  ;;  %v2158_v45 = vmul.f32 1.442695, %v7638_v26 }
 0x302   :  { %v1862_v38 = vpop.permute.xlu1 %1861  ;;  %v4041_v52 = vpop.eup %4040  ;;  %v2190_v14 = vmul.f32 1.442695, %v7640_v17  ;;  %v2216_v29 = vld [vmem:[#allocation3] sm:$0xff]  ;;  %v2221_v17 = vld [vmem:[#allocation3 + $0x28] sm:$0xff] }
 0x303   :  { %4048 = vpow2.f32 %v1988_v8  ;;  %v1926_v36 = vsub.f32 %v5974_v49, %v1862_v38  ;;  %v1927_v62 = vsub.f32 %v5962_v6, %v1862_v38  ;;  %v4043_v50 = vpop.eup %4042  ;;  %v2084_v51 = vsel %vm7615_vm6, %v4041_v52, 0.0  ;;  %v7618_v49 = vld [vmem:[#allocation56_spill] sm:$0xff] }
 0x304   :  { %4050 = vpow2.f32 %v1990_v0  ;;  %v2085_v53 = vsel %vm7617_vm8, %v4043_v50, 0.0  ;;  %vm7619_vm4 = vcmp.ne.s32.totalorder %v7618_v49, %v4830_v63  ;;  %v7641_v8 = vld [vmem:[#allocation92_spill] sm:$0xff]  ;;  %v7643_v38 = vsub.f32 %v6003_v57, %v6008_v21  ;;  %v2233_v50 = vld [vmem:[#allocation3 + $0x88] sm:$0xff]  ;;  %v7651_v49 = vld [vmem:[#allocation105_spill] sm:$0xff] }
 0x305   :  { %v2052_v42 = vmul.f32 1.442695, %v1926_v36  ;;  %v2054_v22 = vmul.f32 1.442695, %v1927_v62  ;;  %v2322_v33 = vadd.f32 %v2085_v53, %v2084_v51  ;;  %v7642_v63 = vsub.f32 %v7641_v8, %v5725_v31  ;;  %v7645_v51 = vld [vmem:[#allocation96_spill] sm:$0xff]  ;;  %v7648_v53 = vld [vmem:[#allocation113_spill] sm:$0xff] }
 0x306   :  { %v4045_v27 = vpop.eup %4044  ;;  %v2162_v52 = vmul.f32 1.442695, %v7643_v38  ;;  %v7646_v12 = vsub.f32 %v7644_v9, %v7645_v51  ;;  %v7649_v31 = vsub.f32 %v7647_v32, %v7648_v53 }
 0x307   :  { %4052 = vpow2.f32 %v2052_v42  ;;  %v4047_v39 = vpop.eup %4046  ;;  %2323 = vadd.xlane.f32.xlu1 %v2322_v33  ;;  %v2116_v6 = vsel %vm7619_vm4, %v4045_v27, 0.0  ;;  %v2184_v0 = vmul.f32 1.442695, %v7642_v63 }
 0x308   :  { %4054 = vpow2.f32 %v2054_v22  ;;  %v2117_v24 = vsel %vm7621_vm0, %v4047_v39, 0.0  ;;  %v2154_v42 = vmul.f32 1.442695, %v7646_v12  ;;  %v2194_v33 = vmul.f32 1.442695, %v7649_v31  ;;  %v2218_v39 = vld [vmem:[#allocation3 + $0x10] sm:$0xff] }
 0x309   :  { %v2370_v30 = vadd.f32 %v2117_v24, %v2116_v6  ;;  %4056 = vpow2.f32 %v2152_v10  ;;  %v7652_v6 = vsub.f32 %v7651_v49, %v5891_v4  ;;  %v7659_v4 = vld [vmem:[#allocation119_spill] sm:$0xff] }
 0x30a   :  { %4058 = vpow2.f32 %v2186_v54  ;;  %v2237_v12 = vld [vmem:[#allocation3 + $0xa8] sm:$0xff] }
 0x30b   :  { %2371 = vadd.xlane.f32.xlu1 %v2370_v30  ;;  %4060 = vpow2.f32 %v2156_v1  ;;  %v2188_v3 = vmul.f32 1.442695, %v7652_v6  ;;  %v7653_v30 = vld [vmem:[#allocation118_spill] sm:$0xff]  ;;  %v2192_v1 = vmul.f32 1.442695, %v7665_v43 }
 0x30c   :  { %4062 = vpow2.f32 %v2158_v45  ;;  %v7654_v23 = vsub.f32 %v6056_v7, %v7653_v30  ;;  %v3663_v6 = vld [vmem:[%s6854_s2] sm:$0xff] }
 0x30d   :  { %4064 = vpow2.f32 %v2190_v14  ;;  %v7667_v14 = vld [vmem:[#allocation114_spill] sm:$0xff] }
 0x30e   :  { %4066 = vpow2.f32 %v2184_v0  ;;  %v2166_v47 = vmul.f32 1.442695, %v7654_v23 }
 0x30f   :  { %4068 = vpow2.f32 %v2162_v52 }
 0x310   :  { %v4049_v48 = vpop.eup %4048  ;;  %4070 = vpow2.f32 %v2154_v42  ;;  %v7671_v42 = vld [vmem:[#allocation116_spill] sm:$0xff] }
 0x311   :  { %v4051_v61 = vpop.eup %4050  ;;  %v2086_v34 = vsel %vm7628_vm13, %v4049_v48, 0.0  ;;  %4072 = vpow2.f32 %v2194_v33 }
 0x312   :  { %v2087_v58 = vsel %vm7380_vm11, %v4051_v61, 0.0  ;;  %vm7650_vm11 = vcmask 7168   ;;  %v7656_v61 = vld [vmem:[#allocation108_spill] sm:$0xff]  ;;  %4074 = vpow2.f32 %v2188_v3  ;;  %v3631_v3 = vld [vmem:[#allocation4] sm:$0xff] }
 0x313   :  { %v2325_v44 = vadd.f32 %v2087_v58, %v2086_v34  ;;  %vm7655_vm9 = vmmov %vm7650_vm11  ;;  %v7658_v19 = vsub.f32 %v7656_v61, %v7657_v37  ;;  %4076 = vpow2.f32 %v2166_v47  ;;  %v7661_v58 = vsub.f32 %v7659_v4, %v7660_v18  ;;  %v7676_v47 = vld [vmem:[#allocation121_spill] sm:$0xff]  ;;  %v2220_v4 = vld [vmem:[#allocation3 + $0x20] sm:$0xff] }
 0x314   :  { %v4053_v46 = vpop.eup %4052  ;;  %vm7662_vm1 = vmmov %vm7655_vm9  ;;  %v3695_v18 = vmul.f32 %v3663_v6, %v3631_v3  ;;  %v7691_v6 = vld [vmem:[#allocation127_spill] sm:$0xff]  ;;  %v7692_v3 = vld [vmem:[#allocation128_spill] sm:$0xff] }
 0x315   :  { %v4055_v15 = vpop.eup %4054  ;;  %2326 = vadd.xlane.f32.xlu0 %v2325_v44  ;;  %v2118_v5 = vsel %vm7634_vm12, %v4053_v46, 0.0  ;;  %v2160_v40 = vmul.f32 1.442695, %v7658_v19  ;;  %v2198_v44 = vmul.f32 1.442695, %v7661_v58  ;;  %vm7666_vm10 = vmmov %vm7662_vm1  ;;  %v2223_v19 = vld [vmem:[#allocation3 + $0x38] sm:$0xff] }
 0x316   :  { %v2119_v35 = vsel %vm7636_vm3, %v4055_v15, 0.0  ;;  %v4057_v55 = vpop.eup %4056  ;;  %vm7670_vm7 = vmmov %vm7662_vm1  ;;  %v3471_v58 = vld [vmem:[#allocation2] sm:$0xff] }
 0x317   :  { %v2373_v2 = vadd.f32 %v2119_v35, %v2118_v5  ;;  %v2248_v36 = vmul.f32 %v4057_v55, %v2216_v29  ;;  %v4059_v13 = vpop.eup %4058  ;;  %v2235_v5 = vld [vmem:[#allocation3 + $0x98] sm:$0xff]  ;;  %v7668_v55 = vld [vmem:[#allocation115_spill] sm:$0xff]  ;;  %vm7674_vm14 = vmmov %vm7662_vm1 }
 0x318   :  { %v2265_v27 = vmul.f32 %v4059_v13, %v2233_v50  ;;  %v4061_v57 = vpop.eup %4060  ;;  %v7669_v29 = vsub.f32 %v7667_v14, %v7668_v55  ;;  %v2217_v13 = vld [vmem:[#allocation3 + $0x8] sm:$0xff]  ;;  %vm7675_vm2 = vmmov %vm7662_vm1 }
 0x319   :  { %2374 = vadd.xlane.f32.xlu0 %v2373_v2  ;;  %v2250_v10 = vmul.f32 %v4061_v57, %v2218_v39  ;;  %v4063_v48 = vpop.eup %4062  ;;  %v2234_v39 = vld [vmem:[#allocation3 + $0x90] sm:$0xff]  ;;  %vm7679_vm5 = vmmov %vm7662_vm1 }
 0x31a   :  { %v2251_v46 = vmul.f32 %v4063_v48, %v2219_v56  ;;  %v4065_v15 = vpop.eup %4064  ;;  %v2164_v8 = vmul.f32 1.442695, %v7669_v29  ;;  %vm7680_vm15 = vmmov %vm7662_vm1 }
 0x31b   :  { %v4067_v35 = vpop.eup %4066  ;;  %v2267_v26 = vmul.f32 %v4065_v15, %v2235_v5  ;;  %v3680_v15 = vld [vmem:[%s6854_s2 + $0x88] sm:$0xff]  ;;  %vm7684_vm6 = vmmov %vm7662_vm1 }
 0x31c   :  { %v4069_v45 = vpop.eup %4068  ;;  %v2264_v0 = vmul.f32 %v4067_v35, %v2232_v20  ;;  %v7681_v5 = vld [vmem:[#allocation123_spill] sm:$0xff]  ;;  %vm7688_vm8 = vmmov %vm7662_vm1 }
 0x31d   :  { %v4071_v38 = vpop.eup %4070  ;;  %v2253_v50 = vmul.f32 %v4069_v45, %v2221_v17  ;;  %vm7689_vm4 = vmmov %vm7662_vm1 }
 0x31e   :  { %v4073_v9 = vpop.eup %4072  ;;  %v2249_v33 = vmul.f32 %v4071_v38, %v2217_v13  ;;  %v7685_v38 = vld [vmem:[#allocation125_spill] sm:$0xff]  ;;  %vm7690_vm0 = vmmov %vm7662_vm1 }
 0x31f   :  { %v2269_v30 = vmul.f32 %v4073_v9, %v2237_v12  ;;  %vm7694_vm13 = vmmov %vm7690_vm0 }
 0x320   :  { %vm7695_vm12 = vmmov %vm7690_vm0 }
 0x321   :  { %v2282_v62 = vpop.xlane.xlu0 %2281  ;;  %vm7696_vm3 = vmmov %vm7690_vm0 }
 0x322   :  { %v2376_v22 = vadd.f32 %v2282_v62, %v2248_v36 }
 0x324   :  { %2408 = vst.msk [vmem:[#allocation3] sm:$0xff] %vm7650_vm11, %v2376_v22  ;;  %v7672_v22 = vld [vmem:[#allocation117_spill] sm:$0xff]  ;;  %vm7697_vm11 = vmmov %vm7690_vm0 }
 0x325   :  { %v2333_v21 = vpop.xlane.xlu0 %2332  ;;  %v7673_v32 = vsub.f32 %v7671_v42, %v7672_v22  ;;  %v3665_v22 = vld [vmem:[%s6854_s2 + $0x10] sm:$0xff] }
 0x326   :  { %v2393_v24 = vadd.f32 %v2333_v21, %v2265_v27  ;;  %v4075_v27 = vpop.eup %4074 }
 0x327   :  { %v2196_v53 = vmul.f32 1.442695, %v7673_v32  ;;  %v4077_v49 = vpop.eup %4076  ;;  %v3633_v32 = vld [vmem:[#allocation4 + $0x10] sm:$0xff] }
 0x328   :  { %2425 = vst.msk [vmem:[#allocation3 + $0x88] sm:$0xff] %vm7655_vm9, %v2393_v24  ;;  %vm7698_vm9 = vmmov %vm7690_vm0 }
 0x329   :  { %v2288_v54 = vpop.xlane.xlu0 %2287 }
 0x32a   :  { %v2378_v34 = vadd.f32 %v2288_v54, %v2250_v10  ;;  %v7677_v10 = vld [vmem:[#allocation122_spill] sm:$0xff] }
 0x32b   :  { %v3503_v7 = vld [vmem:[#allocation3] sm:$0xff]  ;;  %v7678_v48 = vsub.f32 %v7676_v47, %v7677_v10  ;;  %v2222_v10 = vld [vmem:[#allocation3 + $0x30] sm:$0xff] }
 0x32c   :  { %4078 = vlog2.f32 %v3503_v7  ;;  %2410 = vst.msk [vmem:[#allocation3 + $0x10] sm:$0xff] %vm7662_vm1, %v2378_v34  ;;  %v2266_v34 = vmul.f32 %v4075_v27, %v2234_v39  ;;  %vm7702_vm1 = vmmov %vm7690_vm0 }
 0x32d   :  { %4080 = vpow2.f32 %v2160_v40  ;;  %v2291_v41 = vpop.xlane.xlu0 %2290  ;;  %v2168_v61 = vmul.f32 1.442695, %v7678_v48  ;;  %v3697_v48 = vmul.f32 %v3665_v22, %v3633_v32  ;;  %v3487_v22 = vld [vmem:[#allocation2 + $0x80] sm:$0xff] }
 0x32e   :  { %v2379_v60 = vadd.f32 %v2291_v41, %v2251_v46  ;;  %4082 = vpow2.f32 %v2198_v44 }
 0x32f   :  { %v3520_v2 = vld [vmem:[#allocation3 + $0x88] sm:$0xff] }
 0x330   :  { %4084 = vlog2.f32 %v3520_v2  ;;  %2411 = vst.msk [vmem:[#allocation3 + $0x18] sm:$0xff] %vm7666_vm10, %v2379_v60  ;;  %v7682_v60 = vld [vmem:[#allocation124_spill] sm:$0xff]  ;;  %vm7703_vm10 = vmmov %vm7690_vm0 }
 0x331   :  { %4086 = vpow2.f32 %v2192_v1  ;;  %v2339_v11 = vpop.xlane.xlu0 %2338  ;;  %v2255_v1 = vmul.f32 %v4077_v49, %v2223_v19  ;;  %v7683_v35 = vsub.f32 %v7681_v5, %v7682_v60  ;;  %v3473_v49 = vld [vmem:[#allocation2 + $0x10] sm:$0xff] }
 0x332   :  { %v2395_v63 = vadd.f32 %v2339_v11, %v2267_v26  ;;  %v2239_v11 = vld [vmem:[#allocation3 + $0xb8] sm:$0xff] }
 0x333   :  { %v3505_v52 = vld [vmem:[#allocation3 + $0x10] sm:$0xff]  ;;  %v2200_v2 = vmul.f32 1.442695, %v7683_v35 }
 0x334   :  { %v2330_v36 = vpop.xlane.xlu1 %2329  ;;  %4088 = vlog2.f32 %v3505_v52  ;;  %2427 = vst.msk [vmem:[#allocation3 + $0x98] sm:$0xff] %vm7670_vm7, %v2395_v63  ;;  %v3712_v63 = vmul.f32 %v3680_v15, %v3648_v25  ;;  %v7686_v52 = vld [vmem:[#allocation126_spill] sm:$0xff]  ;;  %v2238_v15 = vld [vmem:[#allocation3 + $0xb0] sm:$0xff]  ;;  %vm7707_vm7 = vmmov %vm7690_vm0 }
 0x335   :  { %v2392_v62 = vadd.f32 %v2330_v36, %v2264_v0  ;;  %v2297_v51 = vpop.xlane.xlu0 %2296  ;;  %4090 = vpow2.f32 %v2164_v8  ;;  %v2236_v8 = vld [vmem:[#allocation3 + $0xa0] sm:$0xff]  ;;  %v3488_v0 = vld [vmem:[#allocation2 + $0x88] sm:$0xff]  ;;  %v7687_v36 = vsub.f32 %v7685_v38, %v7686_v52 }
 0x336   :  { %v2381_v31 = vadd.f32 %v2297_v51, %v2253_v50 }
 0x337   :  { %2424 = vst.msk [vmem:[#allocation3 + $0x80] sm:$0xff] %vm7674_vm14, %v2392_v62  ;;  %v3506_v57 = vld [vmem:[#allocation3 + $0x18] sm:$0xff]  ;;  %v2170_v13 = vmul.f32 1.442695, %v7687_v36  ;;  %vm7708_vm14 = vmmov %vm7690_vm0 }
 0x338   :  { %v2285_v21 = vpop.xlane.xlu1 %2284  ;;  %4092 = vlog2.f32 %v3506_v57  ;;  %2413 = vst.msk [vmem:[#allocation3 + $0x28] sm:$0xff] %vm7675_vm2, %v2381_v31  ;;  %vm7709_vm2 = vmmov %vm7690_vm0 }
 0x339   :  { %v2377_v24 = vadd.f32 %v2285_v21, %v2249_v33  ;;  %v4079_v23 = vpop.eup %4078  ;;  %v2345_v37 = vpop.xlane.xlu0 %2344  ;;  %4094 = vpow2.f32 %v2196_v53 }
 0x33a   :  { %v4081_v40 = vpop.eup %4080  ;;  %v3536_v54 = vmul.f32 0.6931472, %v4079_v23  ;;  %v2397_v56 = vadd.f32 %v2345_v37, %v2269_v30 }
 0x33b   :  { %2409 = vst.msk [vmem:[#allocation3 + $0x8] sm:$0xff] %vm7679_vm5, %v2377_v24  ;;  %v3522_v44 = vld [vmem:[#allocation3 + $0x98] sm:$0xff]  ;;  %v4083_v46 = vpop.eup %4082  ;;  %v2252_v45 = vmul.f32 %v4081_v40, %v2220_v4  ;;  %v7693_v24 = vsub.f32 %v7691_v6, %v7692_v3  ;;  %vm7710_vm5 = vmmov %vm7690_vm0 }
 0x33c   :  { %v2336_v7 = vpop.xlane.xlu1 %2335  ;;  %v3599_v59 = vadd.f32 %v3536_v54, %v3471_v58  ;;  %4096 = vlog2.f32 %v3522_v44  ;;  %2429 = vst.msk [vmem:[#allocation3 + $0xa8] sm:$0xff] %vm7680_vm15, %v2397_v56  ;;  %v2271_v12 = vmul.f32 %v4083_v46, %v2239_v11  ;;  %v3666_v40 = vld [vmem:[%s6854_s2 + $0x18] sm:$0xff]  ;;  %vm7711_vm15 = vmmov %vm7690_vm0 }
 0x33d   :  { %v2394_v43 = vadd.f32 %v2336_v7, %v2266_v34  ;;  %v4085_v41 = vpop.eup %4084  ;;  %4098 = vpow2.f32 %v2168_v61  ;;  %v2202_v30 = vmul.f32 1.442695, %v7693_v24  ;;  %v3634_v54 = vld [vmem:[#allocation4 + $0x18] sm:$0xff]  ;;  %v3476_v24 = vld [vmem:[#allocation2 + $0x28] sm:$0xff] }
 0x33e   :  { %v3519_v20 = vld [vmem:[#allocation3 + $0x80] sm:$0xff]  ;;  %v2303_v26 = vpop.xlane.xlu0 %2302  ;;  %v4087_v17 = vpop.eup %4086  ;;  %v3727_v14 = vsub.f32 %v3695_v18, %v3599_v59  ;;  %v3570_v55 = vmul.f32 0.6931472, %v4085_v41  ;;  %v3474_v44 = vld [vmem:[#allocation2 + $0x18] sm:$0xff]  ;;  %v3698_v25 = vmul.f32 %v3666_v40, %v3634_v54 }
 0x33f   :  { %4100 = vlog2.f32 %v3519_v20  ;;  %2426 = vst.msk [vmem:[#allocation3 + $0x90] sm:$0xff] %vm7684_vm6, %v2394_v43  ;;  %v2383_v29 = vadd.f32 %v2303_v26, %v2255_v1  ;;  %v3508_v62 = vld [vmem:[#allocation3 + $0x28] sm:$0xff]  ;;  %v2268_v33 = vmul.f32 %v4087_v17, %v2236_v8  ;;  %v3682_v59 = vld [vmem:[%s6854_s2 + $0x98] sm:$0xff]  ;;  %v3647_v20 = vld [vmem:[#allocation4 + $0x80] sm:$0xff] }
 0x340   :  { %v2294_v50 = vpop.xlane.xlu1 %2293  ;;  %3759 = vst.msk [vmem:[%s6855_s5] sm:$0xff] %vm7688_vm8, %v3727_v14  ;;  %v3616_v9 = vadd.f32 %v3570_v55, %v3488_v0  ;;  %4102 = vlog2.f32 %v3508_v62  ;;  %v3650_v43 = vld [vmem:[#allocation4 + $0x98] sm:$0xff]  ;;  %v2224_v17 = vld [vmem:[#allocation3 + $0x40] sm:$0xff]  ;;  %v3636_v62 = vld [vmem:[#allocation4 + $0x28] sm:$0xff] }
 0x341   :  { %2415 = vst.msk [vmem:[#allocation3 + $0x38] sm:$0xff] %vm7689_vm4, %v2383_v29  ;;  %v2380_v51 = vadd.f32 %v2294_v50, %v2252_v45  ;;  %v4089_v42 = vpop.eup %4088  ;;  %4104 = vpow2.f32 %v2200_v2  ;;  %v3679_v2 = vld [vmem:[%s6854_s2 + $0x80] sm:$0xff]  ;;  %v3714_v55 = vmul.f32 %v3682_v59, %v3650_v43  ;;  %v3490_v29 = vld [vmem:[#allocation2 + $0x98] sm:$0xff]  ;;  %vm7712_vm6 = vmmov %vm7690_vm0 }
 0x342   :  { %v3504_v53 = vld [vmem:[#allocation3 + $0x8] sm:$0xff]  ;;  %v2351_v31 = vpop.xlane.xlu0 %2350  ;;  %v3744_v27 = vsub.f32 %v3712_v63, %v3616_v9  ;;  %v3540_v57 = vmul.f32 0.6931472, %v4089_v42  ;;  %v4091_v39 = vpop.eup %4090  ;;  %v7699_v8 = vld [vmem:[#allocation129_spill] sm:$0xff]  ;;  %v7700_v63 = vld [vmem:[#allocation130_spill] sm:$0xff]  ;;  %v3711_v42 = vmul.f32 %v3679_v2, %v3647_v20 }
 0x343   :  { %4106 = vlog2.f32 %v3504_v53  ;;  %2412 = vst.msk [vmem:[#allocation3 + $0x20] sm:$0xff] %vm7690_vm0, %v2380_v51  ;;  %v2399_v21 = vadd.f32 %v2351_v31, %v2271_v12  ;;  %v3524_v23 = vld [vmem:[#allocation3 + $0xa8] sm:$0xff]  ;;  %v2254_v18 = vmul.f32 %v4091_v39, %v2222_v10  ;;  %v7701_v0 = vsub.f32 %v7699_v8, %v7700_v63  ;;  %vm7716_vm8 = vmmov %vm7690_vm0 }
 0x344   :  { %4108 = vpow2.f32 %v2170_v13  ;;  %v2342_v47 = vpop.xlane.xlu1 %2341  ;;  %3776 = vst.msk [vmem:[%s6855_s5 + $0x88] sm:$0xff] %vm7694_vm13, %v3744_v27  ;;  %v3601_v61 = vadd.f32 %v3540_v57, %v3473_v49  ;;  %v3668_v13 = vld [vmem:[%s6854_s2 + $0x28] sm:$0xff]  ;;  %v2240_v49 = vld [vmem:[#allocation3 + $0xc0] sm:$0xff]  ;;  %vm7717_vm4 = vmmov %vm7690_vm0 }
 0x345   :  { %4110 = vlog2.f32 %v3524_v23  ;;  %2431 = vst.msk [vmem:[#allocation3 + $0xb8] sm:$0xff] %vm7695_vm12, %v2399_v21  ;;  %v2396_v37 = vadd.f32 %v2342_v47, %v2268_v33  ;;  %v4093_v19 = vpop.eup %4092  ;;  %v2172_v38 = vmul.f32 1.442695, %v7701_v0  ;;  %v3664_v33 = vld [vmem:[%s6854_s2 + $0x8] sm:$0xff]  ;;  %v3700_v3 = vmul.f32 %v3668_v13, %v3636_v62  ;;  %v7705_v23 = vld [vmem:[#allocation132_spill] sm:$0xff]  ;;  %v3667_v13 = vld [vmem:[%s6854_s2 + $0x20] sm:$0xff] }
 0x346   :  { %v3521_v56 = vld [vmem:[#allocation3 + $0x90] sm:$0xff]  ;;  %v3729_v34 = vsub.f32 %v3697_v48, %v3601_v61  ;;  %v3542_v4 = vmul.f32 0.6931472, %v4093_v19  ;;  %v4095_v58 = vpop.eup %4094  ;;  %v3632_v27 = vld [vmem:[#allocation4 + $0x8] sm:$0xff]  ;;  %v3635_v62 = vld [vmem:[#allocation4 + $0x20] sm:$0xff] }
 0x347   :  { %4112 = vlog2.f32 %v3521_v56  ;;  %2428 = vst.msk [vmem:[#allocation3 + $0xa0] sm:$0xff] %vm7696_vm3, %v2396_v37  ;;  %v2270_v11 = vmul.f32 %v4095_v58, %v2238_v15  ;;  %v3684_v37 = vld [vmem:[%s6854_s2 + $0xa8] sm:$0xff]  ;;  %v3696_v58 = vmul.f32 %v3664_v33, %v3632_v27  ;;  %v3681_v15 = vld [vmem:[%s6854_s2 + $0x90] sm:$0xff]  ;;  %vm7721_vm13 = vmmov %vm7690_vm0 }
 0x348   :  { %4114 = vpow2.f32 %v2202_v30  ;;  %v3510_v7 = vld [vmem:[#allocation3 + $0x38] sm:$0xff]  ;;  %v2300_v46 = vpop.xlane.xlu1 %2299  ;;  %3761 = vst.msk [vmem:[%s6855_s5 + $0x10] sm:$0xff] %vm7697_vm11, %v3729_v34  ;;  %v3602_v1 = vadd.f32 %v3542_v4, %v3474_v44  ;;  %v7704_v30 = vld [vmem:[#allocation131_spill] sm:$0xff]  ;;  %v3489_v0 = vld [vmem:[#allocation2 + $0x90] sm:$0xff] }
 0x349   :  { %4116 = vlog2.f32 %v3510_v7  ;;  %v2382_v41 = vadd.f32 %v2300_v46, %v2254_v18  ;;  %v4097_v5 = vpop.eup %4096  ;;  %v7706_v47 = vsub.f32 %v7704_v30, %v7705_v23  ;;  %v3652_v19 = vld [vmem:[#allocation4 + $0xa8] sm:$0xff]  ;;  %v3475_v30 = vld [vmem:[#allocation2 + $0x20] sm:$0xff]  ;;  %v3654_v23 = vld [vmem:[#allocation4 + $0xb8] sm:$0xff] }
 0x34a   :  { %v3507_v60 = vld [vmem:[#allocation3 + $0x20] sm:$0xff]  ;;  %v4099_v35 = vpop.eup %4098  ;;  %v3730_v26 = vsub.f32 %v3698_v25, %v3602_v1  ;;  %v3574_v45 = vmul.f32 0.6931472, %v4097_v5  ;;  %v2225_v4 = vld [vmem:[#allocation3 + $0x48] sm:$0xff]  ;;  %v3649_v25 = vld [vmem:[#allocation4 + $0x90] sm:$0xff]  ;;  %v3716_v5 = vmul.f32 %v3684_v37, %v3652_v19 }
 0x34b   :  { %4118 = vlog2.f32 %v3507_v60  ;;  %2414 = vst.msk [vmem:[#allocation3 + $0x30] sm:$0xff] %vm7698_vm9, %v2382_v41  ;;  %v2256_v53 = vmul.f32 %v4099_v35, %v2224_v17  ;;  %v2204_v10 = vmul.f32 1.442695, %v7706_v47  ;;  %v3472_v44 = vld [vmem:[#allocation2 + $0x8] sm:$0xff]  ;;  %v3713_v63 = vmul.f32 %v3681_v15, %v3649_v25  ;;  %vm7722_vm12 = vmmov %vm7690_vm0 }
 0x34c   :  { %v4101_v14 = vpop.eup %4100  ;;  %v3526_v52 = vld [vmem:[#allocation3 + $0xb8] sm:$0xff]  ;;  %v2348_v36 = vpop.xlane.xlu1 %2347  ;;  %3762 = vst.msk [vmem:[%s6855_s5 + $0x18] sm:$0xff] %vm7702_vm1, %v3730_v26  ;;  %v3618_v50 = vadd.f32 %v3574_v45, %v3490_v29  ;;  %v3492_v60 = vld [vmem:[#allocation2 + $0xa8] sm:$0xff]  ;;  %vm7723_vm3 = vmmov %vm7690_vm0 }
 0x34d   :  { %v3568_v9 = vmul.f32 0.6931472, %v4101_v14  ;;  %4120 = vlog2.f32 %v3526_v52  ;;  %v2398_v51 = vadd.f32 %v2348_v36, %v2270_v11  ;;  %v4103_v12 = vpop.eup %4102  ;;  %v3670_v26 = vld [vmem:[%s6854_s2 + $0x38] sm:$0xff]  ;;  %v2241_v29 = vld [vmem:[#allocation3 + $0xc8] sm:$0xff]  ;;  %vm7724_vm11 = vmmov %vm7690_vm0 }
 0x34e   :  { %v3523_v32 = vld [vmem:[#allocation3 + $0xa0] sm:$0xff]  ;;  %v4105_v31 = vpop.eup %4104  ;;  %v3746_v57 = vsub.f32 %v3714_v55, %v3618_v50  ;;  %v3546_v39 = vmul.f32 0.6931472, %v4103_v12  ;;  %v7718_v47 = vld [vmem:[#allocation135_spill] sm:$0xff]  ;;  %vm7725_vm9 = vmmov %vm7690_vm0 }
 0x34f   :  { %v3615_v21 = vadd.f32 %v3568_v9, %v3487_v22  ;;  %4122 = vlog2.f32 %v3523_v32  ;;  %2430 = vst.msk [vmem:[#allocation3 + $0xb0] sm:$0xff] %vm7703_vm10, %v2398_v51  ;;  %v2272_v46 = vmul.f32 %v4105_v31, %v2240_v49  ;;  %v7713_v22 = vld [vmem:[#allocation133_spill] sm:$0xff]  ;;  %v7714_v32 = vld [vmem:[#allocation134_spill] sm:$0xff]  ;;  %vm7729_vm1 = vmmov %vm7690_vm0 }
 0x350   :  { %v4107_v6 = vpop.eup %4106  ;;  %4124 = vpow2.f32 %v2172_v38  ;;  %v2306_v48 = vpop.xlane.xlu1 %2305  ;;  %3778 = vst.msk [vmem:[%s6855_s5 + $0x98] sm:$0xff] %vm7707_vm7, %v3746_v57  ;;  %v3604_v54 = vadd.f32 %v3546_v39, %v3476_v24  ;;  %v3638_v38 = vld [vmem:[#allocation4 + $0x38] sm:$0xff]  ;;  %v3699_v24 = vmul.f32 %v3667_v13, %v3635_v62  ;;  %v3685_v13 = vld [vmem:[%s6854_s2 + $0xb0] sm:$0xff]  ;;  %vm7733_vm10 = vmmov %vm7690_vm0 }
 0x351   :  { %v4109_v61 = vpop.eup %4108  ;;  %v3743_v40 = vsub.f32 %v3711_v42, %v3615_v21  ;;  %v3538_v56 = vmul.f32 0.6931472, %v4107_v6  ;;  %v2384_v34 = vadd.f32 %v2306_v48, %v2256_v53  ;;  %v3478_v42 = vld [vmem:[#allocation2 + $0x38] sm:$0xff]  ;;  %v7715_v53 = vsub.f32 %v7713_v22, %v7714_v32  ;;  %v3653_v62 = vld [vmem:[#allocation4 + $0xb0] sm:$0xff]  ;;  %vm7734_vm7 = vmmov %vm7690_vm0 }
 0x352   :  { %v4111_v18 = vpop.eup %4110  ;;  %v3509_v7 = vld [vmem:[#allocation3 + $0x30] sm:$0xff]  ;;  %v3732_v59 = vsub.f32 %v3700_v3, %v3604_v54  ;;  %v2257_v2 = vmul.f32 %v4109_v61, %v2225_v4  ;;  %v3702_v27 = vmul.f32 %v3670_v26, %v3638_v38  ;;  %v3686_v57 = vld [vmem:[%s6854_s2 + $0xb8] sm:$0xff]  ;;  %v3683_v4 = vld [vmem:[%s6854_s2 + $0xa0] sm:$0xff] }
 0x353   :  { %3775 = vst.msk [vmem:[%s6855_s5 + $0x80] sm:$0xff] %vm7708_vm14, %v3743_v40  ;;  %v3600_v43 = vadd.f32 %v3538_v56, %v3472_v44  ;;  %v3578_v1 = vmul.f32 0.6931472, %v4111_v18  ;;  %4126 = vlog2.f32 %v3509_v7  ;;  %v2174_v31 = vmul.f32 1.442695, %v7715_v53  ;;  %v3651_v18 = vld [vmem:[#allocation4 + $0xa0] sm:$0xff]  ;;  %vm7735_vm14 = vmmov %vm7690_vm0 }
 0x354   :  { %2416 = vst.msk [vmem:[#allocation3 + $0x40] sm:$0xff] %vm7709_vm2, %v2384_v34  ;;  %v4113_v41 = vpop.eup %4112  ;;  %4128 = vpow2.f32 %v2204_v10  ;;  %v2354_v35 = vpop.xlane.xlu1 %2353  ;;  %v7719_v10 = vld [vmem:[#allocation136_spill] sm:$0xff]  ;;  %v3718_v7 = vmul.f32 %v3686_v57, %v3654_v23  ;;  %v7730_v57 = vld [vmem:[#allocation139_spill] sm:$0xff]  ;;  %vm7736_vm2 = vmmov %vm7690_vm0 }
 0x355   :  { %v4115_v20 = vpop.eup %4114  ;;  %3764 = vst.msk [vmem:[%s6855_s5 + $0x28] sm:$0xff] %vm7710_vm5, %v3732_v59  ;;  %v3728_v45 = vsub.f32 %v3696_v58, %v3600_v43  ;;  %v3620_v11 = vadd.f32 %v3578_v1, %v3492_v60  ;;  %v3572_v17 = vmul.f32 0.6931472, %v4113_v41  ;;  %v2400_v14 = vadd.f32 %v2354_v35, %v2272_v46  ;;  %v3494_v58 = vld [vmem:[#allocation2 + $0xb8] sm:$0xff]  ;;  %v2226_v59 = vld [vmem:[#allocation3 + $0x50] sm:$0xff]  ;;  %v3491_v43 = vld [vmem:[#allocation2 + $0xa0] sm:$0xff] }
 0x356   :  { %v2309_v55 = vpop.xlane.xlu0 %2308  ;;  %v4117_v8 = vpop.eup %4116  ;;  %v3525_v52 = vld [vmem:[#allocation3 + $0xb0] sm:$0xff]  ;;  %v2273_v33 = vmul.f32 %v4115_v20, %v2241_v29  ;;  %v7720_v48 = vsub.f32 %v7718_v47, %v7719_v10  ;;  %v3715_v41 = vmul.f32 %v3683_v4, %v3651_v18  ;;  %v3655_v4 = vld [vmem:[#allocation4 + $0xc0] sm:$0xff]  ;;  %v3672_v18 = vld [vmem:[%s6854_s2 + $0x48] sm:$0xff] }
 0x357   :  { %v2385_v36 = vadd.f32 %v2309_v55, %v2257_v2  ;;  %3760 = vst.msk [vmem:[%s6855_s5 + $0x8] sm:$0xff] %vm7711_vm15, %v3728_v45  ;;  %v3748_v50 = vsub.f32 %v3716_v5, %v3620_v11  ;;  %v3617_v9 = vadd.f32 %v3572_v17, %v3489_v0  ;;  %v3550_v51 = vmul.f32 0.6931472, %v4117_v8  ;;  %v3669_v20 = vld [vmem:[%s6854_s2 + $0x30] sm:$0xff]  ;;  %vm7740_vm5 = vmmov %vm7690_vm0 }
 0x358   :  { %4130 = vlog2.f32 %v3525_v52  ;;  %2432 = vst.msk [vmem:[#allocation3 + $0xc0] sm:$0xff] %vm7712_vm6, %v2400_v14  ;;  %v4119_v12 = vpop.eup %4118  ;;  %v2206_v61 = vmul.f32 1.442695, %v7720_v48  ;;  %v3637_v26 = vld [vmem:[#allocation4 + $0x30] sm:$0xff]  ;;  %v2227_v48 = vld [vmem:[#allocation3 + $0x58] sm:$0xff]  ;;  %vm7744_vm15 = vmmov %vm7690_vm0 }
 0x359   :  { %2417 = vst.msk [vmem:[#allocation3 + $0x48] sm:$0xff] %vm7716_vm8, %v2385_v36  ;;  %v3745_v21 = vsub.f32 %v3713_v63, %v3617_v9  ;;  %v3606_v39 = vadd.f32 %v3550_v51, %v3478_v42  ;;  %v3544_v49 = vmul.f32 0.6931472, %v4119_v12  ;;  %v2242_v29 = vld [vmem:[#allocation3 + $0xd0] sm:$0xff]  ;;  %v3701_v0 = vmul.f32 %v3669_v20, %v3637_v26  ;;  %v7727_v9 = vld [vmem:[#allocation138_spill] sm:$0xff]  ;;  %v7737_v26 = vld [vmem:[#allocation141_spill] sm:$0xff] }
 0x35a   :  { %3780 = vst.msk [vmem:[%s6855_s5 + $0xa8] sm:$0xff] %vm7717_vm4, %v3748_v50  ;;  %v2357_v6 = vpop.xlane.xlu0 %2356  ;;  %v4121_v3 = vpop.eup %4120  ;;  %v3477_v8 = vld [vmem:[#allocation2 + $0x30] sm:$0xff]  ;;  %v7726_v50 = vld [vmem:[#allocation137_spill] sm:$0xff]  ;;  %vm7745_vm6 = vmmov %vm7690_vm0 }
 0x35b   :  { %v3511_v37 = vld [vmem:[#allocation3 + $0x40] sm:$0xff]  ;;  %v2401_v19 = vadd.f32 %v2357_v6, %v2273_v33  ;;  %3777 = vst.msk [vmem:[%s6855_s5 + $0x90] sm:$0xff] %vm7690_vm0, %v3745_v21  ;;  %v3734_v40 = vsub.f32 %v3702_v27, %v3606_v39  ;;  %v3603_v54 = vadd.f32 %v3544_v49, %v3475_v30  ;;  %v3582_v56 = vmul.f32 0.6931472, %v4121_v3  ;;  %v7731_v21 = vld [vmem:[#allocation140_spill] sm:$0xff]  ;;  %vm7746_vm8 = vmmov %vm7690_vm0 }
 0x35c   :  { %4132 = vlog2.f32 %v3511_v37  ;;  %v4123_v34 = vpop.eup %4122  ;;  %v7728_v51 = vsub.f32 %v7726_v50, %v7727_v9  ;;  %v3717_v27 = vmul.f32 %v3685_v13, %v3653_v62  ;;  %v7732_v39 = vsub.f32 %v7730_v57, %v7731_v21  ;;  %v3639_v30 = vld [vmem:[#allocation4 + $0x40] sm:$0xff]  ;;  %v3496_v62 = vld [vmem:[#allocation2 + $0xc8] sm:$0xff]  ;;  %v7742_v9 = vld [vmem:[#allocation144_spill] sm:$0xff] }
 0x35d   :  { %4134 = vpow2.f32 %v2174_v31  ;;  %2433 = vst.msk [vmem:[#allocation3 + $0xc8] sm:$0xff] %vm7721_vm13, %v2401_v19  ;;  %v4125_v44 = vpop.eup %4124  ;;  %v3731_v46 = vsub.f32 %v3699_v24, %v3603_v54  ;;  %v3622_v15 = vadd.f32 %v3582_v56, %v3494_v58  ;;  %v3576_v25 = vmul.f32 0.6931472, %v4123_v34  ;;  %v3493_v31 = vld [vmem:[#allocation2 + $0xb0] sm:$0xff]  ;;  %v3671_v24 = vld [vmem:[%s6854_s2 + $0x40] sm:$0xff]  ;;  %v3640_v58 = vld [vmem:[#allocation4 + $0x48] sm:$0xff] }
 0x35e   :  { %3766 = vst.msk [vmem:[%s6855_s5 + $0x38] sm:$0xff] %vm7722_vm12, %v3734_v40  ;;  %4136 = vpow2.f32 %v2206_v61  ;;  %v2258_v45 = vmul.f32 %v4125_v44, %v2226_v59  ;;  %v2176_v12 = vmul.f32 1.442695, %v7728_v51  ;;  %v2208_v49 = vmul.f32 1.442695, %v7732_v39  ;;  %v3479_v61 = vld [vmem:[#allocation2 + $0x40] sm:$0xff]  ;;  %vm7747_vm4 = vmmov %vm7690_vm0 }
 0x35f   :  { %v3527_v1 = vld [vmem:[#allocation3 + $0xc0] sm:$0xff]  ;;  %3763 = vst.msk [vmem:[%s6855_s5 + $0x20] sm:$0xff] %vm7723_vm3, %v3731_v46  ;;  %v3750_v5 = vsub.f32 %v3718_v7, %v3622_v15  ;;  %v3619_v60 = vadd.f32 %v3576_v25, %v3491_v43  ;;  %v3703_v19 = vmul.f32 %v3671_v24, %v3639_v30  ;;  %v2243_v59 = vld [vmem:[#allocation3 + $0xd8] sm:$0xff]  ;;  %v7741_v50 = vld [vmem:[#allocation143_spill] sm:$0xff] }
 0x360   :  { %4138 = vlog2.f32 %v3527_v1  ;;  %v3512_v35 = vld [vmem:[#allocation3 + $0x48] sm:$0xff]  ;;  %v4127_v2 = vpop.eup %4126  ;;  %v2312_v55 = vpop.xlane.xlu1 %2311  ;;  %v3687_v40 = vld [vmem:[%s6854_s2 + $0xc0] sm:$0xff]  ;;  %v7743_v51 = vsub.f32 %v7741_v50, %v7742_v9  ;;  %v3673_v57 = vld [vmem:[%s6854_s2 + $0x50] sm:$0xff] }
 0x361   :  { %4140 = vlog2.f32 %v3512_v35  ;;  %v4129_v11 = vpop.eup %4128  ;;  %3782 = vst.msk [vmem:[%s6855_s5 + $0xb8] sm:$0xff] %vm7724_vm11, %v3750_v5  ;;  %v3747_v17 = vsub.f32 %v3715_v41, %v3619_v60  ;;  %v3548_v14 = vmul.f32 0.6931472, %v4127_v2  ;;  %v2386_v63 = vadd.f32 %v2312_v55, %v2258_v45  ;;  %v3495_v43 = vld [vmem:[#allocation2 + $0xc0] sm:$0xff]  ;;  %v3480_v35 = vld [vmem:[#allocation2 + $0x48] sm:$0xff]  ;;  %v3641_v21 = vld [vmem:[#allocation4 + $0x50] sm:$0xff] }
 0x362   :  { %v2274_v42 = vmul.f32 %v4129_v11, %v2242_v29  ;;  %v3719_v5 = vmul.f32 %v3687_v40, %v3655_v4  ;;  %v3704_v60 = vmul.f32 %v3672_v18, %v3640_v58  ;;  %v7738_v45 = vld [vmem:[#allocation142_spill] sm:$0xff]  ;;  %vm7753_vm13 = vmmov %vm7690_vm0 }
 0x363   :  { %3779 = vst.msk [vmem:[%s6855_s5 + $0xa0] sm:$0xff] %vm7725_vm9, %v3747_v17  ;;  %v3605_v38 = vadd.f32 %v3548_v14, %v3477_v8  ;;  %v7739_v11 = vsub.f32 %v7737_v26, %v7738_v45  ;;  %v3688_v8 = vld [vmem:[%s6854_s2 + $0xc8] sm:$0xff]  ;;  %vm7754_vm12 = vmmov %vm7690_vm0  ;;  %v3674_v26 = vld [vmem:[%s6854_s2 + $0x58] sm:$0xff] }
 0x364   :  { %v3528_v52 = vld [vmem:[#allocation3 + $0xc8] sm:$0xff]  ;;  %2418 = vst.msk [vmem:[#allocation3 + $0x50] sm:$0xff] %vm7729_vm1, %v2386_v63  ;;  %v2360_v53 = vpop.xlane.xlu1 %2359  ;;  %vm7755_vm3 = vmmov %vm7690_vm0  ;;  %v3642_v45 = vld [vmem:[#allocation4 + $0x58] sm:$0xff] }
 0x365   :  { %v4131_v36 = vpop.eup %4130  ;;  %4142 = vlog2.f32 %v3528_v52  ;;  %v3733_v22 = vsub.f32 %v3701_v0, %v3605_v38  ;;  %v2402_v33 = vadd.f32 %v2360_v53, %v2274_v42  ;;  %v2178_v17 = vmul.f32 1.442695, %v7739_v11  ;;  %v3656_v63 = vld [vmem:[#allocation4 + $0xc8] sm:$0xff]  ;;  %v2228_v53 = vld [vmem:[#allocation3 + $0x60] sm:$0xff]  ;;  %vm7756_vm11 = vmmov %vm7690_vm0 }
 0x366   :  { %v3580_v32 = vmul.f32 0.6931472, %v4131_v36  ;;  %4144 = vpow2.f32 %v2176_v12  ;;  %v2210_v12 = vmul.f32 1.442695, %v7743_v51  ;;  %v3720_v42 = vmul.f32 %v3688_v8, %v3656_v63  ;;  %vm7759_vm9 = vmmov %vm7690_vm0 }
 0x367   :  { %3765 = vst.msk [vmem:[%s6855_s5 + $0x30] sm:$0xff] %vm7733_vm10, %v3733_v22  ;;  %4146 = vpow2.f32 %v2208_v49  ;;  %v3706_v63 = vmul.f32 %v3674_v26, %v3642_v45  ;;  %vm7760_vm1 = vmmov %vm7690_vm0 }
 0x368   :  { %v3621_v6 = vadd.f32 %v3580_v32, %v3493_v31  ;;  %2434 = vst.msk [vmem:[#allocation3 + $0xd0] sm:$0xff] %vm7734_vm7, %v2402_v33  ;;  %vm7764_vm10 = vmmov %vm7690_vm0 }
 0x369   :  { %v4133_v3 = vpop.eup %4132  ;;  %vm7765_vm7 = vmmov %vm7690_vm0 }
 0x36a   :  { %v4135_v23 = vpop.eup %4134  ;;  %v3749_v47 = vsub.f32 %v3717_v27, %v3621_v6  ;;  %v3552_v10 = vmul.f32 0.6931472, %v4133_v3  ;;  %v2244_v3 = vld [vmem:[#allocation3 + $0xe0] sm:$0xff] }
 0x36b   :  { %v4137_v37 = vpop.eup %4136  ;;  %v3513_v56 = vld [vmem:[#allocation3 + $0x50] sm:$0xff]  ;;  %v2259_v44 = vmul.f32 %v4135_v23, %v2227_v48  ;;  %v3705_v23 = vmul.f32 %v3673_v57, %v3641_v21  ;;  %v7748_v48 = vld [vmem:[#allocation145_spill] sm:$0xff] }
 0x36c   :  { %3781 = vst.msk [vmem:[%s6855_s5 + $0xb0] sm:$0xff] %vm7735_vm14, %v3749_v47  ;;  %v3607_v54 = vadd.f32 %v3552_v10, %v3479_v61  ;;  %4148 = vlog2.f32 %v3513_v56  ;;  %v2275_v55 = vmul.f32 %v4137_v37, %v2243_v59  ;;  %v3481_v47 = vld [vmem:[#allocation2 + $0x50] sm:$0xff]  ;;  %v7749_v61 = vsub.f32 %v6227_v28, %v7748_v48  ;;  %vm7766_vm14 = vmmov %vm7690_vm0 }
 0x36d   :  { %v4139_v34 = vpop.eup %4138  ;;  %v3689_v56 = vld [vmem:[%s6854_s2 + $0xd0] sm:$0xff] }
 0x36e   :  { %v4141_v7 = vpop.eup %4140  ;;  %v3735_v46 = vsub.f32 %v3703_v19, %v3607_v54  ;;  %v3584_v15 = vmul.f32 0.6931472, %v4139_v34  ;;  %v2315_v25 = vpop.xlane.xlu0 %2314  ;;  %v2180_v37 = vmul.f32 1.442695, %v7749_v61  ;;  %v3657_v34 = vld [vmem:[#allocation4 + $0xd0] sm:$0xff] }
 0x36f   :  { %v3554_v1 = vmul.f32 0.6931472, %v4141_v7  ;;  %v2387_v41 = vadd.f32 %v2315_v25, %v2259_v44  ;;  %v3529_v20 = vld [vmem:[#allocation3 + $0xd0] sm:$0xff]  ;;  %v3721_v59 = vmul.f32 %v3689_v56, %v3657_v34 }
 0x370   :  { %3767 = vst.msk [vmem:[%s6855_s5 + $0x40] sm:$0xff] %vm7736_vm2, %v3735_v46  ;;  %v3623_v2 = vadd.f32 %v3584_v15, %v3495_v43  ;;  %4150 = vlog2.f32 %v3529_v20  ;;  %v3497_v7 = vld [vmem:[#allocation2 + $0xd0] sm:$0xff]  ;;  %v7750_v46 = vld [vmem:[#allocation146_spill] sm:$0xff]  ;;  %v7751_v15 = vld [vmem:[#allocation147_spill] sm:$0xff] }
 0x371   :  { %v3608_v14 = vadd.f32 %v3554_v1, %v3480_v35  ;;  %2419 = vst.msk [vmem:[#allocation3 + $0x58] sm:$0xff] %vm7740_vm5, %v2387_v41  ;;  %4152 = vpow2.f32 %v2178_v17  ;;  %v7752_v28 = vsub.f32 %v7750_v46, %v7751_v15  ;;  %v2229_v41 = vld [vmem:[#allocation3 + $0x68] sm:$0xff]  ;;  %v7762_v57 = vld [vmem:[#allocation68_spill] sm:$0xff]  ;;  %vm7767_vm2 = vmmov %vm7690_vm0 }
 0x372   :  { %v4143_v29 = vpop.eup %4142  ;;  %v3751_v0 = vsub.f32 %v3719_v5, %v3623_v2  ;;  %v2363_v38 = vpop.xlane.xlu0 %2362  ;;  %4154 = vpow2.f32 %v2210_v12  ;;  %v2245_v17 = vld [vmem:[#allocation3 + $0xe8] sm:$0xff]  ;;  %v2246_v48 = vld [vmem:[#allocation3 + $0xf0] sm:$0xff]  ;;  %vm7768_vm5 = vmmov %vm7690_vm0 }
 0x373   :  { %v3736_v52 = vsub.f32 %v3704_v60, %v3608_v14  ;;  %v3586_v36 = vmul.f32 0.6931472, %v4143_v29  ;;  %v2403_v13 = vadd.f32 %v2363_v38, %v2275_v55  ;;  %v4145_v32 = vpop.eup %4144  ;;  %v2212_v25 = vmul.f32 1.442695, %v7752_v28  ;;  %v3482_v29 = vld [vmem:[#allocation2 + $0x58] sm:$0xff]  ;;  %v3499_v28 = vld [vmem:[#allocation2 + $0xe0] sm:$0xff] }
 0x374   :  { %3783 = vst.msk [vmem:[%s6855_s5 + $0xc0] sm:$0xff] %vm7744_vm15, %v3751_v0  ;;  %v4147_v27 = vpop.eup %4146  ;;  %v2260_v39 = vmul.f32 %v4145_v32, %v2228_v53  ;;  %v3498_v32 = vld [vmem:[#allocation2 + $0xd8] sm:$0xff]  ;;  %vm7769_vm15 = vmmov %vm7690_vm0 }
 0x375   :  { %3768 = vst.msk [vmem:[%s6855_s5 + $0x48] sm:$0xff] %vm7745_vm6, %v3736_v52  ;;  %v3624_v22 = vadd.f32 %v3586_v36, %v3496_v62  ;;  %v2276_v40 = vmul.f32 %v4147_v27, %v2244_v3  ;;  %v3690_v36 = vld [vmem:[%s6854_s2 + $0xd8] sm:$0xff]  ;;  %v7757_v62 = vld [vmem:[#allocation148_spill] sm:$0xff]  ;;  %vm7770_vm6 = vmmov %vm7690_vm0 }
 0x376   :  { %2435 = vst.msk [vmem:[#allocation3 + $0xd8] sm:$0xff] %vm7746_vm8, %v2403_v13  ;;  %v3658_v13 = vld [vmem:[#allocation4 + $0xd8] sm:$0xff]  ;;  %v7758_v50 = vsub.f32 %v6254_v16, %v7757_v62  ;;  %vm7771_vm8 = vmmov %vm7690_vm0 }
 0x377   :  { %v3752_v31 = vsub.f32 %v3720_v42, %v3624_v22  ;;  %v3722_v53 = vmul.f32 %v3690_v36, %v3658_v13  ;;  %v7761_v27 = vld [vmem:[#allocation149_spill] sm:$0xff] }
 0x378   :  { %v3514_v33 = vld [vmem:[#allocation3 + $0x58] sm:$0xff]  ;;  %v2318_v6 = vpop.xlane.xlu1 %2317  ;;  %v2182_v9 = vmul.f32 1.442695, %v7758_v50  ;;  %v7763_v16 = vsub.f32 %v7761_v27, %v7762_v57  ;;  %v3485_v57 = vld [vmem:[#allocation2 + $0x70] sm:$0xff] }
 0x379   :  { %3784 = vst.msk [vmem:[%s6855_s5 + $0xc8] sm:$0xff] %vm7747_vm4, %v3752_v31  ;;  %4156 = vlog2.f32 %v3514_v33  ;;  %v4149_v49 = vpop.eup %4148  ;;  %v2388_v30 = vadd.f32 %v2318_v6, %v2260_v39  ;;  %v2230_v39 = vld [vmem:[#allocation3 + $0x70] sm:$0xff]  ;;  %vm7772_vm4 = vmmov %vm7690_vm0 }
 0x37a   :  { %v3556_v24 = vmul.f32 0.6931472, %v4149_v49  ;;  %v2214_v21 = vmul.f32 1.442695, %v7763_v16 }
 0x37b   :  { %2420 = vst.msk [vmem:[#allocation3 + $0x60] sm:$0xff] %vm7690_vm0, %v2388_v30 }
 0x37c   :  { %v3609_v19 = vadd.f32 %v3556_v24, %v3481_v47  ;;  %v2366_v4 = vpop.xlane.xlu1 %2365  ;;  %v3643_v47 = vld [vmem:[#allocation4 + $0x60] sm:$0xff] }
 0x37d   :  { %v3530_v10 = vld [vmem:[#allocation3 + $0xd8] sm:$0xff]  ;;  %v4151_v54 = vpop.eup %4150  ;;  %v2404_v44 = vadd.f32 %v2366_v4, %v2276_v40 }
 0x37e   :  { %4158 = vlog2.f32 %v3530_v10  ;;  %v3737_v18 = vsub.f32 %v3705_v23, %v3609_v19  ;;  %v3588_v58 = vmul.f32 0.6931472, %v4151_v54  ;;  %v4153_v1 = vpop.eup %4152  ;;  %v3675_v23 = vld [vmem:[%s6854_s2 + $0x60] sm:$0xff] }
 0x37f   :  { %4160 = vpow2.f32 %v2180_v37  ;;  %2436 = vst.msk [vmem:[#allocation3 + $0xe0] sm:$0xff] %vm7754_vm12, %v2404_v44  ;;  %v4155_v35 = vpop.eup %4154  ;;  %v2261_v2 = vmul.f32 %v4153_v1, %v2229_v41  ;;  %v3483_v19 = vld [vmem:[#allocation2 + $0x60] sm:$0xff]  ;;  %v3707_v54 = vmul.f32 %v3675_v23, %v3643_v47  ;;  %v2231_v41 = vld [vmem:[#allocation3 + $0x78] sm:$0xff]  ;;  %v3501_v23 = vld [vmem:[#allocation2 + $0xf0] sm:$0xff] }
 0x380   :  { %3769 = vst.msk [vmem:[%s6855_s5 + $0x50] sm:$0xff] %vm7753_vm13, %v3737_v18  ;;  %v3625_v43 = vadd.f32 %v3588_v58, %v3497_v7  ;;  %4162 = vpow2.f32 %v2212_v25  ;;  %v2277_v38 = vmul.f32 %v4155_v35, %v2245_v17  ;;  %v3691_v18 = vld [vmem:[%s6854_s2 + $0xe0] sm:$0xff]  ;;  %v3676_v35 = vld [vmem:[%s6854_s2 + $0x68] sm:$0xff]  ;;  %v2247_v17 = vld [vmem:[#allocation3 + $0xf8] sm:$0xff] }
 0x381   :  { %v3659_v58 = vld [vmem:[#allocation4 + $0xe0] sm:$0xff]  ;;  %vm7773_vm13 = vmmov %vm7690_vm0 }
 0x382   :  { %v3753_v5 = vsub.f32 %v3721_v59, %v3625_v43  ;;  %v3515_v60 = vld [vmem:[#allocation3 + $0x60] sm:$0xff]  ;;  %v3723_v25 = vmul.f32 %v3691_v18, %v3659_v58  ;;  %v3694_v18 = vld [vmem:[%s6854_s2 + $0xf8] sm:$0xff]  ;;  %vm7774_vm12 = vmmov %vm7690_vm0 }
 0x383   :  { %4164 = vlog2.f32 %v3515_v60  ;;  %v3662_v58 = vld [vmem:[#allocation4 + $0xf8] sm:$0xff] }
 0x384   :  { %3785 = vst.msk [vmem:[%s6855_s5 + $0xd0] sm:$0xff] %vm7755_vm3, %v3753_v5  ;;  %vm7775_vm3 = vmmov %vm7690_vm0 }
 0x386   :  { %v4157_v20 = vpop.eup %4156  ;;  %v2321_v11 = vpop.xlane.xlu0 %2320  ;;  %v3531_v8 = vld [vmem:[#allocation3 + $0xe0] sm:$0xff] }
 0x387   :  { %v3558_v14 = vmul.f32 0.6931472, %v4157_v20  ;;  %v2389_v55 = vadd.f32 %v2321_v11, %v2261_v2  ;;  %4166 = vlog2.f32 %v3531_v8  ;;  %v3644_v2 = vld [vmem:[#allocation4 + $0x68] sm:$0xff] }
 0x388   :  { %4168 = vpow2.f32 %v2182_v9  ;;  %v3708_v8 = vmul.f32 %v3676_v35, %v3644_v2  ;;  %v3500_v9 = vld [vmem:[#allocation2 + $0xe8] sm:$0xff] }
 0x389   :  { %v3610_v0 = vadd.f32 %v3558_v14, %v3482_v29  ;;  %2421 = vst.msk [vmem:[#allocation3 + $0x68] sm:$0xff] %vm7756_vm11, %v2389_v55  ;;  %v3484_v14 = vld [vmem:[#allocation2 + $0x68] sm:$0xff] }
 0x38a   :  { %v2369_v51 = vpop.xlane.xlu0 %2368 }
 0x38b   :  { %v4159_v52 = vpop.eup %4158  ;;  %v3738_v12 = vsub.f32 %v3706_v63, %v3610_v0  ;;  %v2405_v22 = vadd.f32 %v2369_v51, %v2277_v38  ;;  %v3692_v38 = vld [vmem:[%s6854_s2 + $0xe8] sm:$0xff] }
 0x38c   :  { %v3590_v42 = vmul.f32 0.6931472, %v4159_v52  ;;  %v4161_v33 = vpop.eup %4160  ;;  %v3660_v52 = vld [vmem:[#allocation4 + $0xe8] sm:$0xff] }
 0x38d   :  { %3770 = vst.msk [vmem:[%s6855_s5 + $0x58] sm:$0xff] %vm7759_vm9, %v3738_v12  ;;  %v4163_v3 = vpop.eup %4162  ;;  %v2262_v24 = vmul.f32 %v4161_v33, %v2230_v39  ;;  %v3724_v12 = vmul.f32 %v3692_v38, %v3660_v52  ;;  %v3645_v33 = vld [vmem:[#allocation4 + $0x70] sm:$0xff] }
 0x38e   :  { %v3626_v31 = vadd.f32 %v3590_v42, %v3498_v32  ;;  %2437 = vst.msk [vmem:[#allocation3 + $0xe8] sm:$0xff] %vm7760_vm1, %v2405_v22  ;;  %v2278_v34 = vmul.f32 %v4163_v3, %v2246_v48  ;;  %v3661_v3 = vld [vmem:[#allocation4 + $0xf0] sm:$0xff] }
 0x390   :  { %v3754_v49 = vsub.f32 %v3722_v53, %v3626_v31  ;;  %v3516_v6 = vld [vmem:[#allocation3 + $0x68] sm:$0xff]  ;;  %v4165_v30 = vpop.eup %4164  ;;  %v2324_v10 = vpop.xlane.xlu1 %2323  ;;  %v3677_v31 = vld [vmem:[%s6854_s2 + $0x70] sm:$0xff] }
 0x391   :  { %4170 = vlog2.f32 %v3516_v6  ;;  %v3560_v61 = vmul.f32 0.6931472, %v4165_v30  ;;  %v2390_v37 = vadd.f32 %v2324_v10, %v2262_v24  ;;  %v3709_v16 = vmul.f32 %v3677_v31, %v3645_v33  ;;  %v3693_v6 = vld [vmem:[%s6854_s2 + $0xf0] sm:$0xff] }
 0x392   :  { %3786 = vst.msk [vmem:[%s6855_s5 + $0xd8] sm:$0xff] %vm7764_vm10, %v3754_v49  ;;  %4172 = vpow2.f32 %v2214_v21  ;;  %v3725_v47 = vmul.f32 %v3693_v6, %v3661_v3 }
 0x393   :  { %v3611_v56 = vadd.f32 %v3560_v61, %v3483_v19  ;;  %2422 = vst.msk [vmem:[#allocation3 + $0x70] sm:$0xff] %vm7765_vm7, %v2390_v37  ;;  %v3678_v37 = vld [vmem:[%s6854_s2 + $0x78] sm:$0xff] }
 0x394   :  { %v4167_v4 = vpop.eup %4166  ;;  %v2372_v44 = vpop.xlane.xlu1 %2371  ;;  %v3646_v19 = vld [vmem:[#allocation4 + $0x78] sm:$0xff] }
 0x395   :  { %v3532_v40 = vld [vmem:[#allocation3 + $0xe8] sm:$0xff]  ;;  %v3739_v7 = vsub.f32 %v3707_v54, %v3611_v56  ;;  %v3592_v46 = vmul.f32 0.6931472, %v4167_v4  ;;  %v2406_v15 = vadd.f32 %v2372_v44, %v2278_v34  ;;  %v4169_v43 = vpop.eup %4168  ;;  %v3486_v54 = vld [vmem:[#allocation2 + $0x78] sm:$0xff]  ;;  %v3710_v56 = vmul.f32 %v3678_v37, %v3646_v19 }
 0x396   :  { %4174 = vlog2.f32 %v3532_v40  ;;  %v2263_v20 = vmul.f32 %v4169_v43, %v2231_v41 }
 0x397   :  { %3771 = vst.msk [vmem:[%s6855_s5 + $0x60] sm:$0xff] %vm7766_vm14, %v3739_v7  ;;  %v3627_v59 = vadd.f32 %v3592_v46, %v3499_v28  ;;  %v3502_v46 = vld [vmem:[#allocation2 + $0xf8] sm:$0xff] }
 0x398   :  { %2438 = vst.msk [vmem:[#allocation3 + $0xf0] sm:$0xff] %vm7767_vm2, %v2406_v15  ;;  %v3726_v15 = vmul.f32 %v3694_v18, %v3662_v58 }
 0x399   :  { %v3755_v1 = vsub.f32 %v3723_v25, %v3627_v59 }
 0x39a   :  { %v3517_v5 = vld [vmem:[#allocation3 + $0x70] sm:$0xff] }
 0x39b   :  { %3787 = vst.msk [vmem:[%s6855_s5 + $0xe0] sm:$0xff] %vm7768_vm5, %v3755_v1  ;;  %4176 = vlog2.f32 %v3517_v5 }
 0x39e   :  { %v4171_v60 = vpop.eup %4170  ;;  %v2327_v11 = vpop.xlane.xlu0 %2326 }
 0x39f   :  { %v4173_v26 = vpop.eup %4172  ;;  %v3562_v45 = vmul.f32 0.6931472, %v4171_v60  ;;  %v3533_v55 = vld [vmem:[#allocation3 + $0xf0] sm:$0xff]  ;;  %v2391_v29 = vadd.f32 %v2327_v11, %v2263_v20 }
 0x3a0   :  { %4178 = vlog2.f32 %v3533_v55  ;;  %v2279_v36 = vmul.f32 %v4173_v26, %v2247_v17 }
 0x3a1   :  { %v3612_v63 = vadd.f32 %v3562_v45, %v3484_v14  ;;  %2423 = vst.msk [vmem:[#allocation3 + $0x78] sm:$0xff] %vm7769_vm15, %v2391_v29 }
 0x3a2   :  { %v2375_v50 = vpop.xlane.xlu0 %2374 }
 0x3a3   :  { %v4175_v0 = vpop.eup %4174  ;;  %v3740_v13 = vsub.f32 %v3708_v8, %v3612_v63  ;;  %v2407_v51 = vadd.f32 %v2375_v50, %v2279_v36 }
 0x3a4   :  { %v3594_v62 = vmul.f32 0.6931472, %v4175_v0 }
 0x3a5   :  { %3772 = vst.msk [vmem:[%s6855_s5 + $0x68] sm:$0xff] %vm7770_vm6, %v3740_v13 }
 0x3a6   :  { %v3628_v42 = vadd.f32 %v3594_v62, %v3500_v9  ;;  %2439 = vst.msk [vmem:[#allocation3 + $0xf8] sm:$0xff] %vm7771_vm8, %v2407_v51 }
 0x3a8   :  { %v3756_v22 = vsub.f32 %v3724_v12, %v3628_v42  ;;  %v3518_v32 = vld [vmem:[#allocation3 + $0x78] sm:$0xff]  ;;  %v4177_v53 = vpop.eup %4176 }
 0x3a9   :  { %4180 = vlog2.f32 %v3518_v32  ;;  %v3564_v27 = vmul.f32 0.6931472, %v4177_v53 }
 0x3aa   :  { %3788 = vst.msk [vmem:[%s6855_s5 + $0xe8] sm:$0xff] %vm7772_vm4, %v3756_v22 }
 0x3ab   :  { %v3613_v21 = vadd.f32 %v3564_v27, %v3485_v57 }
 0x3ad   :  { %v3534_v39 = vld [vmem:[#allocation3 + $0xf8] sm:$0xff]  ;;  %v4179_v49 = vpop.eup %4178  ;;  %v3741_v24 = vsub.f32 %v3709_v16, %v3613_v21 }
 0x3ae   :  { %4182 = vlog2.f32 %v3534_v39  ;;  %v3596_v30 = vmul.f32 0.6931472, %v4179_v49 }
 0x3af   :  { %3773 = vst.msk [vmem:[%s6855_s5 + $0x70] sm:$0xff] %vm7690_vm0, %v3741_v24 }
 0x3b0   :  { %v3629_v10 = vadd.f32 %v3596_v30, %v3501_v23 }
 0x3b2   :  { %v3757_v48 = vsub.f32 %v3725_v47, %v3629_v10 }
 0x3b4   :  { %3789 = vst.msk [vmem:[%s6855_s5 + $0xf0] sm:$0xff] %vm7773_vm13, %v3757_v48 }
 0x3b6   :  { %v4181_v61 = vpop.eup %4180 }
 0x3b7   :  { %v3566_v40 = vmul.f32 0.6931472, %v4181_v61 }
 0x3b9   :  { %v3614_v34 = vadd.f32 %v3566_v40, %v3486_v54 }
 0x3bb   :  { %v4183_v4 = vpop.eup %4182  ;;  %v3742_v44 = vsub.f32 %v3710_v56, %v3614_v34 }
 0x3bc   :  { %v3598_v7 = vmul.f32 0.6931472, %v4183_v4 }
 0x3bd   :  { %3774 = vst.msk [vmem:[%s6855_s5 + $0x78] sm:$0xff] %vm7774_vm12, %v3742_v44 }
 0x3be   :  { %v3630_v28 = vadd.f32 %v3598_v7, %v3502_v46 }
 0x3c0   :  { %v3758_v25 = vsub.f32 %v3726_v15, %v3630_v28 }
 0x3c2   :  { %3790 = vst.msk [vmem:[%s6855_s5 + $0xf8] sm:$0xff] %vm7775_vm3, %v3758_v25 }

</bundles_post_ra>
